<compile_context>
chip_gen: v6e
topology: v6e:2x2x1
jax: 0.10.0
libtpu: 0.0.40
codegen_flags: <defaults>
</compile_context>

<pallas_src>
import functools

import jax
import jax.numpy as jnp
from jax import lax
from jax.experimental import pallas as pl
from jax.experimental.pallas import tpu as pltpu

LANE = 128
_MAX_TM = 2048   # row-tile cap: keeps double-buffered in/out blocks well under the
                 # scoped-VMEM defaults (16 MiB v5e, 32 MiB v6e/v7x) at any batch.

_NUM_TC = None


def _round_up(x, m):
    return ((x + m - 1) // m) * m


def _num_tensorcores():
    """v7x has 2 TensorCores per chip; v5e/v6e have 1 (best-effort detection)."""
    global _NUM_TC
    if _NUM_TC is None:
        try:
            kind = jax.devices()[0].device_kind.lower()
            _NUM_TC = 2 if "v7" in kind else 1
        except Exception:
            _NUM_TC = 1
    return _NUM_TC


def _pick_m_tiling(m, rows_per_out=1):
    """steps=1 on single-TC chips, steps=num_TC on v7x when the rows split
    16-aligned; cap the tile so (rows_per_out*tm, K) bf16 blocks stay VMEM-safe."""
    cap = max(_MAX_TM // rows_per_out, 16)
    target = max(_num_tensorcores(), -(-m // cap))
    if target <= 1:
        return 1, m
    for steps in range(target, 4 * target + 1):
        tm = m // steps
        if m % steps == 0 and tm % 16 == 0 and tm <= cap:
            return steps, tm
    return 1, m   # fallback: single full-M block (always legal: block == array dim)


# ----------------------------------------------------------------------------
# Pallas kernel: chain of fused (matmul + shift [+ ReLU]) layers, with an
# optional fused 2x2 MaxPool on the first layer (4 window positions on the
# leading axis of the input block).
# refs = (x, w_0, b_0, w_1, b_1, ..., out)
# ----------------------------------------------------------------------------
def _matmul_chain_kernel(*refs, relu_flags, pool_first):
    x_ref = refs[0]
    o_ref = refs[-1]
    w0 = refs[1][...]
    b0 = refs[2][...]
    if pool_first:
        # MaxPool fused into the epilogue: max over the 4 window positions
        # commutes with the (folded) affine shift and the ReLU.
        h = jnp.dot(x_ref[0].astype(jnp.bfloat16), w0,
                    preferred_element_type=jnp.float32)
        for p in range(1, 4):
            h = jnp.maximum(
                h, jnp.dot(x_ref[p].astype(jnp.bfloat16), w0,
                           preferred_element_type=jnp.float32))
    else:
        h = jnp.dot(x_ref[...].astype(jnp.bfloat16), w0,
                    preferred_element_type=jnp.float32)
    h = h + b0
    if relu_flags[0]:
        h = jnp.maximum(h, 0.0)
    for l in range(1, len(relu_flags)):
        w_ref = refs[1 + 2 * l]
        b_ref = refs[2 + 2 * l]
        h = jnp.dot(h.astype(jnp.bfloat16), w_ref[...],
                    preferred_element_type=jnp.float32) + b_ref[...]
        if relu_flags[l]:
            h = jnp.maximum(h, 0.0)
    o_ref[...] = h.astype(o_ref.dtype)


def matmul_chain(x, layers, out_dtype, pool_first=False):
    """y = layer_n(...layer_0(x)), layer(h) = maybe_relu(h @ w + b).

    x: (M, K0) or, when pool_first, (4, M, K0) with the 2x2 pooling window on
    the leading axis.  layers: sequence of (w_bf16 (K_l, N_l), shift_f32
    (1, N_l), relu) with N_l == K_{l+1} and every N_l a multiple of 128
    (lane-dense stores).  One pallas_call: all weights resident in VMEM, rows
    tiled over a 1-D grid sized for the chip generation.
    """
    if pool_first:
        win, m, k = x.shape
        assert win == 4, x.shape
    else:
        m, k = x.shape
    steps, tm = _pick_m_tiling(m, rows_per_out=4 if pool_first else 1)
    relu_flags = tuple(bool(r) for (_, _, r) in layers)
    n_out = layers[-1][0].shape[1]

    if pool_first:
        in_specs = [pl.BlockSpec((4, tm, k), lambda i: (0, i, 0))]
    else:
        in_specs = [pl.BlockSpec((tm, k), lambda i: (i, 0))]
    args = [x]

    flops = 0
    bytes_accessed = x.size * x.dtype.itemsize + m * n_out * jnp.dtype(out_dtype).itemsize
    vmem_est = 2 * ((4 * tm) if pool_first else tm) * k * x.dtype.itemsize
    vmem_est += 2 * tm * n_out * jnp.dtype(out_dtype).itemsize

    k_cur = k
    for li, (w, b, _) in enumerate(layers):
        kin, n = w.shape
        assert kin == k_cur and b.shape == (1, n), (w.shape, b.shape, k_cur)
        in_specs.append(pl.BlockSpec((kin, n), lambda i: (0, 0)))
        in_specs.append(pl.BlockSpec((1, n), lambda i: (0, 0)))
        args.append(w)
        args.append(b)
        mult = 4 if (pool_first and li == 0) else 1
        flops += 2 * m * kin * n * mult
        wb = w.size * w.dtype.itemsize + b.size * b.dtype.itemsize
        bytes_accessed += wb
        vmem_est += wb
        k_cur = n

    vmem_limit = None
    if vmem_est > (12 << 20):
        vmem_limit = min(64 << 20, int(vmem_est * 1.5) + (2 << 20))

    return pl.pallas_call(
        functools.partial(_matmul_chain_kernel, relu_flags=relu_flags,
                          pool_first=pool_first),
        out_shape=jax.ShapeDtypeStruct((m, n_out), out_dtype),
        grid=(steps,),
        in_specs=in_specs,
        out_specs=pl.BlockSpec((tm, n_out), lambda i: (i, 0)),
        compiler_params=pltpu.CompilerParams(
            dimension_semantics=("parallel",),
            vmem_limit_bytes=vmem_limit),
        cost_estimate=pl.CostEstimate(flops=int(flops), transcendentals=0,
                                      bytes_accessed=int(bytes_accessed)),
    )(*args)


# ----------------------------------------------------------------------------
# One-time parameter folding / padding (hoisted OUT of the forward)
# ----------------------------------------------------------------------------
def _fold_bn(bias, bn):
    """Fold conv/linear bias + eval-mode BatchNorm into (scale, shift)."""
    if bn is None:
        return jnp.ones_like(bias), bias
    s = bn["gamma"] * lax.rsqrt(bn["var"] + bn["eps"])
    return s, (bias - bn["mean"]) * s + bn["beta"]


def _prep_layer(w_in_by_out, bias, bn, relu, k_total=None):
    """w_in_by_out: (K, N), rows = input features.  Fold BN scale into columns,
    zero-pad rows up to k_total (to match a padded upstream output) and columns
    to a multiple of 128 (lane-dense stores); cast the weight to bf16."""
    k, n = w_in_by_out.shape
    if k_total is None:
        k_total = k
    s, t = _fold_bn(bias, bn)
    w = w_in_by_out * s[None, :]
    np_ = _round_up(n, LANE)
    w = jnp.pad(w, ((0, k_total - k), (0, np_ - n))).astype(jnp.bfloat16)
    t = jnp.pad(t, (0, np_ - n)).reshape(1, np_).astype(jnp.float32)
    return (w, t, relu)


def _prep_conv(p_conv, bn):
    w = p_conv["w"]                                   # (O, Cin, k, k) torch layout
    o, cin, k, _ = w.shape
    w2 = jnp.transpose(w, (2, 3, 1, 0)).reshape(k * k * cin, o)   # rows=(kh,kw,cin)
    return {"layer": _prep_layer(w2, p_conv["b"], bn, True), "k": k, "cout": o}


def _prep_mlp_head(params, hh, ww, cpad):
    # m1: PyTorch flattens NCHW (c,h,w); activations here are NHWC, so permute
    # the weight's input rows from (c,h,w) to (h,w,c).  Rows are additionally
    # padded per-pixel up to cpad (conv4's padded output width) so the padded
    # zero-lanes of the conv4 output can be fed straight in (no slice copy).
    m1w = params["m1"]["w"]                           # (256, cc*hh*ww)
    out_dim = m1w.shape[0]
    cc = m1w.shape[1] // (hh * ww)
    w1 = jnp.transpose(m1w.reshape(out_dim, cc, hh, ww), (2, 3, 1, 0))  # (h,w,c,256)
    w1 = jnp.pad(w1, ((0, 0), (0, 0), (0, cpad - cc), (0, 0)))
    w1 = w1.reshape(hh * ww * cpad, out_dim)
    l1 = _prep_layer(w1, params["m1"]["b"], params["mbn1"], True)
    l2 = _prep_layer(params["m2"]["w"].T, params["m2"]["b"], params["mbn2"], True,
                     k_total=l1[0].shape[1])

    # mean1 | logvar1 share the same input -> one lane-dense (.., 128) matmul
    w3 = jnp.concatenate([params["mean1"]["w"].T, params["lv1"]["w"].T], axis=1)
    b3 = jnp.concatenate([params["mean1"]["b"], params["lv1"]["b"]])
    bn3 = {kk: jnp.concatenate([params["meanbn1"][kk], params["lvbn1"][kk]])
           for kk in ("gamma", "beta", "mean", "var")}
    bn3["eps"] = params["meanbn1"]["eps"]
    l3 = _prep_layer(w3, b3, bn3, True)

    # mean2 | logvar2 as one block-diagonal matmul; cols [0:nhid]=mean,
    # [nhid:2*nhid]=logvar, rest zero-padded (lane-dense output).
    nhid = params["mean2"]["w"].shape[0]
    h1 = params["mean2"]["w"].shape[1]
    w4 = jnp.zeros((2 * h1, 2 * nhid), jnp.float32)
    w4 = w4.at[:h1, :nhid].set(params["mean2"]["w"].T)
    w4 = w4.at[h1:, nhid:].set(params["lv2"]["w"].T)
    b4 = jnp.concatenate([params["mean2"]["b"], params["lv2"]["b"]])
    l4 = _prep_layer(w4, b4, None, False, k_total=l3[0].shape[1])
    return {"l1": l1, "l2": l2, "l3": l3, "l4": l4, "nhid": nhid}


def prepare_encoder_params(params, shape):
    """Run once: fold BN, transpose, pad, cast.  Returns arrays + Python ints."""
    _, h, w = shape
    ww = ((w - 8) // 2 - 4) // 2
    hh = ((h - 8) // 2 - 4) // 2
    prep = {
        "c1": _prep_conv(params["c1"], params["bn1"]),
        "c2": _prep_conv(params["c2"], params["bn2"]),
        "c3": _prep_conv(params["c3"], params["bn3"]),
        "c4": _prep_conv(params["c4"], params["bn4"]),
    }
    cpad = prep["c4"]["layer"][0].shape[1]            # conv4 padded output width
    prep.update(_prep_mlp_head(params, hh, ww, cpad))
    return prep


# ----------------------------------------------------------------------------
# Plain-JAX glue (patch extraction only; no K zero-slab padding)
# ----------------------------------------------------------------------------
def _im2col(x, k):
    """x: (N,H,W,C) NHWC, valid conv.  Returns ((N*Ho*Wo, k*k*C), (N,Ho,Wo));
    columns ordered (kh, kw, c)."""
    n, h, w, c = x.shape
    ho, wo = h - k + 1, w - k + 1
    cols = [x[:, i:i + ho, j:j + wo, :] for i in range(k) for j in range(k)]
    patches = jnp.concatenate(cols, axis=-1)
    return patches.reshape(n * ho * wo, k * k * c), (n, ho, wo)


def _im2col_pooled(x, k):
    """Patches for a valid k x k conv followed by MaxPool2d(2,2).  The 4 conv
    output positions of each pooling window live on the leading axis so the
    Pallas kernel can fuse the pool into the matmul epilogue (the un-pooled
    activation never hits HBM).  Returns ((4, N*Hp*Wp, k*k*C), (N, Hp, Wp))."""
    n, h, w, c = x.shape
    ho, wo = h - k + 1, w - k + 1
    hp, wp = ho // 2, wo // 2        # PyTorch MaxPool2d floor behaviour
    groups = []
    for wi in range(2):
        for wj in range(2):
            taps = [x[:, wi + di: wi + di + 2 * hp: 2,
                       wj + dj: wj + dj + 2 * wp: 2, :]
                    for di in range(k) for dj in range(k)]
            groups.append(jnp.concatenate(taps, axis=-1)
                          .reshape(n * hp * wp, k * k * c))
    return jnp.stack(groups, axis=0), (n, hp, wp)


# ----------------------------------------------------------------------------
# Encoder forward (mirrors the PyTorch module, eval-mode BN)
# ----------------------------------------------------------------------------
def _encoder_forward(prep, x_nchw, y):
    x = jnp.transpose(x_nchw, (0, 2, 3, 1)).astype(jnp.bfloat16)   # NCHW -> NHWC

    def conv(xa, cfg):                      # Conv + BN + ReLU
        p, (n, ho, wo) = _im2col(xa, cfg["k"])
        h = matmul_chain(p, [cfg["layer"]], jnp.bfloat16)
        return h[:, :cfg["cout"]].reshape(n, ho, wo, cfg["cout"])

    def conv_pool(xa, cfg, keep_pad=False):  # Conv + BN + ReLU + fused MaxPool
        p, (n, hp, wp) = _im2col_pooled(xa, cfg["k"])
        h = matmul_chain(p, [cfg["layer"]], jnp.bfloat16, pool_first=True)
        if keep_pad:                         # (n, hp*wp*cpad), (h,w,c) ordering
            return h.reshape(n, hp * wp * h.shape[1])
        return h[:, :cfg["cout"]].reshape(n, hp, wp, cfg["cout"])

    x = conv(x, prep["c1"])                       # Conv 5x5 + BN + ReLU
    x = conv_pool(x, prep["c2"])                  # Conv 5x5 + BN + ReLU + MaxPool
    x = conv(x, prep["c3"])                       # Conv 3x3 + BN + ReLU
    x_flat = conv_pool(x, prep["c4"], keep_pad=True)   # Conv + BN + ReLU + Pool + Flatten

    l1, l2, l3, l4 = prep["l1"], prep["l2"], prep["l3"], prep["l4"]
    nhid = prep["nhid"]

    if y is None:
        # Entire MLP + both heads fused into ONE kernel (weights resident in VMEM).
        out = matmul_chain(x_flat, [l1, l2, l3, l4], jnp.float32)
    else:
        h = matmul_chain(x_flat, [l1, l2], jnp.bfloat16)
        h = jnp.concatenate([h, y.astype(jnp.bfloat16)], axis=1)
        out = matmul_chain(h, [l3, l4], jnp.float32)

    return out[:, :nhid], out[:, nhid:2 * nhid]


def build_encoder(params, shape):
    """One-time prep (outside the hot path) + jitted forward closure."""
    prep = prepare_encoder_params(params, shape)

    def forward(x, y=None):
        return _encoder_forward(prep, x, y)

    return jax.jit(forward)


# ----------------------------------------------------------------------------
# Pure-JAX f32 reference (independent path, for correctness checking)
# ----------------------------------------------------------------------------
def _bn_ref(x, bn, axis):
    shape = [1] * x.ndim
    shape[axis] = -1
    s = bn["gamma"] * lax.rsqrt(bn["var"] + bn["eps"])
    t = bn["beta"] - bn["mean"] * s
    return x * s.reshape(shape) + t.reshape(shape)


def reference_forward(params, x, y=None):
    def conv(v, p):
        out = lax.conv_general_dilated(v, p["w"], (1, 1), "VALID",
                                       dimension_numbers=("NCHW", "OIHW", "NCHW"))
        return out + p["b"].reshape(1, -1, 1, 1)

    def pool(v):
        n, c, h, w = v.shape
        return v.reshape(n, c, h // 2, 2, w // 2, 2).max(axis=(3, 5))

    relu = lambda v: jnp.maximum(v, 0.0)
    lin = lambda v, p: v @ p["w"].T + p["b"]

    h = relu(_bn_ref(conv(x, params["c1"]), params["bn1"], 1))
    h = relu(_bn_ref(conv(h, params["c2"]), params["bn2"], 1))
    h = pool(h)
    h = relu(_bn_ref(conv(h, params["c3"]), params["bn3"], 1))
    h = relu(_bn_ref(conv(h, params["c4"]), params["bn4"], 1))
    h = pool(h)
    h = h.reshape(h.shape[0], -1)                         # NCHW flatten
    h = relu(_bn_ref(lin(h, params["m1"]), params["mbn1"], 1))
    h = relu(_bn_ref(lin(h, params["m2"]), params["mbn2"], 1))
    if y is not None:
        h = jnp.concatenate([h, y], axis=1)
    hm = relu(_bn_ref(lin(h, params["mean1"]), params["meanbn1"], 1))
    hl = relu(_bn_ref(lin(h, params["lv1"]), params["lvbn1"], 1))
    return lin(hm, params["mean2"]), lin(hl, params["lv2"])


# ----------------------------------------------------------------------------
# Deterministic parameter construction (shapes match Encoder.__init__)
# ----------------------------------------------------------------------------
def build_params(key, shape, nhid=16, ncond=0):
    c, h, w = shape
    ww = ((w - 8) // 2 - 4) // 2
    hh = ((h - 8) // 2 - 4) // 2
    flat = ww * hh * 64

    keys = iter(jax.random.split(key, 80))

    def conv(ci, co, k):
        return {
            "w": jax.random.normal(next(keys), (co, ci, k, k), jnp.float32)
            * (1.0 / jnp.sqrt(ci * k * k)),
            "b": 0.01 * jax.random.normal(next(keys), (co,), jnp.float32),
        }

    def lin(i, o):
        return {
            "w": jax.random.normal(next(keys), (o, i), jnp.float32)
            * (1.0 / jnp.sqrt(i)),
            "b": 0.01 * jax.random.normal(next(keys), (o,), jnp.float32),
        }

    def bn(n):
        return {
            "gamma": 1.0 + 0.05 * jax.random.normal(next(keys), (n,), jnp.float32),
            "beta": 0.05 * jax.random.normal(next(keys), (n,), jnp.float32),
            "mean": 0.05 * jax.random.normal(next(keys), (n,), jnp.float32),
            "var": jnp.abs(1.0 + 0.05 * jax.random.normal(next(keys), (n,), jnp.float32)),
            "eps": 1e-5,
        }

    return {
        "c1": conv(c, 16, 5), "bn1": bn(16),
        "c2": conv(16, 32, 5), "bn2": bn(32),
        "c3": conv(32, 64, 3), "bn3": bn(64),
        "c4": conv(64, 64, 3), "bn4": bn(64),
        "m1": lin(flat, 256), "mbn1": bn(256),
        "m2": lin(256, 128), "mbn2": bn(128),
        "mean1": lin(128 + ncond, 64), "meanbn1": bn(64),
        "mean2": lin(64, nhid),
        "lv1": lin(128 + ncond, 64), "lvbn1": bn(64),
        "lv2": lin(64, nhid),
    }


# ----------------------------------------------------------------------------
if __name__ == "__main__":
    shape = (3, 28, 28)   # (c, h, w) -> ww = hh = 3, flat = 576
    nhid = 16
    batch = 2

    key = jax.random.PRNGKey(0)
    kx, kp = jax.random.split(key)
    x = jax.random.normal(kx, (batch,) + shape, dtype=jnp.float32)
    params = build_params(kp, shape, nhid=nhid, ncond=0)

    fwd = build_encoder(params, shape)      # one-time BN folding / padding / bf16 cast
    mean, logvar = fwd(x)
    mean = jax.block_until_ready(mean)
    logvar = jax.block_until_ready(logvar)

    assert mean.shape == (batch, nhid), mean.shape
    assert logvar.shape == (batch, nhid), logvar.shape
    assert jnp.all(jnp.isfinite(mean)) and jnp.all(jnp.isfinite(logvar))

    # Correctness vs an independent pure-JAX f32 reference (bf16 MXU inputs ->
    # loose tolerance).
    mean_ref, logvar_ref = reference_forward(params, x)
    for got, ref in ((mean, mean_ref), (logvar, logvar_ref)):
        err = jnp.max(jnp.abs(got - ref))
        tol = 0.05 + 0.05 * jnp.max(jnp.abs(ref))
        assert err <= tol, (float(err), float(tol))

    print("KERNEL_OK")
</pallas_src>

<mosaic_0001>
module attributes {stable_mosaic.version = 11 : i64} {
  func.func @_matmul_chain_kernel(%arg0: i32, %arg1: memref<1152x75xbf16, #tpu.memory_space<vmem>>, %arg2: memref<75x128xbf16, #tpu.memory_space<vmem>>, %arg3: memref<1x128xf32, #tpu.memory_space<vmem>>, %arg4: memref<1152x128xbf16, #tpu.memory_space<vmem>>) attributes {dimension_semantics = [#tpu.dimension_semantics<parallel>], iteration_bounds = array<i64: 1>, scalar_prefetch = 0 : i64, scratch_operands = 0 : i64, tpu.core_type = #tpu.core_type<tc>, window_params = [{transform_indices = @transform_0, window_bounds = array<i64: 1152, 75>}, {pipeline_mode = #tpu.pipeline_mode<synchronous>, transform_indices = @transform_1, window_bounds = array<i64: 75, 128>}, {pipeline_mode = #tpu.pipeline_mode<synchronous>, transform_indices = @transform_2, window_bounds = array<i64: 1, 128>}, {transform_indices = @transform_3, window_bounds = array<i64: 1152, 128>}]} {
    %c0 = arith.constant 0 : index
    %c0_0 = arith.constant 0 : index
    %0 = vector.load %arg2[%c0, %c0_0] : memref<75x128xbf16, #tpu.memory_space<vmem>>, vector<75x128xbf16>
    %c0_1 = arith.constant 0 : index
    %c0_2 = arith.constant 0 : index
    %1 = vector.load %arg3[%c0_1, %c0_2] : memref<1x128xf32, #tpu.memory_space<vmem>>, vector<1x128xf32>
    %c0_3 = arith.constant 0 : index
    %c0_4 = arith.constant 0 : index
    %2 = vector.load %arg1[%c0_3, %c0_4] : memref<1152x75xbf16, #tpu.memory_space<vmem>>, vector<1152x75xbf16>
    %cst = arith.constant dense<0.000000e+00> : vector<1152x128xf32>
    %3 = tpu.matmul %2, %0, %cst {dimension_numbers = #tpu.dot_dimension_numbers<[1], [0], [0], [1], [0, 0, 1, 1], [], []>} : vector<1152x75xbf16>, vector<75x128xbf16>, vector<1152x128xf32> -> vector<1152x128xf32>
    %4 = vector.broadcast %1 : vector<1x128xf32> to vector<1152x128xf32>
    %5 = arith.addf %3, %4 : vector<1152x128xf32>
    %cst_5 = arith.constant 0.000000e+00 : f32
    %6 = vector.broadcast %cst_5 : f32 to vector<1152x128xf32>
    %7 = arith.maximumf %5, %6 : vector<1152x128xf32>
    %8 = arith.truncf %7 : vector<1152x128xf32> to vector<1152x128xbf16>
    %c0_6 = arith.constant 0 : index
    %c0_7 = arith.constant 0 : index
    %9 = vector.load %arg4[%c0_6, %c0_7] : memref<1152x128xbf16, #tpu.memory_space<vmem>>, vector<1152x128xbf16>
    tpu.vector_store %arg4[%c0_6, %c0_7], %8 {strides = array<i32>} : memref<1152x128xbf16, #tpu.memory_space<vmem>>, vector<1152x128xbf16>,
    return
  }
  func.func @transform_0(%arg0: i32) -> (i32, i32) {
    %c0_i32 = arith.constant 0 : i32
    %c0_i32_0 = arith.constant 0 : i32
    return %arg0, %c0_i32 : i32, i32
  }
  func.func @transform_1(%arg0: i32) -> (i32, i32) {
    %c0_i32 = arith.constant 0 : i32
    %c0_i32_0 = arith.constant 0 : i32
    %c0_i32_1 = arith.constant 0 : i32
    return %c0_i32, %c0_i32_0 : i32, i32
  }
  func.func @transform_2(%arg0: i32) -> (i32, i32) {
    %c0_i32 = arith.constant 0 : i32
    %c0_i32_0 = arith.constant 0 : i32
    %c0_i32_1 = arith.constant 0 : i32
    return %c0_i32, %c0_i32_0 : i32, i32
  }
  func.func @transform_3(%arg0: i32) -> (i32, i32) {
    %c0_i32 = arith.constant 0 : i32
    %c0_i32_0 = arith.constant 0 : i32
    return %arg0, %c0_i32 : i32, i32
  }
}

module attributes {stable_mosaic.version = 11 : i64} {
  func.func @_matmul_chain_kernel(%arg0: i32, %arg1: memref<4x200x400xbf16, #tpu.memory_space<vmem>>, %arg2: memref<400x128xbf16, #tpu.memory_space<vmem>>, %arg3: memref<1x128xf32, #tpu.memory_space<vmem>>, %arg4: memref<200x128xbf16, #tpu.memory_space<vmem>>) attributes {dimension_semantics = [#tpu.dimension_semantics<parallel>], iteration_bounds = array<i64: 1>, scalar_prefetch = 0 : i64, scratch_operands = 0 : i64, tpu.core_type = #tpu.core_type<tc>, window_params = [{transform_indices = @transform_0, window_bounds = array<i64: 4, 200, 400>}, {pipeline_mode = #tpu.pipeline_mode<synchronous>, transform_indices = @transform_1, window_bounds = array<i64: 400, 128>}, {pipeline_mode = #tpu.pipeline_mode<synchronous>, transform_indices = @transform_2, window_bounds = array<i64: 1, 128>}, {transform_indices = @transform_3, window_bounds = array<i64: 200, 128>}]} {
    %c0 = arith.constant 0 : index
    %c0_0 = arith.constant 0 : index
    %0 = vector.load %arg2[%c0, %c0_0] : memref<400x128xbf16, #tpu.memory_space<vmem>>, vector<400x128xbf16>
    %c0_1 = arith.constant 0 : index
    %c0_2 = arith.constant 0 : index
    %1 = vector.load %arg3[%c0_1, %c0_2] : memref<1x128xf32, #tpu.memory_space<vmem>>, vector<1x128xf32>
    %c0_3 = arith.constant 0 : index
    %c0_4 = arith.constant 0 : index
    %c0_5 = arith.constant 0 : index
    %2 = vector.load %arg1[%c0_3, %c0_4, %c0_5] : memref<4x200x400xbf16, #tpu.memory_space<vmem>>, vector<1x200x400xbf16>
    %3 = vector.shape_cast %2 : vector<1x200x400xbf16> to vector<200x400xbf16>
    %cst = arith.constant dense<0.000000e+00> : vector<200x128xf32>
    %4 = tpu.matmul %3, %0, %cst {dimension_numbers = #tpu.dot_dimension_numbers<[1], [0], [0], [1], [0, 0, 1, 1], [], []>} : vector<200x400xbf16>, vector<400x128xbf16>, vector<200x128xf32> -> vector<200x128xf32>
    %c1 = arith.constant 1 : index
    %c0_6 = arith.constant 0 : index
    %c0_7 = arith.constant 0 : index
    %5 = vector.load %arg1[%c1, %c0_6, %c0_7] : memref<4x200x400xbf16, #tpu.memory_space<vmem>>, vector<1x200x400xbf16>
    %6 = vector.shape_cast %5 : vector<1x200x400xbf16> to vector<200x400xbf16>
    %cst_8 = arith.constant dense<0.000000e+00> : vector<200x128xf32>
    %7 = tpu.matmul %6, %0, %cst_8 {dimension_numbers = #tpu.dot_dimension_numbers<[1], [0], [0], [1], [0, 0, 1, 1], [], []>} : vector<200x400xbf16>, vector<400x128xbf16>, vector<200x128xf32> -> vector<200x128xf32>
    %8 = arith.maximumf %4, %7 : vector<200x128xf32>
    %c2 = arith.constant 2 : index
    %c0_9 = arith.constant 0 : index
    %c0_10 = arith.constant 0 : index
    %9 = vector.load %arg1[%c2, %c0_9, %c0_10] : memref<4x200x400xbf16, #tpu.memory_space<vmem>>, vector<1x200x400xbf16>
    %10 = vector.shape_cast %9 : vector<1x200x400xbf16> to vector<200x400xbf16>
    %cst_11 = arith.constant dense<0.000000e+00> : vector<200x128xf32>
    %11 = tpu.matmul %10, %0, %cst_11 {dimension_numbers = #tpu.dot_dimension_numbers<[1], [0], [0], [1], [0, 0, 1, 1], [], []>} : vector<200x400xbf16>, vector<400x128xbf16>, vector<200x128xf32> -> vector<200x128xf32>
    %12 = arith.maximumf %8, %11 : vector<200x128xf32>
    %c3 = arith.constant 3 : index
    %c0_12 = arith.constant 0 : index
    %c0_13 = arith.constant 0 : index
    %13 = vector.load %arg1[%c3, %c0_12, %c0_13] : memref<4x200x400xbf16, #tpu.memory_space<vmem>>, vector<1x200x400xbf16>
    %14 = vector.shape_cast %13 : vector<1x200x400xbf16> to vector<200x400xbf16>
    %cst_14 = arith.constant dense<0.000000e+00> : vector<200x128xf32>
    %15 = tpu.matmul %14, %0, %cst_14 {dimension_numbers = #tpu.dot_dimension_numbers<[1], [0], [0], [1], [0, 0, 1, 1], [], []>} : vector<200x400xbf16>, vector<400x128xbf16>, vector<200x128xf32> -> vector<200x128xf32>
    %16 = arith.maximumf %12, %15 : vector<200x128xf32>
    %17 = vector.broadcast %1 : vector<1x128xf32> to vector<200x128xf32>
    %18 = arith.addf %16, %17 : vector<200x128xf32>
    %cst_15 = arith.constant 0.000000e+00 : f32
    %19 = vector.broadcast %cst_15 : f32 to vector<200x128xf32>
    %20 = arith.maximumf %18, %19 : vector<200x128xf32>
    %21 = arith.truncf %20 : vector<200x128xf32> to vector<200x128xbf16>
    %c0_16 = arith.constant 0 : index
    %c0_17 = arith.constant 0 : index
    %22 = vector.load %arg4[%c0_16, %c0_17] : memref<200x128xbf16, #tpu.memory_space<vmem>>, vector<200x128xbf16>
    tpu.vector_store %arg4[%c0_16, %c0_17], %21 {strides = array<i32>} : memref<200x128xbf16, #tpu.memory_space<vmem>>, vector<200x128xbf16>,
    return
  }
  func.func @transform_0(%arg0: i32) -> (i32, i32, i32) {
    %c0_i32 = arith.constant 0 : i32
    %c0_i32_0 = arith.constant 0 : i32
    %c0_i32_1 = arith.constant 0 : i32
    return %c0_i32, %arg0, %c0_i32_0 : i32, i32, i32
  }
  func.func @transform_1(%arg0: i32) -> (i32, i32) {
    %c0_i32 = arith.constant 0 : i32
    %c0_i32_0 = arith.constant 0 : i32
    %c0_i32_1 = arith.constant 0 : i32
    return %c0_i32, %c0_i32_0 : i32, i32
  }
  func.func @transform_2(%arg0: i32) -> (i32, i32) {
    %c0_i32 = arith.constant 0 : i32
    %c0_i32_0 = arith.constant 0 : i32
    %c0_i32_1 = arith.constant 0 : i32
    return %c0_i32, %c0_i32_0 : i32, i32
  }
  func.func @transform_3(%arg0: i32) -> (i32, i32) {
    %c0_i32 = arith.constant 0 : i32
    %c0_i32_0 = arith.constant 0 : i32
    return %arg0, %c0_i32 : i32, i32
  }
}

module attributes {stable_mosaic.version = 11 : i64} {
  func.func @_matmul_chain_kernel(%arg0: i32, %arg1: memref<128x288xbf16, #tpu.memory_space<vmem>>, %arg2: memref<288x128xbf16, #tpu.memory_space<vmem>>, %arg3: memref<1x128xf32, #tpu.memory_space<vmem>>, %arg4: memref<128x128xbf16, #tpu.memory_space<vmem>>) attributes {dimension_semantics = [#tpu.dimension_semantics<parallel>], iteration_bounds = array<i64: 1>, scalar_prefetch = 0 : i64, scratch_operands = 0 : i64, tpu.core_type = #tpu.core_type<tc>, window_params = [{transform_indices = @transform_0, window_bounds = array<i64: 128, 288>}, {pipeline_mode = #tpu.pipeline_mode<synchronous>, transform_indices = @transform_1, window_bounds = array<i64: 288, 128>}, {pipeline_mode = #tpu.pipeline_mode<synchronous>, transform_indices = @transform_2, window_bounds = array<i64: 1, 128>}, {transform_indices = @transform_3, window_bounds = array<i64: 128, 128>}]} {
    %c0 = arith.constant 0 : index
    %c0_0 = arith.constant 0 : index
    %0 = vector.load %arg2[%c0, %c0_0] : memref<288x128xbf16, #tpu.memory_space<vmem>>, vector<288x128xbf16>
    %c0_1 = arith.constant 0 : index
    %c0_2 = arith.constant 0 : index
    %1 = vector.load %arg3[%c0_1, %c0_2] : memref<1x128xf32, #tpu.memory_space<vmem>>, vector<1x128xf32>
    %c0_3 = arith.constant 0 : index
    %c0_4 = arith.constant 0 : index
    %2 = vector.load %arg1[%c0_3, %c0_4] : memref<128x288xbf16, #tpu.memory_space<vmem>>, vector<128x288xbf16>
    %cst = arith.constant dense<0.000000e+00> : vector<128x128xf32>
    %3 = tpu.matmul %2, %0, %cst {dimension_numbers = #tpu.dot_dimension_numbers<[1], [0], [0], [1], [0, 0, 1, 1], [], []>} : vector<128x288xbf16>, vector<288x128xbf16>, vector<128x128xf32> -> vector<128x128xf32>
    %4 = vector.broadcast %1 : vector<1x128xf32> to vector<128x128xf32>
    %5 = arith.addf %3, %4 : vector<128x128xf32>
    %cst_5 = arith.constant 0.000000e+00 : f32
    %6 = vector.broadcast %cst_5 : f32 to vector<128x128xf32>
    %7 = arith.maximumf %5, %6 : vector<128x128xf32>
    %8 = arith.truncf %7 : vector<128x128xf32> to vector<128x128xbf16>
    %c0_6 = arith.constant 0 : index
    %c0_7 = arith.constant 0 : index
    %9 = vector.load %arg4[%c0_6, %c0_7] : memref<128x128xbf16, #tpu.memory_space<vmem>>, vector<128x128xbf16>
    tpu.vector_store %arg4[%c0_6, %c0_7], %8 {strides = array<i32>} : memref<128x128xbf16, #tpu.memory_space<vmem>>, vector<128x128xbf16>,
    return
  }
  func.func @transform_0(%arg0: i32) -> (i32, i32) {
    %c0_i32 = arith.constant 0 : i32
    %c0_i32_0 = arith.constant 0 : i32
    return %arg0, %c0_i32 : i32, i32
  }
  func.func @transform_1(%arg0: i32) -> (i32, i32) {
    %c0_i32 = arith.constant 0 : i32
    %c0_i32_0 = arith.constant 0 : i32
    %c0_i32_1 = arith.constant 0 : i32
    return %c0_i32, %c0_i32_0 : i32, i32
  }
  func.func @transform_2(%arg0: i32) -> (i32, i32) {
    %c0_i32 = arith.constant 0 : i32
    %c0_i32_0 = arith.constant 0 : i32
    %c0_i32_1 = arith.constant 0 : i32
    return %c0_i32, %c0_i32_0 : i32, i32
  }
  func.func @transform_3(%arg0: i32) -> (i32, i32) {
    %c0_i32 = arith.constant 0 : i32
    %c0_i32_0 = arith.constant 0 : i32
    return %arg0, %c0_i32 : i32, i32
  }
}

module attributes {stable_mosaic.version = 11 : i64} {
  func.func @_matmul_chain_kernel(%arg0: i32, %arg1: memref<4x18x576xbf16, #tpu.memory_space<vmem>>, %arg2: memref<576x128xbf16, #tpu.memory_space<vmem>>, %arg3: memref<1x128xf32, #tpu.memory_space<vmem>>, %arg4: memref<18x128xbf16, #tpu.memory_space<vmem>>) attributes {dimension_semantics = [#tpu.dimension_semantics<parallel>], iteration_bounds = array<i64: 1>, scalar_prefetch = 0 : i64, scratch_operands = 0 : i64, tpu.core_type = #tpu.core_type<tc>, window_params = [{transform_indices = @transform_0, window_bounds = array<i64: 4, 18, 576>}, {pipeline_mode = #tpu.pipeline_mode<synchronous>, transform_indices = @transform_1, window_bounds = array<i64: 576, 128>}, {pipeline_mode = #tpu.pipeline_mode<synchronous>, transform_indices = @transform_2, window_bounds = array<i64: 1, 128>}, {transform_indices = @transform_3, window_bounds = array<i64: 18, 128>}]} {
    %c0 = arith.constant 0 : index
    %c0_0 = arith.constant 0 : index
    %0 = vector.load %arg2[%c0, %c0_0] : memref<576x128xbf16, #tpu.memory_space<vmem>>, vector<576x128xbf16>
    %c0_1 = arith.constant 0 : index
    %c0_2 = arith.constant 0 : index
    %1 = vector.load %arg3[%c0_1, %c0_2] : memref<1x128xf32, #tpu.memory_space<vmem>>, vector<1x128xf32>
    %c0_3 = arith.constant 0 : index
    %c0_4 = arith.constant 0 : index
    %c0_5 = arith.constant 0 : index
    %2 = vector.load %arg1[%c0_3, %c0_4, %c0_5] : memref<4x18x576xbf16, #tpu.memory_space<vmem>>, vector<1x18x576xbf16>
    %3 = vector.shape_cast %2 : vector<1x18x576xbf16> to vector<18x576xbf16>
    %cst = arith.constant dense<0.000000e+00> : vector<18x128xf32>
    %4 = tpu.matmul %3, %0, %cst {dimension_numbers = #tpu.dot_dimension_numbers<[1], [0], [0], [1], [0, 0, 1, 1], [], []>} : vector<18x576xbf16>, vector<576x128xbf16>, vector<18x128xf32> -> vector<18x128xf32>
    %c1 = arith.constant 1 : index
    %c0_6 = arith.constant 0 : index
    %c0_7 = arith.constant 0 : index
    %5 = vector.load %arg1[%c1, %c0_6, %c0_7] : memref<4x18x576xbf16, #tpu.memory_space<vmem>>, vector<1x18x576xbf16>
    %6 = vector.shape_cast %5 : vector<1x18x576xbf16> to vector<18x576xbf16>
    %cst_8 = arith.constant dense<0.000000e+00> : vector<18x128xf32>
    %7 = tpu.matmul %6, %0, %cst_8 {dimension_numbers = #tpu.dot_dimension_numbers<[1], [0], [0], [1], [0, 0, 1, 1], [], []>} : vector<18x576xbf16>, vector<576x128xbf16>, vector<18x128xf32> -> vector<18x128xf32>
    %8 = arith.maximumf %4, %7 : vector<18x128xf32>
    %c2 = arith.constant 2 : index
    %c0_9 = arith.constant 0 : index
    %c0_10 = arith.constant 0 : index
    %9 = vector.load %arg1[%c2, %c0_9, %c0_10] : memref<4x18x576xbf16, #tpu.memory_space<vmem>>, vector<1x18x576xbf16>
    %10 = vector.shape_cast %9 : vector<1x18x576xbf16> to vector<18x576xbf16>
    %cst_11 = arith.constant dense<0.000000e+00> : vector<18x128xf32>
    %11 = tpu.matmul %10, %0, %cst_11 {dimension_numbers = #tpu.dot_dimension_numbers<[1], [0], [0], [1], [0, 0, 1, 1], [], []>} : vector<18x576xbf16>, vector<576x128xbf16>, vector<18x128xf32> -> vector<18x128xf32>
    %12 = arith.maximumf %8, %11 : vector<18x128xf32>
    %c3 = arith.constant 3 : index
    %c0_12 = arith.constant 0 : index
    %c0_13 = arith.constant 0 : index
    %13 = vector.load %arg1[%c3, %c0_12, %c0_13] : memref<4x18x576xbf16, #tpu.memory_space<vmem>>, vector<1x18x576xbf16>
    %14 = vector.shape_cast %13 : vector<1x18x576xbf16> to vector<18x576xbf16>
    %cst_14 = arith.constant dense<0.000000e+00> : vector<18x128xf32>
    %15 = tpu.matmul %14, %0, %cst_14 {dimension_numbers = #tpu.dot_dimension_numbers<[1], [0], [0], [1], [0, 0, 1, 1], [], []>} : vector<18x576xbf16>, vector<576x128xbf16>, vector<18x128xf32> -> vector<18x128xf32>
    %16 = arith.maximumf %12, %15 : vector<18x128xf32>
    %17 = vector.broadcast %1 : vector<1x128xf32> to vector<18x128xf32>
    %18 = arith.addf %16, %17 : vector<18x128xf32>
    %cst_15 = arith.constant 0.000000e+00 : f32
    %19 = vector.broadcast %cst_15 : f32 to vector<18x128xf32>
    %20 = arith.maximumf %18, %19 : vector<18x128xf32>
    %21 = arith.truncf %20 : vector<18x128xf32> to vector<18x128xbf16>
    %c0_16 = arith.constant 0 : index
    %c0_17 = arith.constant 0 : index
    %22 = vector.load %arg4[%c0_16, %c0_17] : memref<18x128xbf16, #tpu.memory_space<vmem>>, vector<18x128xbf16>
    tpu.vector_store %arg4[%c0_16, %c0_17], %21 {strides = array<i32>} : memref<18x128xbf16, #tpu.memory_space<vmem>>, vector<18x128xbf16>,
    return
  }
  func.func @transform_0(%arg0: i32) -> (i32, i32, i32) {
    %c0_i32 = arith.constant 0 : i32
    %c0_i32_0 = arith.constant 0 : i32
    %c0_i32_1 = arith.constant 0 : i32
    return %c0_i32, %arg0, %c0_i32_0 : i32, i32, i32
  }
  func.func @transform_1(%arg0: i32) -> (i32, i32) {
    %c0_i32 = arith.constant 0 : i32
    %c0_i32_0 = arith.constant 0 : i32
    %c0_i32_1 = arith.constant 0 : i32
    return %c0_i32, %c0_i32_0 : i32, i32
  }
  func.func @transform_2(%arg0: i32) -> (i32, i32) {
    %c0_i32 = arith.constant 0 : i32
    %c0_i32_0 = arith.constant 0 : i32
    %c0_i32_1 = arith.constant 0 : i32
    return %c0_i32, %c0_i32_0 : i32, i32
  }
  func.func @transform_3(%arg0: i32) -> (i32, i32) {
    %c0_i32 = arith.constant 0 : i32
    %c0_i32_0 = arith.constant 0 : i32
    return %arg0, %c0_i32 : i32, i32
  }
}

module attributes {stable_mosaic.version = 11 : i64} {
  func.func @_matmul_chain_kernel(%arg0: i32, %arg1: memref<2x1152xbf16, #tpu.memory_space<vmem>>, %arg2: memref<1152x256xbf16, #tpu.memory_space<vmem>>, %arg3: memref<1x256xf32, #tpu.memory_space<vmem>>, %arg4: memref<256x128xbf16, #tpu.memory_space<vmem>>, %arg5: memref<1x128xf32, #tpu.memory_space<vmem>>, %arg6: memref<128x128xbf16, #tpu.memory_space<vmem>>, %arg7: memref<1x128xf32, #tpu.memory_space<vmem>>, %arg8: memref<128x128xbf16, #tpu.memory_space<vmem>>, %arg9: memref<1x128xf32, #tpu.memory_space<vmem>>, %arg10: memref<2x128xf32, #tpu.memory_space<vmem>>) attributes {dimension_semantics = [#tpu.dimension_semantics<parallel>], iteration_bounds = array<i64: 1>, scalar_prefetch = 0 : i64, scratch_operands = 0 : i64, tpu.core_type = #tpu.core_type<tc>, window_params = [{transform_indices = @transform_0, window_bounds = array<i64: 2, 1152>}, {pipeline_mode = #tpu.pipeline_mode<synchronous>, transform_indices = @transform_1, window_bounds = array<i64: 1152, 256>}, {pipeline_mode = #tpu.pipeline_mode<synchronous>, transform_indices = @transform_2, window_bounds = array<i64: 1, 256>}, {pipeline_mode = #tpu.pipeline_mode<synchronous>, transform_indices = @transform_3, window_bounds = array<i64: 256, 128>}, {pipeline_mode = #tpu.pipeline_mode<synchronous>, transform_indices = @transform_4, window_bounds = array<i64: 1, 128>}, {pipeline_mode = #tpu.pipeline_mode<synchronous>, transform_indices = @transform_5, window_bounds = array<i64: 128, 128>}, {pipeline_mode = #tpu.pipeline_mode<synchronous>, transform_indices = @transform_6, window_bounds = array<i64: 1, 128>}, {pipeline_mode = #tpu.pipeline_mode<synchronous>, transform_indices = @transform_7, window_bounds = array<i64: 128, 128>}, {pipeline_mode = #tpu.pipeline_mode<synchronous>, transform_indices = @transform_8, window_bounds = array<i64: 1, 128>}, {transform_indices = @transform_9, window_bounds = array<i64: 2, 128>}]} {
    %c0 = arith.constant 0 : index
    %c0_0 = arith.constant 0 : index
    %0 = vector.load %arg2[%c0, %c0_0] : memref<1152x256xbf16, #tpu.memory_space<vmem>>, vector<1152x256xbf16>
    %c0_1 = arith.constant 0 : index
    %c0_2 = arith.constant 0 : index
    %1 = vector.load %arg3[%c0_1, %c0_2] : memref<1x256xf32, #tpu.memory_space<vmem>>, vector<1x256xf32>
    %c0_3 = arith.constant 0 : index
    %c0_4 = arith.constant 0 : index
    %2 = vector.load %arg1[%c0_3, %c0_4] : memref<2x1152xbf16, #tpu.memory_space<vmem>>, vector<2x1152xbf16>
    %cst = arith.constant dense<0.000000e+00> : vector<2x256xf32>
    %3 = tpu.matmul %2, %0, %cst {dimension_numbers = #tpu.dot_dimension_numbers<[1], [0], [0], [1], [0, 0, 1, 1], [], []>} : vector<2x1152xbf16>, vector<1152x256xbf16>, vector<2x256xf32> -> vector<2x256xf32>
    %4 = vector.broadcast %1 : vector<1x256xf32> to vector<2x256xf32>
    %5 = arith.addf %3, %4 : vector<2x256xf32>
    %cst_5 = arith.constant 0.000000e+00 : f32
    %6 = vector.broadcast %cst_5 : f32 to vector<2x256xf32>
    %7 = arith.maximumf %5, %6 : vector<2x256xf32>
    %8 = arith.truncf %7 : vector<2x256xf32> to vector<2x256xbf16>
    %c0_6 = arith.constant 0 : index
    %c0_7 = arith.constant 0 : index
    %9 = vector.load %arg4[%c0_6, %c0_7] : memref<256x128xbf16, #tpu.memory_space<vmem>>, vector<256x128xbf16>
    %cst_8 = arith.constant dense<0.000000e+00> : vector<2x128xf32>
    %10 = tpu.matmul %8, %9, %cst_8 {dimension_numbers = #tpu.dot_dimension_numbers<[1], [0], [0], [1], [0, 0, 1, 1], [], []>} : vector<2x256xbf16>, vector<256x128xbf16>, vector<2x128xf32> -> vector<2x128xf32>
    %c0_9 = arith.constant 0 : index
    %c0_10 = arith.constant 0 : index
    %11 = vector.load %arg5[%c0_9, %c0_10] : memref<1x128xf32, #tpu.memory_space<vmem>>, vector<1x128xf32>
    %12 = vector.broadcast %11 : vector<1x128xf32> to vector<2x128xf32>
    %13 = arith.addf %10, %12 : vector<2x128xf32>
    %cst_11 = arith.constant 0.000000e+00 : f32
    %14 = vector.broadcast %cst_11 : f32 to vector<2x128xf32>
    %15 = arith.maximumf %13, %14 : vector<2x128xf32>
    %16 = arith.truncf %15 : vector<2x128xf32> to vector<2x128xbf16>
    %c0_12 = arith.constant 0 : index
    %c0_13 = arith.constant 0 : index
    %17 = vector.load %arg6[%c0_12, %c0_13] : memref<128x128xbf16, #tpu.memory_space<vmem>>, vector<128x128xbf16>
    %cst_14 = arith.constant dense<0.000000e+00> : vector<2x128xf32>
    %18 = tpu.matmul %16, %17, %cst_14 {dimension_numbers = #tpu.dot_dimension_numbers<[1], [0], [0], [1], [0, 0, 1, 1], [], []>} : vector<2x128xbf16>, vector<128x128xbf16>, vector<2x128xf32> -> vector<2x128xf32>
    %c0_15 = arith.constant 0 : index
    %c0_16 = arith.constant 0 : index
    %19 = vector.load %arg7[%c0_15, %c0_16] : memref<1x128xf32, #tpu.memory_space<vmem>>, vector<1x128xf32>
    %20 = vector.broadcast %19 : vector<1x128xf32> to vector<2x128xf32>
    %21 = arith.addf %18, %20 : vector<2x128xf32>
    %cst_17 = arith.constant 0.000000e+00 : f32
    %22 = vector.broadcast %cst_17 : f32 to vector<2x128xf32>
    %23 = arith.maximumf %21, %22 : vector<2x128xf32>
    %24 = arith.truncf %23 : vector<2x128xf32> to vector<2x128xbf16>
    %c0_18 = arith.constant 0 : index
    %c0_19 = arith.constant 0 : index
    %25 = vector.load %arg8[%c0_18, %c0_19] : memref<128x128xbf16, #tpu.memory_space<vmem>>, vector<128x128xbf16>
    %cst_20 = arith.constant dense<0.000000e+00> : vector<2x128xf32>
    %26 = tpu.matmul %24, %25, %cst_20 {dimension_numbers = #tpu.dot_dimension_numbers<[1], [0], [0], [1], [0, 0, 1, 1], [], []>} : vector<2x128xbf16>, vector<128x128xbf16>, vector<2x128xf32> -> vector<2x128xf32>
    %c0_21 = arith.constant 0 : index
    %c0_22 = arith.constant 0 : index
    %27 = vector.load %arg9[%c0_21, %c0_22] : memref<1x128xf32, #tpu.memory_space<vmem>>, vector<1x128xf32>
    %28 = vector.broadcast %27 : vector<1x128xf32> to vector<2x128xf32>
    %29 = arith.addf %26, %28 : vector<2x128xf32>
    %c0_23 = arith.constant 0 : index
    %c0_24 = arith.constant 0 : index
    %30 = vector.load %arg10[%c0_23, %c0_24] : memref<2x128xf32, #tpu.memory_space<vmem>>, vector<2x128xf32>
    tpu.vector_store %arg10[%c0_23, %c0_24], %29 {strides = array<i32>} : memref<2x128xf32, #tpu.memory_space<vmem>>, vector<2x128xf32>,
    return
  }
  func.func @transform_0(%arg0: i32) -> (i32, i32) {
    %c0_i32 = arith.constant 0 : i32
    %c0_i32_0 = arith.constant 0 : i32
    return %arg0, %c0_i32 : i32, i32
  }
  func.func @transform_1(%arg0: i32) -> (i32, i32) {
    %c0_i32 = arith.constant 0 : i32
    %c0_i32_0 = arith.constant 0 : i32
    %c0_i32_1 = arith.constant 0 : i32
    return %c0_i32, %c0_i32_0 : i32, i32
  }
  func.func @transform_2(%arg0: i32) -> (i32, i32) {
    %c0_i32 = arith.constant 0 : i32
    %c0_i32_0 = arith.constant 0 : i32
    %c0_i32_1 = arith.constant 0 : i32
    return %c0_i32, %c0_i32_0 : i32, i32
  }
  func.func @transform_3(%arg0: i32) -> (i32, i32) {
    %c0_i32 = arith.constant 0 : i32
    %c0_i32_0 = arith.constant 0 : i32
    %c0_i32_1 = arith.constant 0 : i32
    return %c0_i32, %c0_i32_0 : i32, i32
  }
  func.func @transform_4(%arg0: i32) -> (i32, i32) {
    %c0_i32 = arith.constant 0 : i32
    %c0_i32_0 = arith.constant 0 : i32
    %c0_i32_1 = arith.constant 0 : i32
    return %c0_i32, %c0_i32_0 : i32, i32
  }
  func.func @transform_5(%arg0: i32) -> (i32, i32) {
    %c0_i32 = arith.constant 0 : i32
    %c0_i32_0 = arith.constant 0 : i32
    %c0_i32_1 = arith.constant 0 : i32
    return %c0_i32, %c0_i32_0 : i32, i32
  }
  func.func @transform_6(%arg0: i32) -> (i32, i32) {
    %c0_i32 = arith.constant 0 : i32
    %c0_i32_0 = arith.constant 0 : i32
    %c0_i32_1 = arith.constant 0 : i32
    return %c0_i32, %c0_i32_0 : i32, i32
  }
  func.func @transform_7(%arg0: i32) -> (i32, i32) {
    %c0_i32 = arith.constant 0 : i32
    %c0_i32_0 = arith.constant 0 : i32
    %c0_i32_1 = arith.constant 0 : i32
    return %c0_i32, %c0_i32_0 : i32, i32
  }
  func.func @transform_8(%arg0: i32) -> (i32, i32) {
    %c0_i32 = arith.constant 0 : i32
    %c0_i32_0 = arith.constant 0 : i32
    %c0_i32_1 = arith.constant 0 : i32
    return %c0_i32, %c0_i32_0 : i32, i32
  }
  func.func @transform_9(%arg0: i32) -> (i32, i32) {
    %c0_i32 = arith.constant 0 : i32
    %c0_i32_0 = arith.constant 0 : i32
    return %arg0, %c0_i32 : i32, i32
  }
}

</mosaic_0001>

<bundles_post_ra>
// kernel: forward.5
= control target key start
LH: loop header
LB: loop body
LE: loop exit
PB: predicated region body
PF: predicated region fallthrough
CT: control target
= control target key end

     0   :  { %vm782_vm0 = vcmask 1044480   ;;  %vm783_vm1 = vcmask 1045504   ;;  %v3455_v1 = vmov 65535   ;;  %vm565_vm2 = vcmask 613376   ;;  %s4133_s1 = inlined_call_operand.vmem [shape: bf16[75,128], index: 1, kind: input, shape index: {}]   ;;  %s4134_s0 = inlined_call_operand.vmem [shape: bf16[1152,75], index: 0, kind: input, shape index: {}]   ;;  %s4135_s2 = inlined_call_operand.vmem [shape: f32[1,128], index: 2, kind: input, shape index: {}]   ;;  %s4136_s3 = inlined_call_operand.vmem [shape: bf16[1152,128], index: 3, kind: output, shape index: {}]  }
   0x1   :  { %v3377_v0 = vld [vmem:[%s4133_s1 + $0x20] sm:$0x3f]   ;;  %v784_v2 = vsel %vm782_vm0, 4294967295, %v3455_v1  ;;  %v3378_v5 = vld [vmem:[%s4133_s1 + $0x18] sm:$0xff]   ;;  %v3379_v8 = vld [vmem:[%s4133_s1 + $0x10] sm:$0xff]  }
   0x2   :  { %v785_v3 = vsel %vm783_vm1, %v784_v2, 0  ;;  %v3382_v6 = vld [vmem:[%s4134_s0] sm:$0xff]   ;;  %v3380_v9 = vld [vmem:[%s4133_s1 + $0x8] sm:$0xff]   ;;  %v3386_v13 = vld [vmem:[%s4134_s0 + $0x10] sm:$0xff]  }
   0x3   :  { %v787_v4 = vand.u32 %v3377_v0, %v785_v3  ;;  %v3383_v7 = vld [vmem:[%s4134_s0 + $0x120] sm:$0xff]   ;;  %3222 = vmatprep.mubr.msk.bf16.mxu0 %vm565_vm2, %v3382_v6  ;;  %v3384_v11 = vld [vmem:[%s4134_s0 + $0x8] sm:$0xff]   ;;  %v3387_v14 = vld [vmem:[%s4134_s0 + $0x130] sm:$0xff]  }
   0x4   :  { %3294 = vmatprep.mubr.msk.bf16.mxu1 %vm565_vm2, %v3383_v7  ;;  %v3381_v10 = vld [vmem:[%s4133_s1] sm:$0xff]   ;;  %v3385_v12 = vld [vmem:[%s4134_s0 + $0x128] sm:$0xff]   ;;  %v3388_v15 = vld [vmem:[%s4134_s0 + $0x18] sm:$0xff]  }
   0x5   :  { %3212 = vmatprep.subr.bf16.mxu0 %v787_v4  ;;  %3366 = vmatprep.subr.bf16.mxu1 %v787_v4  ;;  %v3389_v16 = vld [vmem:[%s4134_s0 + $0x138] sm:$0xff]   ;;  %v3390_v17 = vld [vmem:[%s4134_s0 + $0x20] sm:$0xff]   ;;  %v3392_v19 = vld [vmem:[%s4134_s0 + $0x28] sm:$0xff]  }
   0x6   :  { %3213 = vmatpush3.bf16.msra.mxu0 %v787_v4  ;;  %3371 = vmatpush3.bf16.msra.mxu1 %v787_v4  ;;  %v3391_v18 = vld [vmem:[%s4134_s0 + $0x140] sm:$0xff]   ;;  %v3393_v20 = vld [vmem:[%s4134_s0 + $0x148] sm:$0xff]   ;;  %v3394_v21 = vld [vmem:[%s4134_s0 + $0x30] sm:$0xff]  }
   0x7   :  { %3214 = vmatprep.subr.bf16.mxu0 %v3378_v5  ;;  %3367 = vmatprep.subr.bf16.mxu1 %v3378_v5  ;;  %v3395_v22 = vld [vmem:[%s4134_s0 + $0x150] sm:$0xff]   ;;  %v3396_v23 = vld [vmem:[%s4134_s0 + $0x38] sm:$0xff]   ;;  %v3398_v25 = vld [vmem:[%s4134_s0 + $0x40] sm:$0xff]  }
   0x8   :  { %v3397_v24 = vld [vmem:[%s4134_s0 + $0x158] sm:$0xff]   ;;  %v3399_v26 = vld [vmem:[%s4134_s0 + $0x160] sm:$0xff]   ;;  %v3400_v27 = vld [vmem:[%s4134_s0 + $0x48] sm:$0xff]  }
   0x9   :  { %v3401_v28 = vld [vmem:[%s4134_s0 + $0x168] sm:$0xff]   ;;  %v3402_v29 = vld [vmem:[%s4134_s0 + $0x50] sm:$0xff]   ;;  %v3404_v31 = vld [vmem:[%s4134_s0 + $0x58] sm:$0xff]  }
   0xa   :  { %3215 = vmatpush3.bf16.msra.mxu0 %v3378_v5  ;;  %3372 = vmatpush3.bf16.msra.mxu1 %v3378_v5  ;;  %v3403_v30 = vld [vmem:[%s4134_s0 + $0x170] sm:$0xff]   ;;  %v3405_v32 = vld [vmem:[%s4134_s0 + $0x178] sm:$0xff]   ;;  %v3406_v33 = vld [vmem:[%s4134_s0 + $0x60] sm:$0xff]  }
   0xb   :  { %3216 = vmatprep.subr.bf16.mxu0 %v3379_v8  ;;  %3368 = vmatprep.subr.bf16.mxu1 %v3379_v8  ;;  %v3407_v34 = vld [vmem:[%s4134_s0 + $0x180] sm:$0xff]   ;;  %v3408_v35 = vld [vmem:[%s4134_s0 + $0x68] sm:$0xff]   ;;  %v3410_v37 = vld [vmem:[%s4134_s0 + $0x70] sm:$0xff]  }
   0xc   :  { %v3409_v36 = vld [vmem:[%s4134_s0 + $0x188] sm:$0xff]   ;;  %v3411_v38 = vld [vmem:[%s4134_s0 + $0x190] sm:$0xff]   ;;  %v3412_v39 = vld [vmem:[%s4134_s0 + $0x78] sm:$0xff]  }
   0xd   :  { %v3413_v40 = vld [vmem:[%s4134_s0 + $0x198] sm:$0xff]   ;;  %v3414_v41 = vld [vmem:[%s4134_s0 + $0x80] sm:$0xff]   ;;  %v3416_v43 = vld [vmem:[%s4134_s0 + $0x88] sm:$0xff]  }
   0xe   :  { %3217 = vmatpush3.bf16.msra.mxu0 %v3379_v8  ;;  %3373 = vmatpush3.bf16.msra.mxu1 %v3379_v8  ;;  %v3415_v42 = vld [vmem:[%s4134_s0 + $0x1a0] sm:$0xff]   ;;  %v3417_v44 = vld [vmem:[%s4134_s0 + $0x1a8] sm:$0xff]   ;;  %v3418_v45 = vld [vmem:[%s4134_s0 + $0x90] sm:$0xff]  }
   0xf   :  { %3218 = vmatprep.subr.bf16.mxu0 %v3380_v9  ;;  %3369 = vmatprep.subr.bf16.mxu1 %v3380_v9  ;;  %v3419_v46 = vld [vmem:[%s4134_s0 + $0x1b0] sm:$0xff]   ;;  %v3420_v47 = vld [vmem:[%s4134_s0 + $0x98] sm:$0xff]   ;;  %v3422_v49 = vld [vmem:[%s4134_s0 + $0xa0] sm:$0xff]  }
  0x10   :  { %v3421_v48 = vld [vmem:[%s4134_s0 + $0x1b8] sm:$0xff]   ;;  %v3423_v50 = vld [vmem:[%s4134_s0 + $0x1c0] sm:$0xff]   ;;  %v3424_v51 = vld [vmem:[%s4134_s0 + $0xa8] sm:$0xff]  }
  0x11   :  { %v3425_v52 = vld [vmem:[%s4134_s0 + $0x1c8] sm:$0xff]   ;;  %v3426_v53 = vld [vmem:[%s4134_s0 + $0xb0] sm:$0xff]   ;;  %v3428_v55 = vld [vmem:[%s4134_s0 + $0xb8] sm:$0xff]  }
  0x12   :  { %3219 = vmatpush3.bf16.msra.mxu0 %v3380_v9  ;;  %3374 = vmatpush3.bf16.msra.mxu1 %v3380_v9  ;;  %v3427_v54 = vld [vmem:[%s4134_s0 + $0x1d0] sm:$0xff]   ;;  %v3429_v56 = vld [vmem:[%s4134_s0 + $0x1d8] sm:$0xff]   ;;  %v3430_v57 = vld [vmem:[%s4134_s0 + $0xc0] sm:$0xff]  }
  0x13   :  { %3220 = vmatprep.subr.bf16.mxu0 %v3381_v10  ;;  %3370 = vmatprep.subr.bf16.mxu1 %v3381_v10  ;;  %v3431_v58 = vld [vmem:[%s4134_s0 + $0x1e0] sm:$0xff]   ;;  %v3432_v59 = vld [vmem:[%s4134_s0 + $0xc8] sm:$0xff]   ;;  %v3434_v61 = vld [vmem:[%s4134_s0 + $0xd0] sm:$0xff]  }
  0x14   :  { %v3433_v60 = vld [vmem:[%s4134_s0 + $0x1e8] sm:$0xff]   ;;  %v3435_v62 = vld [vmem:[%s4134_s0 + $0x1f0] sm:$0xff]   ;;  %v3436_v63 = vld [vmem:[%s4134_s0 + $0xd8] sm:$0xff]  }
  0x15   :  { %v3437_v0 = vld [vmem:[%s4134_s0 + $0x1f8] sm:$0xff]   ;;  %v3438_v1 = vld [vmem:[%s4134_s0 + $0xe0] sm:$0xff]   ;;  %v3440_v3 = vld [vmem:[%s4134_s0 + $0xe8] sm:$0xff]  }
  0x16   :  { %3221 = vmatpush3.bf16.msra.mxu0 %v3381_v10  ;;  %3375 = vmatpush3.bf16.msra.mxu1 %v3381_v10  ;;  %v3439_v2 = vld [vmem:[%s4134_s0 + $0x200] sm:$0xff]   ;;  %v3441_v4 = vld [vmem:[%s4134_s0 + $0x208] sm:$0xff]   ;;  %v3442_v5 = vld [vmem:[%s4134_s0 + $0xf0] sm:$0xff]  }
  0x17   :  { %v3443_v6 = vld [vmem:[%s4134_s0 + $0x210] sm:$0xff]   ;;  %v3444_v7 = vld [vmem:[%s4134_s0 + $0xf8] sm:$0xff]   ;;  %v3446_v9 = vld [vmem:[%s4134_s0 + $0x100] sm:$0xff]  }
  0x18   :  { %v3445_v8 = vld [vmem:[%s4134_s0 + $0x218] sm:$0xff]   ;;  %v3447_v10 = vld [vmem:[%s4134_s0 + $0x220] sm:$0xff]  }
  0x19   :  { %3223 = vmatmul.mubr.msk.bf16.vlgmr.msra.gmra.mxu0 %vm565_vm2, %v3384_v11  ;;  %3295 = vmatmul.mubr.msk.bf16.vlgmr.msra.gmra.mxu1 %vm565_vm2, %v3385_v12  ;;  %v3448_v11 = vld [vmem:[%s4134_s0 + $0x108] sm:$0xff]  }
  0x1a   :  { %3226 = vmatprep.mubr.msk.bf16.mxu0 %vm565_vm2, %v3386_v13  ;;  %3298 = vmatprep.mubr.msk.bf16.mxu1 %vm565_vm2, %v3387_v14  ;;  %v3449_v12 = vld [vmem:[%s4134_s0 + $0x228] sm:$0xff]   ;;  %v3450_v13 = vld [vmem:[%s4134_s0 + $0x110] sm:$0xff]  }
  0x1b   :  { %v3451_v14 = vld [vmem:[%s4134_s0 + $0x230] sm:$0xff]  }
  0x21   :  { %3227 = vmatmul.mubr.msk.bf16.gmra.mxu0 %vm565_vm2, %v3388_v15  ;;  %3299 = vmatmul.mubr.msk.bf16.gmra.mxu1 %vm565_vm2, %v3389_v16  ;;  %v3452_v15 = vld [vmem:[%s4134_s0 + $0x118] sm:$0xff]  }
  0x22   :  { %3230 = vmatprep.mubr.msk.bf16.mxu0 %vm565_vm2, %v3390_v17  ;;  %3302 = vmatprep.mubr.msk.bf16.mxu1 %vm565_vm2, %v3391_v18  ;;  %v3453_v16 = vld [vmem:[%s4134_s0 + $0x238] sm:$0xff]   ;;  %v3782_v17 = vld [vmem:[%s4135_s2] ss:$0 sm:$0xff] }
  0x29   :  { %3231 = vmatmul.mubr.msk.bf16.gmra.mxu0 %vm565_vm2, %v3392_v19  ;;  %3303 = vmatmul.mubr.msk.bf16.gmra.mxu1 %vm565_vm2, %v3393_v20 }
  0x2a   :  { %3234 = vmatprep.mubr.msk.bf16.mxu0 %vm565_vm2, %v3394_v21  ;;  %3306 = vmatprep.mubr.msk.bf16.mxu1 %vm565_vm2, %v3395_v22 }
  0x31   :  { %3235 = vmatmul.mubr.msk.bf16.gmra.mxu0 %vm565_vm2, %v3396_v23  ;;  %3307 = vmatmul.mubr.msk.bf16.gmra.mxu1 %vm565_vm2, %v3397_v24 }
  0x32   :  { %3238 = vmatprep.mubr.msk.bf16.mxu0 %vm565_vm2, %v3398_v25  ;;  %3310 = vmatprep.mubr.msk.bf16.mxu1 %vm565_vm2, %v3399_v26 }
  0x39   :  { %3239 = vmatmul.mubr.msk.bf16.gmra.mxu0 %vm565_vm2, %v3400_v27  ;;  %3311 = vmatmul.mubr.msk.bf16.gmra.mxu1 %vm565_vm2, %v3401_v28 }
  0x3a   :  { %3242 = vmatprep.mubr.msk.bf16.mxu0 %vm565_vm2, %v3402_v29  ;;  %3314 = vmatprep.mubr.msk.bf16.mxu1 %vm565_vm2, %v3403_v30 }
  0x41   :  { %3243 = vmatmul.mubr.msk.bf16.gmra.mxu0 %vm565_vm2, %v3404_v31  ;;  %3315 = vmatmul.mubr.msk.bf16.gmra.mxu1 %vm565_vm2, %v3405_v32 }
  0x42   :  { %3246 = vmatprep.mubr.msk.bf16.mxu0 %vm565_vm2, %v3406_v33  ;;  %3318 = vmatprep.mubr.msk.bf16.mxu1 %vm565_vm2, %v3407_v34 }
  0x49   :  { %3247 = vmatmul.mubr.msk.bf16.gmra.mxu0 %vm565_vm2, %v3408_v35  ;;  %3319 = vmatmul.mubr.msk.bf16.gmra.mxu1 %vm565_vm2, %v3409_v36 }
  0x4a   :  { %3250 = vmatprep.mubr.msk.bf16.mxu0 %vm565_vm2, %v3410_v37  ;;  %3322 = vmatprep.mubr.msk.bf16.mxu1 %vm565_vm2, %v3411_v38 }
  0x51   :  { %3251 = vmatmul.mubr.msk.bf16.gmra.mxu0 %vm565_vm2, %v3412_v39  ;;  %3323 = vmatmul.mubr.msk.bf16.gmra.mxu1 %vm565_vm2, %v3413_v40 }
  0x52   :  { %3254 = vmatprep.mubr.msk.bf16.mxu0 %vm565_vm2, %v3414_v41  ;;  %3326 = vmatprep.mubr.msk.bf16.mxu1 %vm565_vm2, %v3415_v42 }
  0x59   :  { %3255 = vmatmul.mubr.msk.bf16.gmra.mxu0 %vm565_vm2, %v3416_v43  ;;  %3327 = vmatmul.mubr.msk.bf16.gmra.mxu1 %vm565_vm2, %v3417_v44 }
  0x5a   :  { %3258 = vmatprep.mubr.msk.bf16.mxu0 %vm565_vm2, %v3418_v45  ;;  %3330 = vmatprep.mubr.msk.bf16.mxu1 %vm565_vm2, %v3419_v46 }
  0x61   :  { %3259 = vmatmul.mubr.msk.bf16.gmra.mxu0 %vm565_vm2, %v3420_v47  ;;  %3331 = vmatmul.mubr.msk.bf16.gmra.mxu1 %vm565_vm2, %v3421_v48 }
  0x62   :  { %3262 = vmatprep.mubr.msk.bf16.mxu0 %vm565_vm2, %v3422_v49  ;;  %3334 = vmatprep.mubr.msk.bf16.mxu1 %vm565_vm2, %v3423_v50 }
  0x69   :  { %3263 = vmatmul.mubr.msk.bf16.gmra.mxu0 %vm565_vm2, %v3424_v51  ;;  %3335 = vmatmul.mubr.msk.bf16.gmra.mxu1 %vm565_vm2, %v3425_v52 }
  0x6a   :  { %3266 = vmatprep.mubr.msk.bf16.mxu0 %vm565_vm2, %v3426_v53  ;;  %3338 = vmatprep.mubr.msk.bf16.mxu1 %vm565_vm2, %v3427_v54 }
  0x71   :  { %3267 = vmatmul.mubr.msk.bf16.gmra.mxu0 %vm565_vm2, %v3428_v55  ;;  %3339 = vmatmul.mubr.msk.bf16.gmra.mxu1 %vm565_vm2, %v3429_v56 }
  0x72   :  { %3270 = vmatprep.mubr.msk.bf16.mxu0 %vm565_vm2, %v3430_v57  ;;  %3342 = vmatprep.mubr.msk.bf16.mxu1 %vm565_vm2, %v3431_v58 }
  0x79   :  { %3271 = vmatmul.mubr.msk.bf16.gmra.mxu0 %vm565_vm2, %v3432_v59  ;;  %3343 = vmatmul.mubr.msk.bf16.gmra.mxu1 %vm565_vm2, %v3433_v60 }
  0x7a   :  { %3274 = vmatprep.mubr.msk.bf16.mxu0 %vm565_vm2, %v3434_v61  ;;  %3346 = vmatprep.mubr.msk.bf16.mxu1 %vm565_vm2, %v3435_v62 }
  0x81   :  { %3275 = vmatmul.mubr.msk.bf16.gmra.mxu0 %vm565_vm2, %v3436_v63  ;;  %3347 = vmatmul.mubr.msk.bf16.gmra.mxu1 %vm565_vm2, %v3437_v0 }
  0x82   :  { %3278 = vmatprep.mubr.msk.bf16.mxu0 %vm565_vm2, %v3438_v1  ;;  %3350 = vmatprep.mubr.msk.bf16.mxu1 %vm565_vm2, %v3439_v2 }
  0x89   :  { %3279 = vmatmul.mubr.msk.bf16.gmra.mxu0 %vm565_vm2, %v3440_v3  ;;  %3351 = vmatmul.mubr.msk.bf16.gmra.mxu1 %vm565_vm2, %v3441_v4 }
  0x8a   :  { %3282 = vmatprep.mubr.msk.bf16.mxu0 %vm565_vm2, %v3442_v5  ;;  %3354 = vmatprep.mubr.msk.bf16.mxu1 %vm565_vm2, %v3443_v6 }
  0x91   :  { %3283 = vmatmul.mubr.msk.bf16.gmra.mxu0 %vm565_vm2, %v3444_v7  ;;  %3355 = vmatmul.mubr.msk.bf16.gmra.mxu1 %vm565_vm2, %v3445_v8 }
  0x92   :  { %3286 = vmatprep.mubr.msk.bf16.mxu0 %vm565_vm2, %v3446_v9  ;;  %3358 = vmatprep.mubr.msk.bf16.mxu1 %vm565_vm2, %v3447_v10 }
  0x99   :  { %3287 = vmatmul.mubr.msk.bf16.gmra.mxu0 %vm565_vm2, %v3448_v11  ;;  %3359 = vmatmul.mubr.msk.bf16.gmra.mxu1 %vm565_vm2, %v3449_v12 }
  0x9a   :  { %3290 = vmatprep.mubr.msk.bf16.mxu0 %vm565_vm2, %v3450_v13  ;;  %3362 = vmatprep.mubr.msk.bf16.mxu1 %vm565_vm2, %v3451_v14 }
  0xa1   :  { %3291 = vmatmul.mubr.msk.bf16.gmra.mxu0 %vm565_vm2, %v3452_v15  ;;  %3363 = vmatmul.mubr.msk.bf16.gmra.mxu1 %vm565_vm2, %v3453_v16 }
  0xd9   :  { %v3224_v18 = vpop.f32.mrf.mxu0  ;;  %v3296_v19 = vpop.f32.mrf.mxu1 }
  0xda   :  { %v832_v20 = vadd.f32 %v3224_v18, %v3782_v17  ;;  %v1120_v21 = vadd.f32 %v3296_v19, %v3782_v17 }
  0xdb   :  { %v823_v22 = vpop.f32.mrf.mxu0  ;;  %v1111_v23 = vpop.f32.mrf.mxu1 }
  0xdc   :  { %v824_v24 = vadd.f32 %v3782_v17, %v823_v22  ;;  %v1112_v25 = vadd.f32 %v3782_v17, %v1111_v23  ;;  %v1400_v30 = vmax.f32 %v832_v20, 0.0  ;;  %v1472_v31 = vmax.f32 %v1120_v21, 0.0 }
  0xdd   :  { %v3225_v26 = vpop.f32.mrf.mxu0  ;;  %v3297_v27 = vpop.f32.mrf.mxu1 }
  0xde   :  { %v835_v28 = vadd.f32 %v3225_v26, %v3782_v17  ;;  %v1123_v29 = vadd.f32 %v3297_v27, %v3782_v17  ;;  %v1398_v38 = vmax.f32 %v824_v24, 0.0  ;;  %v1470_v39 = vmax.f32 %v1112_v25, 0.0 }
  0xdf   :  { %v826_v32 = vpop.f32.mrf.mxu0  ;;  %v1114_v33 = vpop.f32.mrf.mxu1 }
  0xe0   :  { %v1401_v34 = vmax.f32 %v835_v28, 0.0  ;;  %v1473_v35 = vmax.f32 %v1123_v29, 0.0  ;;  %v827_v36 = vadd.f32 %v3782_v17, %v826_v32  ;;  %v1115_v37 = vadd.f32 %v3782_v17, %v1114_v33 }
  0xe1   :  { %v3228_v40 = vpop.f32.mrf.mxu0  ;;  %v3300_v41 = vpop.f32.mrf.mxu1 }
  0xe2   :  { %v2712_v42 = vpack.c.bf16 %v1401_v34, %v1400_v30  ;;  %v2892_v43 = vpack.c.bf16 %v1473_v35, %v1472_v31  ;;  %v1399_v44 = vmax.f32 %v827_v36, 0.0  ;;  %v1471_v45 = vmax.f32 %v1115_v37, 0.0 }
  0xe3   :  { %v848_v46 = vadd.f32 %v3228_v40, %v3782_v17  ;;  %v1136_v47 = vadd.f32 %v3300_v41, %v3782_v17  ;;  %v839_v48 = vpop.f32.mrf.mxu0  ;;  %v1127_v49 = vpop.f32.mrf.mxu1 }
  0xe4   :  { %3064 = vst [vmem:[%s4136_s3 + $0x8] sm:$0xff] %v2712_v42   ;;  %3100 = vst [vmem:[%s4136_s3 + $0x128] sm:$0xff] %v2892_v43   ;;  %v2707_v50 = vpack.c.bf16 %v1399_v44, %v1398_v38  ;;  %v2887_v51 = vpack.c.bf16 %v1471_v45, %v1470_v39  ;;  %v840_v52 = vadd.f32 %v3782_v17, %v839_v48 }
  0xe5   :  { %v1128_v53 = vadd.f32 %v3782_v17, %v1127_v49  ;;  %v3229_v54 = vpop.f32.mrf.mxu0  ;;  %v3301_v55 = vpop.f32.mrf.mxu1  ;;  %v1404_v58 = vmax.f32 %v848_v46, 0.0  ;;  %v1476_v59 = vmax.f32 %v1136_v47, 0.0 }
  0xe6   :  { %2708 = vst [vmem:[%s4136_s3] sm:$0xff] %v2707_v50   ;;  %3099 = vst [vmem:[%s4136_s3 + $0x120] sm:$0xff] %v2887_v51   ;;  %v851_v56 = vadd.f32 %v3229_v54, %v3782_v17  ;;  %v1139_v57 = vadd.f32 %v3301_v55, %v3782_v17  ;;  %v1402_v2 = vmax.f32 %v840_v52, 0.0 }
  0xe7   :  { %v842_v60 = vpop.f32.mrf.mxu0  ;;  %v1130_v61 = vpop.f32.mrf.mxu1  ;;  %v1474_v3 = vmax.f32 %v1128_v53, 0.0 }
  0xe8   :  { %v1405_v62 = vmax.f32 %v851_v56, 0.0  ;;  %v1477_v63 = vmax.f32 %v1139_v57, 0.0  ;;  %v843_v0 = vadd.f32 %v3782_v17, %v842_v60  ;;  %v1131_v1 = vadd.f32 %v3782_v17, %v1130_v61 }
  0xe9   :  { %v3232_v4 = vpop.f32.mrf.mxu0  ;;  %v3304_v5 = vpop.f32.mrf.mxu1 }
  0xea   :  { %v2722_v6 = vpack.c.bf16 %v1405_v62, %v1404_v58  ;;  %v2902_v7 = vpack.c.bf16 %v1477_v63, %v1476_v59  ;;  %v1403_v8 = vmax.f32 %v843_v0, 0.0  ;;  %v1475_v9 = vmax.f32 %v1131_v1, 0.0 }
  0xeb   :  { %v864_v10 = vadd.f32 %v3232_v4, %v3782_v17  ;;  %v1152_v11 = vadd.f32 %v3304_v5, %v3782_v17  ;;  %v855_v12 = vpop.f32.mrf.mxu0  ;;  %v1143_v13 = vpop.f32.mrf.mxu1 }
  0xec   :  { %3066 = vst [vmem:[%s4136_s3 + $0x18] sm:$0xff] %v2722_v6   ;;  %3102 = vst [vmem:[%s4136_s3 + $0x138] sm:$0xff] %v2902_v7   ;;  %v2717_v14 = vpack.c.bf16 %v1403_v8, %v1402_v2  ;;  %v2897_v15 = vpack.c.bf16 %v1475_v9, %v1474_v3  ;;  %v856_v16 = vadd.f32 %v3782_v17, %v855_v12 }
  0xed   :  { %v1144_v18 = vadd.f32 %v3782_v17, %v1143_v13  ;;  %v3233_v19 = vpop.f32.mrf.mxu0  ;;  %v3305_v20 = vpop.f32.mrf.mxu1  ;;  %v1408_v23 = vmax.f32 %v864_v10, 0.0  ;;  %v1480_v24 = vmax.f32 %v1152_v11, 0.0 }
  0xee   :  { %3065 = vst [vmem:[%s4136_s3 + $0x10] sm:$0xff] %v2717_v14   ;;  %3101 = vst [vmem:[%s4136_s3 + $0x130] sm:$0xff] %v2897_v15   ;;  %v867_v21 = vadd.f32 %v3233_v19, %v3782_v17  ;;  %v1155_v22 = vadd.f32 %v3305_v20, %v3782_v17  ;;  %v1406_v31 = vmax.f32 %v856_v16, 0.0 }
  0xef   :  { %v858_v25 = vpop.f32.mrf.mxu0  ;;  %v1146_v26 = vpop.f32.mrf.mxu1  ;;  %v1478_v32 = vmax.f32 %v1144_v18, 0.0 }
  0xf0   :  { %v1409_v27 = vmax.f32 %v867_v21, 0.0  ;;  %v1481_v28 = vmax.f32 %v1155_v22, 0.0  ;;  %v859_v29 = vadd.f32 %v3782_v17, %v858_v25  ;;  %v1147_v30 = vadd.f32 %v3782_v17, %v1146_v26 }
  0xf1   :  { %v3236_v33 = vpop.f32.mrf.mxu0  ;;  %v3308_v34 = vpop.f32.mrf.mxu1 }
  0xf2   :  { %v2732_v35 = vpack.c.bf16 %v1409_v27, %v1408_v23  ;;  %v2912_v36 = vpack.c.bf16 %v1481_v28, %v1480_v24  ;;  %v1407_v37 = vmax.f32 %v859_v29, 0.0  ;;  %v1479_v38 = vmax.f32 %v1147_v30, 0.0 }
  0xf3   :  { %v880_v39 = vadd.f32 %v3236_v33, %v3782_v17  ;;  %v1168_v40 = vadd.f32 %v3308_v34, %v3782_v17  ;;  %v871_v41 = vpop.f32.mrf.mxu0  ;;  %v1159_v42 = vpop.f32.mrf.mxu1 }
  0xf4   :  { %3068 = vst [vmem:[%s4136_s3 + $0x28] sm:$0xff] %v2732_v35   ;;  %3104 = vst [vmem:[%s4136_s3 + $0x148] sm:$0xff] %v2912_v36   ;;  %v2727_v43 = vpack.c.bf16 %v1407_v37, %v1406_v31  ;;  %v2907_v44 = vpack.c.bf16 %v1479_v38, %v1478_v32  ;;  %v872_v45 = vadd.f32 %v3782_v17, %v871_v41 }
  0xf5   :  { %v1160_v46 = vadd.f32 %v3782_v17, %v1159_v42  ;;  %v3237_v47 = vpop.f32.mrf.mxu0  ;;  %v3309_v48 = vpop.f32.mrf.mxu1  ;;  %v1412_v51 = vmax.f32 %v880_v39, 0.0  ;;  %v1484_v52 = vmax.f32 %v1168_v40, 0.0 }
  0xf6   :  { %3067 = vst [vmem:[%s4136_s3 + $0x20] sm:$0xff] %v2727_v43   ;;  %3103 = vst [vmem:[%s4136_s3 + $0x140] sm:$0xff] %v2907_v44   ;;  %v883_v49 = vadd.f32 %v3237_v47, %v3782_v17  ;;  %v1171_v50 = vadd.f32 %v3309_v48, %v3782_v17  ;;  %v1410_v59 = vmax.f32 %v872_v45, 0.0 }
  0xf7   :  { %v874_v53 = vpop.f32.mrf.mxu0  ;;  %v1162_v54 = vpop.f32.mrf.mxu1  ;;  %v1482_v60 = vmax.f32 %v1160_v46, 0.0 }
  0xf8   :  { %v1413_v55 = vmax.f32 %v883_v49, 0.0  ;;  %v1485_v56 = vmax.f32 %v1171_v50, 0.0  ;;  %v875_v57 = vadd.f32 %v3782_v17, %v874_v53  ;;  %v1163_v58 = vadd.f32 %v3782_v17, %v1162_v54 }
  0xf9   :  { %v3240_v61 = vpop.f32.mrf.mxu0  ;;  %v3312_v62 = vpop.f32.mrf.mxu1 }
  0xfa   :  { %v2742_v63 = vpack.c.bf16 %v1413_v55, %v1412_v51  ;;  %v2922_v0 = vpack.c.bf16 %v1485_v56, %v1484_v52  ;;  %v1411_v1 = vmax.f32 %v875_v57, 0.0  ;;  %v1483_v2 = vmax.f32 %v1163_v58, 0.0 }
  0xfb   :  { %v896_v3 = vadd.f32 %v3240_v61, %v3782_v17  ;;  %v1184_v4 = vadd.f32 %v3312_v62, %v3782_v17  ;;  %v887_v5 = vpop.f32.mrf.mxu0  ;;  %v1175_v6 = vpop.f32.mrf.mxu1 }
  0xfc   :  { %3070 = vst [vmem:[%s4136_s3 + $0x38] sm:$0xff] %v2742_v63   ;;  %3106 = vst [vmem:[%s4136_s3 + $0x158] sm:$0xff] %v2922_v0   ;;  %v2737_v7 = vpack.c.bf16 %v1411_v1, %v1410_v59  ;;  %v2917_v8 = vpack.c.bf16 %v1483_v2, %v1482_v60  ;;  %v888_v9 = vadd.f32 %v3782_v17, %v887_v5 }
  0xfd   :  { %v1176_v10 = vadd.f32 %v3782_v17, %v1175_v6  ;;  %v3241_v11 = vpop.f32.mrf.mxu0  ;;  %v3313_v12 = vpop.f32.mrf.mxu1  ;;  %v1416_v15 = vmax.f32 %v896_v3, 0.0  ;;  %v1488_v16 = vmax.f32 %v1184_v4, 0.0 }
  0xfe   :  { %3069 = vst [vmem:[%s4136_s3 + $0x30] sm:$0xff] %v2737_v7   ;;  %3105 = vst [vmem:[%s4136_s3 + $0x150] sm:$0xff] %v2917_v8   ;;  %v899_v13 = vadd.f32 %v3241_v11, %v3782_v17  ;;  %v1187_v14 = vadd.f32 %v3313_v12, %v3782_v17  ;;  %v1414_v24 = vmax.f32 %v888_v9, 0.0 }
  0xff   :  { %v890_v18 = vpop.f32.mrf.mxu0  ;;  %v1178_v19 = vpop.f32.mrf.mxu1  ;;  %v1486_v25 = vmax.f32 %v1176_v10, 0.0 }
 0x100   :  { %v1417_v20 = vmax.f32 %v899_v13, 0.0  ;;  %v1489_v21 = vmax.f32 %v1187_v14, 0.0  ;;  %v891_v22 = vadd.f32 %v3782_v17, %v890_v18  ;;  %v1179_v23 = vadd.f32 %v3782_v17, %v1178_v19 }
 0x101   :  { %v3244_v26 = vpop.f32.mrf.mxu0  ;;  %v3316_v27 = vpop.f32.mrf.mxu1 }
 0x102   :  { %v2752_v28 = vpack.c.bf16 %v1417_v20, %v1416_v15  ;;  %v2932_v29 = vpack.c.bf16 %v1489_v21, %v1488_v16  ;;  %v1415_v30 = vmax.f32 %v891_v22, 0.0  ;;  %v1487_v31 = vmax.f32 %v1179_v23, 0.0 }
 0x103   :  { %v912_v32 = vadd.f32 %v3244_v26, %v3782_v17  ;;  %v1200_v33 = vadd.f32 %v3316_v27, %v3782_v17  ;;  %v903_v34 = vpop.f32.mrf.mxu0  ;;  %v1191_v35 = vpop.f32.mrf.mxu1 }
 0x104   :  { %3072 = vst [vmem:[%s4136_s3 + $0x48] sm:$0xff] %v2752_v28   ;;  %3108 = vst [vmem:[%s4136_s3 + $0x168] sm:$0xff] %v2932_v29   ;;  %v2747_v36 = vpack.c.bf16 %v1415_v30, %v1414_v24  ;;  %v2927_v37 = vpack.c.bf16 %v1487_v31, %v1486_v25  ;;  %v904_v38 = vadd.f32 %v3782_v17, %v903_v34 }
 0x105   :  { %v1192_v39 = vadd.f32 %v3782_v17, %v1191_v35  ;;  %v3245_v40 = vpop.f32.mrf.mxu0  ;;  %v3317_v41 = vpop.f32.mrf.mxu1  ;;  %v1420_v44 = vmax.f32 %v912_v32, 0.0  ;;  %v1492_v45 = vmax.f32 %v1200_v33, 0.0 }
 0x106   :  { %3071 = vst [vmem:[%s4136_s3 + $0x40] sm:$0xff] %v2747_v36   ;;  %3107 = vst [vmem:[%s4136_s3 + $0x160] sm:$0xff] %v2927_v37   ;;  %v915_v42 = vadd.f32 %v3245_v40, %v3782_v17  ;;  %v1203_v43 = vadd.f32 %v3317_v41, %v3782_v17  ;;  %v1418_v52 = vmax.f32 %v904_v38, 0.0 }
 0x107   :  { %v906_v46 = vpop.f32.mrf.mxu0  ;;  %v1194_v47 = vpop.f32.mrf.mxu1  ;;  %v1490_v53 = vmax.f32 %v1192_v39, 0.0 }
 0x108   :  { %v1421_v48 = vmax.f32 %v915_v42, 0.0  ;;  %v1493_v49 = vmax.f32 %v1203_v43, 0.0  ;;  %v907_v50 = vadd.f32 %v3782_v17, %v906_v46  ;;  %v1195_v51 = vadd.f32 %v3782_v17, %v1194_v47 }
 0x109   :  { %v3248_v54 = vpop.f32.mrf.mxu0  ;;  %v3320_v55 = vpop.f32.mrf.mxu1 }
 0x10a   :  { %v2762_v56 = vpack.c.bf16 %v1421_v48, %v1420_v44  ;;  %v2942_v57 = vpack.c.bf16 %v1493_v49, %v1492_v45  ;;  %v1419_v58 = vmax.f32 %v907_v50, 0.0  ;;  %v1491_v59 = vmax.f32 %v1195_v51, 0.0 }
 0x10b   :  { %v928_v60 = vadd.f32 %v3248_v54, %v3782_v17  ;;  %v1216_v61 = vadd.f32 %v3320_v55, %v3782_v17  ;;  %v919_v62 = vpop.f32.mrf.mxu0  ;;  %v1207_v63 = vpop.f32.mrf.mxu1 }
 0x10c   :  { %3074 = vst [vmem:[%s4136_s3 + $0x58] sm:$0xff] %v2762_v56   ;;  %3110 = vst [vmem:[%s4136_s3 + $0x178] sm:$0xff] %v2942_v57   ;;  %v2757_v0 = vpack.c.bf16 %v1419_v58, %v1418_v52  ;;  %v2937_v1 = vpack.c.bf16 %v1491_v59, %v1490_v53  ;;  %v920_v2 = vadd.f32 %v3782_v17, %v919_v62 }
 0x10d   :  { %v1208_v3 = vadd.f32 %v3782_v17, %v1207_v63  ;;  %v3249_v4 = vpop.f32.mrf.mxu0  ;;  %v3321_v5 = vpop.f32.mrf.mxu1  ;;  %v1424_v8 = vmax.f32 %v928_v60, 0.0  ;;  %v1496_v9 = vmax.f32 %v1216_v61, 0.0 }
 0x10e   :  { %3073 = vst [vmem:[%s4136_s3 + $0x50] sm:$0xff] %v2757_v0   ;;  %3109 = vst [vmem:[%s4136_s3 + $0x170] sm:$0xff] %v2937_v1   ;;  %v931_v6 = vadd.f32 %v3249_v4, %v3782_v17  ;;  %v1219_v7 = vadd.f32 %v3321_v5, %v3782_v17  ;;  %v1422_v16 = vmax.f32 %v920_v2, 0.0 }
 0x10f   :  { %v922_v10 = vpop.f32.mrf.mxu0  ;;  %v1210_v11 = vpop.f32.mrf.mxu1  ;;  %v1494_v18 = vmax.f32 %v1208_v3, 0.0 }
 0x110   :  { %v1425_v12 = vmax.f32 %v931_v6, 0.0  ;;  %v1497_v13 = vmax.f32 %v1219_v7, 0.0  ;;  %v923_v14 = vadd.f32 %v3782_v17, %v922_v10  ;;  %v1211_v15 = vadd.f32 %v3782_v17, %v1210_v11 }
 0x111   :  { %v3252_v19 = vpop.f32.mrf.mxu0  ;;  %v3324_v20 = vpop.f32.mrf.mxu1 }
 0x112   :  { %v2772_v21 = vpack.c.bf16 %v1425_v12, %v1424_v8  ;;  %v2952_v22 = vpack.c.bf16 %v1497_v13, %v1496_v9  ;;  %v1423_v23 = vmax.f32 %v923_v14, 0.0  ;;  %v1495_v24 = vmax.f32 %v1211_v15, 0.0 }
 0x113   :  { %v944_v25 = vadd.f32 %v3252_v19, %v3782_v17  ;;  %v1232_v26 = vadd.f32 %v3324_v20, %v3782_v17  ;;  %v935_v27 = vpop.f32.mrf.mxu0  ;;  %v1223_v28 = vpop.f32.mrf.mxu1 }
 0x114   :  { %3076 = vst [vmem:[%s4136_s3 + $0x68] sm:$0xff] %v2772_v21   ;;  %3112 = vst [vmem:[%s4136_s3 + $0x188] sm:$0xff] %v2952_v22   ;;  %v2767_v29 = vpack.c.bf16 %v1423_v23, %v1422_v16  ;;  %v2947_v30 = vpack.c.bf16 %v1495_v24, %v1494_v18  ;;  %v936_v31 = vadd.f32 %v3782_v17, %v935_v27 }
 0x115   :  { %v1224_v32 = vadd.f32 %v3782_v17, %v1223_v28  ;;  %v3253_v33 = vpop.f32.mrf.mxu0  ;;  %v3325_v34 = vpop.f32.mrf.mxu1  ;;  %v1428_v37 = vmax.f32 %v944_v25, 0.0  ;;  %v1500_v38 = vmax.f32 %v1232_v26, 0.0 }
 0x116   :  { %3075 = vst [vmem:[%s4136_s3 + $0x60] sm:$0xff] %v2767_v29   ;;  %3111 = vst [vmem:[%s4136_s3 + $0x180] sm:$0xff] %v2947_v30   ;;  %v947_v35 = vadd.f32 %v3253_v33, %v3782_v17  ;;  %v1235_v36 = vadd.f32 %v3325_v34, %v3782_v17  ;;  %v1426_v45 = vmax.f32 %v936_v31, 0.0 }
 0x117   :  { %v938_v39 = vpop.f32.mrf.mxu0  ;;  %v1226_v40 = vpop.f32.mrf.mxu1  ;;  %v1498_v46 = vmax.f32 %v1224_v32, 0.0 }
 0x118   :  { %v1429_v41 = vmax.f32 %v947_v35, 0.0  ;;  %v1501_v42 = vmax.f32 %v1235_v36, 0.0  ;;  %v939_v43 = vadd.f32 %v3782_v17, %v938_v39  ;;  %v1227_v44 = vadd.f32 %v3782_v17, %v1226_v40 }
 0x119   :  { %v3256_v47 = vpop.f32.mrf.mxu0  ;;  %v3328_v48 = vpop.f32.mrf.mxu1 }
 0x11a   :  { %v2782_v49 = vpack.c.bf16 %v1429_v41, %v1428_v37  ;;  %v2962_v50 = vpack.c.bf16 %v1501_v42, %v1500_v38  ;;  %v1427_v51 = vmax.f32 %v939_v43, 0.0  ;;  %v1499_v52 = vmax.f32 %v1227_v44, 0.0 }
 0x11b   :  { %v960_v53 = vadd.f32 %v3256_v47, %v3782_v17  ;;  %v1248_v54 = vadd.f32 %v3328_v48, %v3782_v17  ;;  %v951_v55 = vpop.f32.mrf.mxu0  ;;  %v1239_v56 = vpop.f32.mrf.mxu1 }
 0x11c   :  { %3078 = vst [vmem:[%s4136_s3 + $0x78] sm:$0xff] %v2782_v49   ;;  %3114 = vst [vmem:[%s4136_s3 + $0x198] sm:$0xff] %v2962_v50   ;;  %v2777_v57 = vpack.c.bf16 %v1427_v51, %v1426_v45  ;;  %v2957_v58 = vpack.c.bf16 %v1499_v52, %v1498_v46  ;;  %v952_v59 = vadd.f32 %v3782_v17, %v951_v55 }
 0x11d   :  { %v1240_v60 = vadd.f32 %v3782_v17, %v1239_v56  ;;  %v3257_v61 = vpop.f32.mrf.mxu0  ;;  %v3329_v62 = vpop.f32.mrf.mxu1  ;;  %v1432_v1 = vmax.f32 %v960_v53, 0.0  ;;  %v1504_v2 = vmax.f32 %v1248_v54, 0.0 }
 0x11e   :  { %3077 = vst [vmem:[%s4136_s3 + $0x70] sm:$0xff] %v2777_v57   ;;  %3113 = vst [vmem:[%s4136_s3 + $0x190] sm:$0xff] %v2957_v58   ;;  %v963_v63 = vadd.f32 %v3257_v61, %v3782_v17  ;;  %v1251_v0 = vadd.f32 %v3329_v62, %v3782_v17  ;;  %v1430_v9 = vmax.f32 %v952_v59, 0.0 }
 0x11f   :  { %v954_v3 = vpop.f32.mrf.mxu0  ;;  %v1242_v4 = vpop.f32.mrf.mxu1  ;;  %v1502_v10 = vmax.f32 %v1240_v60, 0.0 }
 0x120   :  { %v1433_v5 = vmax.f32 %v963_v63, 0.0  ;;  %v1505_v6 = vmax.f32 %v1251_v0, 0.0  ;;  %v955_v7 = vadd.f32 %v3782_v17, %v954_v3  ;;  %v1243_v8 = vadd.f32 %v3782_v17, %v1242_v4 }
 0x121   :  { %v3260_v11 = vpop.f32.mrf.mxu0  ;;  %v3332_v12 = vpop.f32.mrf.mxu1 }
 0x122   :  { %v2792_v13 = vpack.c.bf16 %v1433_v5, %v1432_v1  ;;  %v2972_v14 = vpack.c.bf16 %v1505_v6, %v1504_v2  ;;  %v1431_v15 = vmax.f32 %v955_v7, 0.0  ;;  %v1503_v16 = vmax.f32 %v1243_v8, 0.0 }
 0x123   :  { %v976_v18 = vadd.f32 %v3260_v11, %v3782_v17  ;;  %v1264_v19 = vadd.f32 %v3332_v12, %v3782_v17  ;;  %v967_v20 = vpop.f32.mrf.mxu0  ;;  %v1255_v21 = vpop.f32.mrf.mxu1 }
 0x124   :  { %3080 = vst [vmem:[%s4136_s3 + $0x88] sm:$0xff] %v2792_v13   ;;  %3116 = vst [vmem:[%s4136_s3 + $0x1a8] sm:$0xff] %v2972_v14   ;;  %v2787_v22 = vpack.c.bf16 %v1431_v15, %v1430_v9  ;;  %v2967_v23 = vpack.c.bf16 %v1503_v16, %v1502_v10  ;;  %v968_v24 = vadd.f32 %v3782_v17, %v967_v20 }
 0x125   :  { %v1256_v25 = vadd.f32 %v3782_v17, %v1255_v21  ;;  %v3261_v26 = vpop.f32.mrf.mxu0  ;;  %v3333_v27 = vpop.f32.mrf.mxu1  ;;  %v1436_v30 = vmax.f32 %v976_v18, 0.0  ;;  %v1508_v31 = vmax.f32 %v1264_v19, 0.0 }
 0x126   :  { %3079 = vst [vmem:[%s4136_s3 + $0x80] sm:$0xff] %v2787_v22   ;;  %3115 = vst [vmem:[%s4136_s3 + $0x1a0] sm:$0xff] %v2967_v23   ;;  %v979_v28 = vadd.f32 %v3261_v26, %v3782_v17  ;;  %v1267_v29 = vadd.f32 %v3333_v27, %v3782_v17  ;;  %v1434_v38 = vmax.f32 %v968_v24, 0.0 }
 0x127   :  { %v970_v32 = vpop.f32.mrf.mxu0  ;;  %v1258_v33 = vpop.f32.mrf.mxu1  ;;  %v1506_v39 = vmax.f32 %v1256_v25, 0.0 }
 0x128   :  { %v1437_v34 = vmax.f32 %v979_v28, 0.0  ;;  %v1509_v35 = vmax.f32 %v1267_v29, 0.0  ;;  %v971_v36 = vadd.f32 %v3782_v17, %v970_v32  ;;  %v1259_v37 = vadd.f32 %v3782_v17, %v1258_v33 }
 0x129   :  { %v3264_v40 = vpop.f32.mrf.mxu0  ;;  %v3336_v41 = vpop.f32.mrf.mxu1 }
 0x12a   :  { %v2802_v42 = vpack.c.bf16 %v1437_v34, %v1436_v30  ;;  %v2982_v43 = vpack.c.bf16 %v1509_v35, %v1508_v31  ;;  %v1435_v44 = vmax.f32 %v971_v36, 0.0  ;;  %v1507_v45 = vmax.f32 %v1259_v37, 0.0 }
 0x12b   :  { %v992_v46 = vadd.f32 %v3264_v40, %v3782_v17  ;;  %v1280_v47 = vadd.f32 %v3336_v41, %v3782_v17  ;;  %v983_v48 = vpop.f32.mrf.mxu0  ;;  %v1271_v49 = vpop.f32.mrf.mxu1 }
 0x12c   :  { %3082 = vst [vmem:[%s4136_s3 + $0x98] sm:$0xff] %v2802_v42   ;;  %3118 = vst [vmem:[%s4136_s3 + $0x1b8] sm:$0xff] %v2982_v43   ;;  %v2797_v50 = vpack.c.bf16 %v1435_v44, %v1434_v38  ;;  %v2977_v51 = vpack.c.bf16 %v1507_v45, %v1506_v39  ;;  %v984_v52 = vadd.f32 %v3782_v17, %v983_v48 }
 0x12d   :  { %v1272_v53 = vadd.f32 %v3782_v17, %v1271_v49  ;;  %v3265_v54 = vpop.f32.mrf.mxu0  ;;  %v3337_v55 = vpop.f32.mrf.mxu1  ;;  %v1440_v58 = vmax.f32 %v992_v46, 0.0  ;;  %v1512_v59 = vmax.f32 %v1280_v47, 0.0 }
 0x12e   :  { %3081 = vst [vmem:[%s4136_s3 + $0x90] sm:$0xff] %v2797_v50   ;;  %3117 = vst [vmem:[%s4136_s3 + $0x1b0] sm:$0xff] %v2977_v51   ;;  %v995_v56 = vadd.f32 %v3265_v54, %v3782_v17  ;;  %v1283_v57 = vadd.f32 %v3337_v55, %v3782_v17  ;;  %v1438_v2 = vmax.f32 %v984_v52, 0.0 }
 0x12f   :  { %v986_v60 = vpop.f32.mrf.mxu0  ;;  %v1274_v61 = vpop.f32.mrf.mxu1  ;;  %v1510_v3 = vmax.f32 %v1272_v53, 0.0 }
 0x130   :  { %v1441_v62 = vmax.f32 %v995_v56, 0.0  ;;  %v1513_v63 = vmax.f32 %v1283_v57, 0.0  ;;  %v987_v0 = vadd.f32 %v3782_v17, %v986_v60  ;;  %v1275_v1 = vadd.f32 %v3782_v17, %v1274_v61 }
 0x131   :  { %v3268_v4 = vpop.f32.mrf.mxu0  ;;  %v3340_v5 = vpop.f32.mrf.mxu1 }
 0x132   :  { %v2812_v6 = vpack.c.bf16 %v1441_v62, %v1440_v58  ;;  %v2992_v7 = vpack.c.bf16 %v1513_v63, %v1512_v59  ;;  %v1439_v8 = vmax.f32 %v987_v0, 0.0  ;;  %v1511_v9 = vmax.f32 %v1275_v1, 0.0 }
 0x133   :  { %v1008_v10 = vadd.f32 %v3268_v4, %v3782_v17  ;;  %v1296_v11 = vadd.f32 %v3340_v5, %v3782_v17  ;;  %v999_v12 = vpop.f32.mrf.mxu0  ;;  %v1287_v13 = vpop.f32.mrf.mxu1 }
 0x134   :  { %3084 = vst [vmem:[%s4136_s3 + $0xa8] sm:$0xff] %v2812_v6   ;;  %3120 = vst [vmem:[%s4136_s3 + $0x1c8] sm:$0xff] %v2992_v7   ;;  %v2807_v14 = vpack.c.bf16 %v1439_v8, %v1438_v2  ;;  %v2987_v15 = vpack.c.bf16 %v1511_v9, %v1510_v3  ;;  %v1000_v16 = vadd.f32 %v3782_v17, %v999_v12 }
 0x135   :  { %v1288_v18 = vadd.f32 %v3782_v17, %v1287_v13  ;;  %v3269_v19 = vpop.f32.mrf.mxu0  ;;  %v3341_v20 = vpop.f32.mrf.mxu1  ;;  %v1444_v23 = vmax.f32 %v1008_v10, 0.0  ;;  %v1516_v24 = vmax.f32 %v1296_v11, 0.0 }
 0x136   :  { %3083 = vst [vmem:[%s4136_s3 + $0xa0] sm:$0xff] %v2807_v14   ;;  %3119 = vst [vmem:[%s4136_s3 + $0x1c0] sm:$0xff] %v2987_v15   ;;  %v1011_v21 = vadd.f32 %v3269_v19, %v3782_v17  ;;  %v1299_v22 = vadd.f32 %v3341_v20, %v3782_v17  ;;  %v1442_v31 = vmax.f32 %v1000_v16, 0.0 }
 0x137   :  { %v1002_v25 = vpop.f32.mrf.mxu0  ;;  %v1290_v26 = vpop.f32.mrf.mxu1  ;;  %v1514_v32 = vmax.f32 %v1288_v18, 0.0 }
 0x138   :  { %v1445_v27 = vmax.f32 %v1011_v21, 0.0  ;;  %v1517_v28 = vmax.f32 %v1299_v22, 0.0  ;;  %v1003_v29 = vadd.f32 %v3782_v17, %v1002_v25  ;;  %v1291_v30 = vadd.f32 %v3782_v17, %v1290_v26 }
 0x139   :  { %v3272_v33 = vpop.f32.mrf.mxu0  ;;  %v3344_v34 = vpop.f32.mrf.mxu1 }
 0x13a   :  { %v2822_v35 = vpack.c.bf16 %v1445_v27, %v1444_v23  ;;  %v3002_v36 = vpack.c.bf16 %v1517_v28, %v1516_v24  ;;  %v1443_v37 = vmax.f32 %v1003_v29, 0.0  ;;  %v1515_v38 = vmax.f32 %v1291_v30, 0.0 }
 0x13b   :  { %v1024_v39 = vadd.f32 %v3272_v33, %v3782_v17  ;;  %v1312_v40 = vadd.f32 %v3344_v34, %v3782_v17  ;;  %v1015_v41 = vpop.f32.mrf.mxu0  ;;  %v1303_v42 = vpop.f32.mrf.mxu1 }
 0x13c   :  { %3086 = vst [vmem:[%s4136_s3 + $0xb8] sm:$0xff] %v2822_v35   ;;  %3122 = vst [vmem:[%s4136_s3 + $0x1d8] sm:$0xff] %v3002_v36   ;;  %v2817_v43 = vpack.c.bf16 %v1443_v37, %v1442_v31  ;;  %v2997_v44 = vpack.c.bf16 %v1515_v38, %v1514_v32  ;;  %v1016_v45 = vadd.f32 %v3782_v17, %v1015_v41 }
 0x13d   :  { %v1304_v46 = vadd.f32 %v3782_v17, %v1303_v42  ;;  %v3273_v47 = vpop.f32.mrf.mxu0  ;;  %v3345_v48 = vpop.f32.mrf.mxu1  ;;  %v1448_v51 = vmax.f32 %v1024_v39, 0.0  ;;  %v1520_v52 = vmax.f32 %v1312_v40, 0.0 }
 0x13e   :  { %3085 = vst [vmem:[%s4136_s3 + $0xb0] sm:$0xff] %v2817_v43   ;;  %3121 = vst [vmem:[%s4136_s3 + $0x1d0] sm:$0xff] %v2997_v44   ;;  %v1027_v49 = vadd.f32 %v3273_v47, %v3782_v17  ;;  %v1315_v50 = vadd.f32 %v3345_v48, %v3782_v17  ;;  %v1446_v59 = vmax.f32 %v1016_v45, 0.0 }
 0x13f   :  { %v1018_v53 = vpop.f32.mrf.mxu0  ;;  %v1306_v54 = vpop.f32.mrf.mxu1  ;;  %v1518_v60 = vmax.f32 %v1304_v46, 0.0 }
 0x140   :  { %v1449_v55 = vmax.f32 %v1027_v49, 0.0  ;;  %v1521_v56 = vmax.f32 %v1315_v50, 0.0  ;;  %v1019_v57 = vadd.f32 %v3782_v17, %v1018_v53  ;;  %v1307_v58 = vadd.f32 %v3782_v17, %v1306_v54 }
 0x141   :  { %v3276_v61 = vpop.f32.mrf.mxu0  ;;  %v3348_v62 = vpop.f32.mrf.mxu1 }
 0x142   :  { %v2832_v63 = vpack.c.bf16 %v1449_v55, %v1448_v51  ;;  %v3012_v0 = vpack.c.bf16 %v1521_v56, %v1520_v52  ;;  %v1447_v1 = vmax.f32 %v1019_v57, 0.0  ;;  %v1519_v2 = vmax.f32 %v1307_v58, 0.0 }
 0x143   :  { %v1040_v3 = vadd.f32 %v3276_v61, %v3782_v17  ;;  %v1328_v4 = vadd.f32 %v3348_v62, %v3782_v17  ;;  %v1031_v5 = vpop.f32.mrf.mxu0  ;;  %v1319_v6 = vpop.f32.mrf.mxu1 }
 0x144   :  { %3088 = vst [vmem:[%s4136_s3 + $0xc8] sm:$0xff] %v2832_v63   ;;  %3124 = vst [vmem:[%s4136_s3 + $0x1e8] sm:$0xff] %v3012_v0   ;;  %v2827_v7 = vpack.c.bf16 %v1447_v1, %v1446_v59  ;;  %v3007_v8 = vpack.c.bf16 %v1519_v2, %v1518_v60  ;;  %v1032_v9 = vadd.f32 %v3782_v17, %v1031_v5 }
 0x145   :  { %v1320_v10 = vadd.f32 %v3782_v17, %v1319_v6  ;;  %v3277_v11 = vpop.f32.mrf.mxu0  ;;  %v3349_v12 = vpop.f32.mrf.mxu1  ;;  %v1452_v15 = vmax.f32 %v1040_v3, 0.0  ;;  %v1524_v16 = vmax.f32 %v1328_v4, 0.0 }
 0x146   :  { %3087 = vst [vmem:[%s4136_s3 + $0xc0] sm:$0xff] %v2827_v7   ;;  %3123 = vst [vmem:[%s4136_s3 + $0x1e0] sm:$0xff] %v3007_v8   ;;  %v1043_v13 = vadd.f32 %v3277_v11, %v3782_v17  ;;  %v1331_v14 = vadd.f32 %v3349_v12, %v3782_v17  ;;  %v1450_v24 = vmax.f32 %v1032_v9, 0.0 }
 0x147   :  { %v1034_v18 = vpop.f32.mrf.mxu0  ;;  %v1322_v19 = vpop.f32.mrf.mxu1  ;;  %v1522_v25 = vmax.f32 %v1320_v10, 0.0 }
 0x148   :  { %v1453_v20 = vmax.f32 %v1043_v13, 0.0  ;;  %v1525_v21 = vmax.f32 %v1331_v14, 0.0  ;;  %v1035_v22 = vadd.f32 %v3782_v17, %v1034_v18  ;;  %v1323_v23 = vadd.f32 %v3782_v17, %v1322_v19 }
 0x149   :  { %v3280_v26 = vpop.f32.mrf.mxu0  ;;  %v3352_v27 = vpop.f32.mrf.mxu1 }
 0x14a   :  { %v2842_v28 = vpack.c.bf16 %v1453_v20, %v1452_v15  ;;  %v3022_v29 = vpack.c.bf16 %v1525_v21, %v1524_v16  ;;  %v1451_v30 = vmax.f32 %v1035_v22, 0.0  ;;  %v1523_v31 = vmax.f32 %v1323_v23, 0.0 }
 0x14b   :  { %v1056_v32 = vadd.f32 %v3280_v26, %v3782_v17  ;;  %v1344_v33 = vadd.f32 %v3352_v27, %v3782_v17  ;;  %v1047_v34 = vpop.f32.mrf.mxu0  ;;  %v1335_v35 = vpop.f32.mrf.mxu1 }
 0x14c   :  { %3090 = vst [vmem:[%s4136_s3 + $0xd8] sm:$0xff] %v2842_v28   ;;  %3126 = vst [vmem:[%s4136_s3 + $0x1f8] sm:$0xff] %v3022_v29   ;;  %v2837_v36 = vpack.c.bf16 %v1451_v30, %v1450_v24  ;;  %v3017_v37 = vpack.c.bf16 %v1523_v31, %v1522_v25  ;;  %v1048_v38 = vadd.f32 %v3782_v17, %v1047_v34  ;;  %v3454_v31 = vld [vmem:[%s4135_s2] ss:$0 sm:$0xff] }
 0x14d   :  { %v1336_v39 = vadd.f32 %v3782_v17, %v1335_v35  ;;  %v3281_v40 = vpop.f32.mrf.mxu0  ;;  %v3353_v41 = vpop.f32.mrf.mxu1  ;;  %v1456_v44 = vmax.f32 %v1056_v32, 0.0  ;;  %v1528_v45 = vmax.f32 %v1344_v33, 0.0 }
 0x14e   :  { %3089 = vst [vmem:[%s4136_s3 + $0xd0] sm:$0xff] %v2837_v36   ;;  %3125 = vst [vmem:[%s4136_s3 + $0x1f0] sm:$0xff] %v3017_v37   ;;  %v1059_v42 = vadd.f32 %v3281_v40, %v3782_v17  ;;  %v1347_v43 = vadd.f32 %v3353_v41, %v3782_v17  ;;  %v1454_v52 = vmax.f32 %v1048_v38, 0.0 }
 0x14f   :  { %v1050_v46 = vpop.f32.mrf.mxu0  ;;  %v1338_v47 = vpop.f32.mrf.mxu1  ;;  %v1526_v53 = vmax.f32 %v1336_v39, 0.0 }
 0x150   :  { %v1457_v48 = vmax.f32 %v1059_v42, 0.0  ;;  %v1529_v49 = vmax.f32 %v1347_v43, 0.0  ;;  %v1051_v50 = vadd.f32 %v3782_v17, %v1050_v46  ;;  %v1339_v51 = vadd.f32 %v3782_v17, %v1338_v47 }
 0x151   :  { %v3284_v54 = vpop.f32.mrf.mxu0  ;;  %v3356_v55 = vpop.f32.mrf.mxu1 }
 0x152   :  { %v2852_v56 = vpack.c.bf16 %v1457_v48, %v1456_v44  ;;  %v3032_v57 = vpack.c.bf16 %v1529_v49, %v1528_v45  ;;  %v1455_v58 = vmax.f32 %v1051_v50, 0.0  ;;  %v1527_v59 = vmax.f32 %v1339_v51, 0.0 }
 0x153   :  { %v1072_v60 = vadd.f32 %v3284_v54, %v3782_v17  ;;  %v1360_v61 = vadd.f32 %v3356_v55, %v3782_v17  ;;  %v1063_v62 = vpop.f32.mrf.mxu0  ;;  %v1351_v63 = vpop.f32.mrf.mxu1 }
 0x154   :  { %3092 = vst [vmem:[%s4136_s3 + $0xe8] sm:$0xff] %v2852_v56   ;;  %3128 = vst [vmem:[%s4136_s3 + $0x208] sm:$0xff] %v3032_v57   ;;  %v2847_v0 = vpack.c.bf16 %v1455_v58, %v1454_v52  ;;  %v3027_v1 = vpack.c.bf16 %v1527_v59, %v1526_v53  ;;  %v1064_v2 = vadd.f32 %v3782_v17, %v1063_v62 }
 0x155   :  { %v1352_v3 = vadd.f32 %v3782_v17, %v1351_v63  ;;  %v3285_v4 = vpop.f32.mrf.mxu0  ;;  %v3357_v5 = vpop.f32.mrf.mxu1  ;;  %v1460_v8 = vmax.f32 %v1072_v60, 0.0  ;;  %v1532_v9 = vmax.f32 %v1360_v61, 0.0 }
 0x156   :  { %3091 = vst [vmem:[%s4136_s3 + $0xe0] sm:$0xff] %v2847_v0   ;;  %3127 = vst [vmem:[%s4136_s3 + $0x200] sm:$0xff] %v3027_v1   ;;  %v1075_v6 = vadd.f32 %v3285_v4, %v3782_v17  ;;  %v1363_v7 = vadd.f32 %v3357_v5, %v3782_v17  ;;  %v1458_v16 = vmax.f32 %v1064_v2, 0.0 }
 0x157   :  { %v1066_v10 = vpop.f32.mrf.mxu0  ;;  %v1354_v11 = vpop.f32.mrf.mxu1  ;;  %v1530_v18 = vmax.f32 %v1352_v3, 0.0 }
 0x158   :  { %v1461_v12 = vmax.f32 %v1075_v6, 0.0  ;;  %v1533_v13 = vmax.f32 %v1363_v7, 0.0  ;;  %v1067_v14 = vadd.f32 %v3782_v17, %v1066_v10  ;;  %v1355_v15 = vadd.f32 %v3782_v17, %v1354_v11 }
 0x159   :  { %v3288_v19 = vpop.f32.mrf.mxu0  ;;  %v3360_v20 = vpop.f32.mrf.mxu1 }
 0x15a   :  { %v2862_v21 = vpack.c.bf16 %v1461_v12, %v1460_v8  ;;  %v3042_v22 = vpack.c.bf16 %v1533_v13, %v1532_v9  ;;  %v1459_v23 = vmax.f32 %v1067_v14, 0.0  ;;  %v1531_v24 = vmax.f32 %v1355_v15, 0.0 }
 0x15b   :  { %v1088_v25 = vadd.f32 %v3288_v19, %v3782_v17  ;;  %v1376_v26 = vadd.f32 %v3360_v20, %v3782_v17  ;;  %v1079_v27 = vpop.f32.mrf.mxu0  ;;  %v1367_v28 = vpop.f32.mrf.mxu1 }
 0x15c   :  { %3094 = vst [vmem:[%s4136_s3 + $0xf8] sm:$0xff] %v2862_v21   ;;  %3130 = vst [vmem:[%s4136_s3 + $0x218] sm:$0xff] %v3042_v22   ;;  %v2857_v29 = vpack.c.bf16 %v1459_v23, %v1458_v16  ;;  %v3037_v30 = vpack.c.bf16 %v1531_v24, %v1530_v18  ;;  %v1080_v32 = vadd.f32 %v3454_v31, %v1079_v27 }
 0x15d   :  { %v1368_v33 = vadd.f32 %v3454_v31, %v1367_v28  ;;  %v3289_v34 = vpop.f32.mrf.mxu0  ;;  %v3361_v17 = vpop.f32.mrf.mxu1  ;;  %v1464_v37 = vmax.f32 %v1088_v25, 0.0  ;;  %v1536_v38 = vmax.f32 %v1376_v26, 0.0 }
 0x15e   :  { %3093 = vst [vmem:[%s4136_s3 + $0xf0] sm:$0xff] %v2857_v29   ;;  %3129 = vst [vmem:[%s4136_s3 + $0x210] sm:$0xff] %v3037_v30   ;;  %v1091_v35 = vadd.f32 %v3454_v31, %v3289_v34  ;;  %v1379_v36 = vadd.f32 %v3454_v31, %v3361_v17  ;;  %v1462_v45 = vmax.f32 %v1080_v32, 0.0 }
 0x15f   :  { %v1082_v39 = vpop.f32.mrf.mxu0  ;;  %v1370_v40 = vpop.f32.mrf.mxu1  ;;  %v1534_v46 = vmax.f32 %v1368_v33, 0.0 }
 0x160   :  { %v1465_v41 = vmax.f32 %v1091_v35, 0.0  ;;  %v1537_v42 = vmax.f32 %v1379_v36, 0.0  ;;  %v1083_v43 = vadd.f32 %v3454_v31, %v1082_v39  ;;  %v1371_v44 = vadd.f32 %v3454_v31, %v1370_v40 }
 0x161   :  { %v3292_v47 = vpop.f32.mrf.mxu0  ;;  %v3364_v48 = vpop.f32.mrf.mxu1 }
 0x162   :  { %v2872_v49 = vpack.c.bf16 %v1465_v41, %v1464_v37  ;;  %v3052_v50 = vpack.c.bf16 %v1537_v42, %v1536_v38  ;;  %v1463_v51 = vmax.f32 %v1083_v43, 0.0  ;;  %v1535_v52 = vmax.f32 %v1371_v44, 0.0 }
 0x163   :  { %v1104_v53 = vadd.f32 %v3454_v31, %v3292_v47  ;;  %v1392_v54 = vadd.f32 %v3454_v31, %v3364_v48  ;;  %v1095_v55 = vpop.f32.mrf.mxu0  ;;  %v1383_v56 = vpop.f32.mrf.mxu1 }
 0x164   :  { %3096 = vst [vmem:[%s4136_s3 + $0x108] sm:$0xff] %v2872_v49   ;;  %3132 = vst [vmem:[%s4136_s3 + $0x228] sm:$0xff] %v3052_v50   ;;  %v2867_v57 = vpack.c.bf16 %v1463_v51, %v1462_v45  ;;  %v3047_v58 = vpack.c.bf16 %v1535_v52, %v1534_v46  ;;  %v1096_v59 = vadd.f32 %v3454_v31, %v1095_v55 }
 0x165   :  { %v1384_v60 = vadd.f32 %v3454_v31, %v1383_v56  ;;  %v3293_v61 = vpop.f32.mrf.mxu0  ;;  %v3365_v62 = vpop.f32.mrf.mxu1  ;;  %v1468_v1 = vmax.f32 %v1104_v53, 0.0  ;;  %v1540_v2 = vmax.f32 %v1392_v54, 0.0 }
 0x166   :  { %3095 = vst [vmem:[%s4136_s3 + $0x100] sm:$0xff] %v2867_v57   ;;  %3131 = vst [vmem:[%s4136_s3 + $0x220] sm:$0xff] %v3047_v58   ;;  %v1107_v63 = vadd.f32 %v3454_v31, %v3293_v61  ;;  %v1395_v0 = vadd.f32 %v3454_v31, %v3365_v62  ;;  %v1466_v9 = vmax.f32 %v1096_v59, 0.0 }
 0x167   :  { %v1098_v3 = vpop.f32.mrf.mxu0  ;;  %v1386_v4 = vpop.f32.mrf.mxu1  ;;  %v1538_v10 = vmax.f32 %v1384_v60, 0.0 }
 0x168   :  { %v1469_v5 = vmax.f32 %v1107_v63, 0.0  ;;  %v1541_v6 = vmax.f32 %v1395_v0, 0.0  ;;  %v1099_v7 = vadd.f32 %v3454_v31, %v1098_v3  ;;  %v1387_v8 = vadd.f32 %v3454_v31, %v1386_v4 }
 0x16a   :  { %v2882_v11 = vpack.c.bf16 %v1469_v5, %v1468_v1  ;;  %v3062_v12 = vpack.c.bf16 %v1541_v6, %v1540_v2  ;;  %v1467_v13 = vmax.f32 %v1099_v7, 0.0  ;;  %v1539_v14 = vmax.f32 %v1387_v8, 0.0 }
 0x16c   :  { %3098 = vst [vmem:[%s4136_s3 + $0x118] sm:$0xff] %v2882_v11   ;;  %3134 = vst [vmem:[%s4136_s3 + $0x238] sm:$0xff] %v3062_v12   ;;  %v2877_v15 = vpack.c.bf16 %v1467_v13, %v1466_v9  ;;  %v3057_v16 = vpack.c.bf16 %v1539_v14, %v1538_v10 }
 0x16e   :  { %3097 = vst [vmem:[%s4136_s3 + $0x110] sm:$0xff] %v2877_v15   ;;  %3133 = vst [vmem:[%s4136_s3 + $0x230] sm:$0xff] %v3057_v16  }

// kernel: forward.6
= control target key start
LH: loop header
LB: loop body
LE: loop exit
PB: predicated region body
PF: predicated region fallthrough
CT: control target
= control target key end

     0   :  { %v4176_v0 = vmov 0   ;;  %vm507_vm0 = vcmask 130048   ;;  %s5527_s1 = inlined_call_operand.vmem [shape: bf16[400,128], index: 1, kind: input, shape index: {}]   ;;  %s5528_s0 = inlined_call_operand.vmem [shape: bf16[4,200,400], index: 0, kind: input, shape index: {}]   ;;  %s5529_s2 = inlined_call_operand.vmem [shape: f32[1,128], index: 2, kind: input, shape index: {}]   ;;  %s5530_s3 = inlined_call_operand.vmem [shape: bf16[200,128], index: 3, kind: output, shape index: {}]  }
   0x1   :  { %683 = vmatprep.subr.bf16.mxu1 %v4176_v0  ;;  %v4201_v1 = vld [vmem:[%s5527_s1 + $0x78] sm:$0xff]   ;;  %v4218_v4 = vld [vmem:[%s5527_s1 + $0x70] sm:$0xff]   ;;  %v4236_v7 = vld [vmem:[%s5527_s1 + $0x68] sm:$0xff]  }
   0x2   :  { %v4206_v2 = vld [vmem:[%s5527_s1 + $0xb8] sm:$0xff]   ;;  %3446 = vmatprep.subr.bf16.mxu0 %v4201_v1  ;;  %v4225_v5 = vld [vmem:[%s5527_s1 + $0xb0] sm:$0xff]   ;;  %v4242_v8 = vld [vmem:[%s5527_s1 + $0xa8] sm:$0xff]  }
   0x3   :  { %v4212_v3 = vld [vmem:[%s5527_s1 + $0x38] sm:$0xff]   ;;  %684 = vmatpush1.bf16.msra.mxu1 %v4206_v2  ;;  %v4231_v6 = vld [vmem:[%s5527_s1 + $0x30] sm:$0xff]   ;;  %v4249_v9 = vld [vmem:[%s5527_s1 + $0x28] sm:$0xff]  }
   0x4   :  { %3447 = vmatpush3.bf16.msra.mxu0 %v4212_v3  ;;  %685 = vmatprep.subr.bf16.mxu1 %v4176_v0  ;;  %v4255_v10 = vld [vmem:[%s5527_s1 + $0x60] sm:$0xff]   ;;  %v4274_v13 = vld [vmem:[%s5527_s1 + $0x58] sm:$0xff]   ;;  %v4293_v16 = vld [vmem:[%s5527_s1 + $0x50] sm:$0xff]  }
   0x5   :  { %3448 = vmatprep.subr.bf16.mxu0 %v4218_v4  ;;  %v4261_v11 = vld [vmem:[%s5527_s1 + $0xa0] sm:$0xff]   ;;  %v4280_v14 = vld [vmem:[%s5527_s1 + $0x98] sm:$0xff]   ;;  %v4299_v17 = vld [vmem:[%s5527_s1 + $0x90] sm:$0xff]  }
   0x6   :  { %v4268_v12 = vld [vmem:[%s5527_s1 + $0x20] sm:$0xff]   ;;  %v4287_v15 = vld [vmem:[%s5527_s1 + $0x18] sm:$0xff]   ;;  %v4306_v18 = vld [vmem:[%s5527_s1 + $0x10] sm:$0xff]  }
   0x7   :  { %686 = vmatpush1.bf16.msra.mxu1 %v4225_v5  ;;  %v4312_v19 = vld [vmem:[%s5527_s1 + $0x48] sm:$0xff]   ;;  %v4330_v22 = vld [vmem:[%s5527_s1 + $0x40] sm:$0xff]  }
   0x8   :  { %3449 = vmatpush3.bf16.msra.mxu0 %v4231_v6  ;;  %687 = vmatprep.subr.bf16.mxu1 %v4176_v0  ;;  %v4317_v20 = vld [vmem:[%s5527_s1 + $0x88] sm:$0xff]   ;;  %v3849_v23 = vld [vmem:[%s5528_s0 + $0x4] ss:$16 sps:$4 sm:$0xff]   ;;  %v3847_v27 = vld [vmem:[%s5528_s0] ss:$16 sps:$4 sm:$0xff]  }
   0x9   :  { %3450 = vmatprep.subr.bf16.mxu0 %v4236_v7  ;;  %v4323_v21 = vld [vmem:[%s5527_s1 + $0x8] sm:$0xff]   ;;  %v4340_v24 = vld [vmem:[%s5527_s1 + $0x80] sm:$0xff]   ;;  %579 = vmatprep.mubr.bf16.mxu0 %v3849_v23 }
   0xa   :  { %v3853_v25 = vld [vmem:[%s5528_s0 + $0xc] ss:$16 sps:$4 sm:$0xff]   ;;  %v4350_v26 = vld [vmem:[%s5527_s1] sm:$0xff]   ;;  %v3851_v30 = vld [vmem:[%s5528_s0 + $0x8] ss:$16 sps:$4 sm:$0xff]  }
   0xb   :  { %688 = vmatpush1.bf16.msra.mxu1 %v4242_v8  ;;  %2966 = vmatprep.mubr.msk.bf16.mxu1 %vm507_vm0, %v3853_v25  ;;  %v4361_v28 = vld [vmem:[%s5527_s1 + $0xc0] sm:$0xff]   ;;  %v3857_v31 = vld [vmem:[%s5528_s0 + $0x2c] ss:$16 sps:$4 sm:$0xff]   ;;  %v3859_v34 = vld [vmem:[%s5528_s0 + $0x28] ss:$16 sps:$4 sm:$0xff]  }
   0xc   :  { %3451 = vmatpush3.bf16.msra.mxu0 %v4249_v9  ;;  %689 = vmatprep.subr.bf16.mxu1 %v4176_v0  ;;  %v3854_v29 = vld [vmem:[%s5528_s0 + $0x24] ss:$16 sps:$4 sm:$0xff]   ;;  %v3856_v32 = vld [vmem:[%s5528_s0 + $0x20] ss:$16 sps:$4 sm:$0xff]   ;;  %v3863_v35 = vld [vmem:[%s5528_s0 + $0x4c] ss:$16 sps:$4 sm:$0xff]  }
   0xd   :  { %3452 = vmatprep.subr.bf16.mxu0 %v4255_v10  ;;  %v3860_v33 = vld [vmem:[%s5528_s0 + $0x44] ss:$16 sps:$4 sm:$0xff]   ;;  %v3862_v36 = vld [vmem:[%s5528_s0 + $0x40] ss:$16 sps:$4 sm:$0xff]   ;;  %v3865_v38 = vld [vmem:[%s5528_s0 + $0x48] ss:$16 sps:$4 sm:$0xff]  }
   0xe   :  { %v3866_v37 = vld [vmem:[%s5528_s0 + $0x64] ss:$16 sps:$4 sm:$0xff]   ;;  %v3869_v39 = vld [vmem:[%s5528_s0 + $0x6c] ss:$16 sps:$4 sm:$0xff]   ;;  %v3868_v40 = vld [vmem:[%s5528_s0 + $0x60] ss:$16 sps:$4 sm:$0xff]  }
   0xf   :  { %690 = vmatpush1.bf16.msra.mxu1 %v4261_v11  ;;  %v3872_v41 = vld [vmem:[%s5528_s0 + $0x84] ss:$16 sps:$4 sm:$0xff]   ;;  %v3871_v42 = vld [vmem:[%s5528_s0 + $0x68] ss:$16 sps:$4 sm:$0xff]   ;;  %v3875_v43 = vld [vmem:[%s5528_s0 + $0x8c] ss:$16 sps:$4 sm:$0xff]  }
  0x10   :  { %3453 = vmatpush3.bf16.msra.mxu0 %v4268_v12  ;;  %691 = vmatprep.subr.bf16.mxu1 %v4176_v0  ;;  %v3874_v44 = vld [vmem:[%s5528_s0 + $0x80] ss:$16 sps:$4 sm:$0xff]   ;;  %v3878_v45 = vld [vmem:[%s5528_s0 + $0xa4] ss:$16 sps:$4 sm:$0xff]   ;;  %v3877_v46 = vld [vmem:[%s5528_s0 + $0x88] ss:$16 sps:$4 sm:$0xff]  }
  0x11   :  { %3454 = vmatprep.subr.bf16.mxu0 %v4274_v13  ;;  %v3881_v47 = vld [vmem:[%s5528_s0 + $0xac] ss:$16 sps:$4 sm:$0xff]   ;;  %v3880_v48 = vld [vmem:[%s5528_s0 + $0xa0] ss:$16 sps:$4 sm:$0xff]   ;;  %v3884_v49 = vld [vmem:[%s5528_s0 + $0xc4] ss:$16 sps:$4 sm:$0xff]  }
  0x12   :  { %v3883_v50 = vld [vmem:[%s5528_s0 + $0xa8] ss:$16 sps:$4 sm:$0xff]   ;;  %v3887_v51 = vld [vmem:[%s5528_s0 + $0xcc] ss:$16 sps:$4 sm:$0xff]   ;;  %v3886_v52 = vld [vmem:[%s5528_s0 + $0xc0] ss:$16 sps:$4 sm:$0xff]  }
  0x13   :  { %692 = vmatpush1.bf16.msra.mxu1 %v4280_v14  ;;  %v3890_v53 = vld [vmem:[%s5528_s0 + $0xe4] ss:$16 sps:$4 sm:$0xff]   ;;  %v3889_v54 = vld [vmem:[%s5528_s0 + $0xc8] ss:$16 sps:$4 sm:$0xff]   ;;  %v3893_v55 = vld [vmem:[%s5528_s0 + $0xec] ss:$16 sps:$4 sm:$0xff]  }
  0x14   :  { %3455 = vmatpush3.bf16.msra.mxu0 %v4287_v15  ;;  %693 = vmatprep.subr.bf16.mxu1 %v4176_v0  ;;  %v3892_v56 = vld [vmem:[%s5528_s0 + $0xe0] ss:$16 sps:$4 sm:$0xff]   ;;  %v3896_v57 = vld [vmem:[%s5528_s0 + $0x104] ss:$16 sps:$4 sm:$0xff]   ;;  %v3895_v58 = vld [vmem:[%s5528_s0 + $0xe8] ss:$16 sps:$4 sm:$0xff]  }
  0x15   :  { %3456 = vmatprep.subr.bf16.mxu0 %v4293_v16  ;;  %v3899_v59 = vld [vmem:[%s5528_s0 + $0x10c] ss:$16 sps:$4 sm:$0xff]   ;;  %v3898_v60 = vld [vmem:[%s5528_s0 + $0x100] ss:$16 sps:$4 sm:$0xff]   ;;  %v3902_v61 = vld [vmem:[%s5528_s0 + $0x124] ss:$16 sps:$4 sm:$0xff]  }
  0x16   :  { %v3901_v62 = vld [vmem:[%s5528_s0 + $0x108] ss:$16 sps:$4 sm:$0xff]   ;;  %v3905_v63 = vld [vmem:[%s5528_s0 + $0x12c] ss:$16 sps:$4 sm:$0xff]   ;;  %v3904_v23 = vld [vmem:[%s5528_s0 + $0x120] ss:$16 sps:$4 sm:$0xff]  }
  0x17   :  { %694 = vmatpush1.bf16.msra.mxu1 %v4299_v17  ;;  %v3908_v25 = vld [vmem:[%s5528_s0 + $0x144] ss:$16 sps:$4 sm:$0xff]  }
  0x18   :  { %3457 = vmatpush3.bf16.msra.mxu0 %v4306_v18  ;;  %695 = vmatprep.subr.bf16.mxu1 %v4176_v0 }
  0x19   :  { %3458 = vmatprep.subr.bf16.mxu0 %v4312_v19 }
  0x1b   :  { %696 = vmatpush1.bf16.msra.mxu1 %v4317_v20 }
  0x1c   :  { %3459 = vmatpush3.bf16.msra.mxu0 %v4323_v21  ;;  %697 = vmatprep.subr.bf16.mxu1 %v4176_v0 }
  0x1d   :  { %3460 = vmatprep.subr.bf16.mxu0 %v4330_v22 }
  0x1f   :  { %698 = vmatpush1.bf16.msra.mxu1 %v4340_v24 }
  0x20   :  { %3461 = vmatpush3.bf16.msra.mxu0 %v4350_v26  ;;  %713 = vmatprep.subr.bf16.mxu1 %v4176_v0 }
  0x21   :  { %3540 = vmatprep.subr.bf16.mxu0 %v4201_v1 }
  0x23   :  { %580 = vmatmul.mubr.bf16.vlgmr.msra.gmra.mxu0 %v3847_v27  ;;  %714 = vmatpush2.bf16.msra.mxu1 %v4361_v28  ;;  %v3907_v27 = vld [vmem:[%s5528_s0 + $0x128] ss:$16 sps:$4 sm:$0xff]  }
  0x24   :  { %3541 = vmatpush3.bf16.msra.mxu0 %v4212_v3  ;;  %1286 = vmatprep.subr.bf16.mxu1 %v4176_v0 }
  0x25   :  { %587 = vmatprep.mubr.bf16.mxu0 %v3854_v29  ;;  %3542 = vmatprep.subr.bf16.mxu0 %v4218_v4  ;;  %v3911_v29 = vld [vmem:[%s5528_s0 + $0x14c] ss:$16 sps:$4 sm:$0xff]  }
  0x26   :  { %716 = vmatmul.mubr.bf16.vlgmr.msra.gmra.mxu1 %v3851_v30  ;;  %v3910_v30 = vld [vmem:[%s5528_s0 + $0x140] ss:$16 sps:$4 sm:$0xff]  }
  0x27   :  { %1287 = vmatpush1.bf16.msra.mxu1 %v4206_v2  ;;  %2967 = vmatprep.mubr.msk.bf16.mxu1 %vm507_vm0, %v3857_v31  ;;  %v3914_v31 = vld [vmem:[%s5528_s0 + $0x164] ss:$16 sps:$4 sm:$0xff]  }
  0x28   :  { %3543 = vmatpush3.bf16.msra.mxu0 %v4231_v6  ;;  %1288 = vmatprep.subr.bf16.mxu1 %v4176_v0 }
  0x29   :  { %3544 = vmatprep.subr.bf16.mxu0 %v4236_v7 }
  0x2b   :  { %588 = vmatmul.mubr.bf16.gmra.mxu0 %v3856_v32  ;;  %1289 = vmatpush1.bf16.msra.mxu1 %v4225_v5  ;;  %v3913_v32 = vld [vmem:[%s5528_s0 + $0x148] ss:$16 sps:$4 sm:$0xff]  }
  0x2c   :  { %595 = vmatprep.mubr.bf16.mxu0 %v3860_v33  ;;  %3545 = vmatpush3.bf16.msra.mxu0 %v4249_v9  ;;  %v3917_v33 = vld [vmem:[%s5528_s0 + $0x16c] ss:$16 sps:$4 sm:$0xff]  }
  0x2d   :  { %1290 = vmatprep.subr.bf16.mxu1 %v4176_v0  ;;  %3546 = vmatprep.subr.bf16.mxu0 %v4255_v10 }
  0x2e   :  { %724 = vmatmul.mubr.bf16.gmra.mxu1 %v3859_v34  ;;  %v114_v34 = vld [vmem:[%s5528_s0 + $0x180] sm:$0xff] }
  0x2f   :  { %2968 = vmatprep.mubr.msk.bf16.mxu1 %vm507_vm0, %v3863_v35  ;;  %1291 = vmatpush1.bf16.msra.mxu1 %v4242_v8  ;;  %v3916_v35 = vld [vmem:[%s5528_s0 + $0x160] ss:$16 sps:$4 sm:$0xff]  }
  0x30   :  { %1292 = vmatprep.subr.bf16.mxu1 %v4176_v0  ;;  %3547 = vmatpush3.bf16.msra.mxu0 %v4268_v12 }
  0x31   :  { %3548 = vmatprep.subr.bf16.mxu0 %v4274_v13 }
  0x33   :  { %596 = vmatmul.mubr.bf16.gmra.mxu0 %v3862_v36  ;;  %1293 = vmatpush1.bf16.msra.mxu1 %v4261_v11  ;;  %v2938_v36 = vcombine.high %v114_v34, %v114_v34 }
  0x34   :  { %603 = vmatprep.mubr.bf16.mxu0 %v3866_v37  ;;  %1294 = vmatprep.subr.bf16.mxu1 %v4176_v0  ;;  %v115_v37 = vld [vmem:[%s5528_s0 + $0x188] sm:$0xff] }
  0x35   :  { %3549 = vmatpush3.bf16.msra.mxu0 %v4287_v15 }
  0x36   :  { %732 = vmatmul.mubr.bf16.gmra.mxu1 %v3865_v38  ;;  %3550 = vmatprep.subr.bf16.mxu0 %v4293_v16  ;;  %v3919_v38 = vld [vmem:[%s5528_s0 + $0x168] ss:$16 sps:$4 sm:$0xff]  }
  0x37   :  { %2969 = vmatprep.mubr.msk.bf16.mxu1 %vm507_vm0, %v3869_v39  ;;  %1295 = vmatpush1.bf16.msra.mxu1 %v4280_v14  ;;  %v2940_v39 = vcombine.high %v115_v37, %v115_v37 }
  0x38   :  { %1296 = vmatprep.subr.bf16.mxu1 %v4176_v0 }
  0x39   :  { %3551 = vmatpush3.bf16.msra.mxu0 %v4306_v18 }
  0x3a   :  { %3552 = vmatprep.subr.bf16.mxu0 %v4312_v19 }
  0x3b   :  { %604 = vmatmul.mubr.bf16.gmra.mxu0 %v3868_v40  ;;  %1297 = vmatpush1.bf16.msra.mxu1 %v4299_v17  ;;  %v2937_v40 = vcombine.low %v114_v34, %v114_v34 }
  0x3c   :  { %611 = vmatprep.mubr.bf16.mxu0 %v3872_v41  ;;  %1298 = vmatprep.subr.bf16.mxu1 %v4176_v0  ;;  %v3926_v41 = vld [vmem:[%s5528_s0 + $0x194] ss:$16 sps:$4 sm:$0xff]  }
  0x3d   :  { %3553 = vmatpush3.bf16.msra.mxu0 %v4323_v21 }
  0x3e   :  { %740 = vmatmul.mubr.bf16.gmra.mxu1 %v3871_v42  ;;  %3554 = vmatprep.subr.bf16.mxu0 %v4330_v22  ;;  %v2939_v42 = vcombine.low %v115_v37, %v115_v37 }
  0x3f   :  { %2970 = vmatprep.mubr.msk.bf16.mxu1 %vm507_vm0, %v3875_v43  ;;  %1299 = vmatpush1.bf16.msra.mxu1 %v4317_v20  ;;  %v3929_v43 = vld [vmem:[%s5528_s0 + $0x19c] ss:$16 sps:$4 sm:$0xff]  }
  0x40   :  { %1300 = vmatprep.subr.bf16.mxu1 %v4176_v0 }
  0x41   :  { %3555 = vmatpush3.bf16.msra.mxu0 %v4350_v26 }
  0x42   :  { %3634 = vmatprep.subr.bf16.mxu0 %v4201_v1 }
  0x43   :  { %612 = vmatmul.mubr.bf16.gmra.mxu0 %v3874_v44  ;;  %1301 = vmatpush1.bf16.msra.mxu1 %v4340_v24  ;;  %v3924_v44 = vld [vmem:[%s5528_s0 + $0x190] ss:$16 sps:$4 sm:$0xff]  }
  0x44   :  { %619 = vmatprep.mubr.bf16.mxu0 %v3878_v45  ;;  %1316 = vmatprep.subr.bf16.mxu1 %v4176_v0  ;;  %v3930_v45 = vld [vmem:[%s5528_s0 + $0x1b4] ss:$16 sps:$4 sm:$0xff]  }
  0x46   :  { %748 = vmatmul.mubr.bf16.gmra.mxu1 %v3877_v46  ;;  %v3927_v46 = vld [vmem:[%s5528_s0 + $0x198] ss:$16 sps:$4 sm:$0xff]  }
  0x47   :  { %2971 = vmatprep.mubr.msk.bf16.mxu1 %vm507_vm0, %v3881_v47  ;;  %1317 = vmatpush2.bf16.msra.mxu1 %v4361_v28  ;;  %v3933_v47 = vld [vmem:[%s5528_s0 + $0x1bc] ss:$16 sps:$4 sm:$0xff]  }
  0x48   :  { %1914 = vmatprep.subr.bf16.mxu1 %v4176_v0 }
  0x4b   :  { %620 = vmatmul.mubr.bf16.gmra.mxu0 %v3880_v48  ;;  %v3932_v48 = vld [vmem:[%s5528_s0 + $0x1b0] ss:$16 sps:$4 sm:$0xff]  }
  0x4c   :  { %627 = vmatprep.mubr.bf16.mxu0 %v3884_v49  ;;  %v3936_v49 = vld [vmem:[%s5528_s0 + $0x1d4] ss:$16 sps:$4 sm:$0xff]  }
  0x4e   :  { %756 = vmatmul.mubr.bf16.gmra.mxu1 %v3883_v50  ;;  %v3975_v50 = vld [vmem:[%s5528_s0 + $0x29c] ss:$16 sps:$4 sm:$0xff]  }
  0x4f   :  { %2972 = vmatprep.mubr.msk.bf16.mxu1 %vm507_vm0, %v3887_v51  ;;  %v3974_v51 = vld [vmem:[%s5528_s0 + $0x290] ss:$16 sps:$4 sm:$0xff]  }
  0x53   :  { %628 = vmatmul.mubr.bf16.gmra.mxu0 %v3886_v52  ;;  %v3978_v52 = vld [vmem:[%s5528_s0 + $0x2b4] ss:$16 sps:$4 sm:$0xff]  }
  0x54   :  { %635 = vmatprep.mubr.bf16.mxu0 %v3890_v53  ;;  %v3977_v53 = vld [vmem:[%s5528_s0 + $0x298] ss:$16 sps:$4 sm:$0xff]  }
  0x56   :  { %764 = vmatmul.mubr.bf16.gmra.mxu1 %v3889_v54  ;;  %v3981_v54 = vld [vmem:[%s5528_s0 + $0x2bc] ss:$16 sps:$4 sm:$0xff]  }
  0x57   :  { %2973 = vmatprep.mubr.msk.bf16.mxu1 %vm507_vm0, %v3893_v55  ;;  %v3980_v55 = vld [vmem:[%s5528_s0 + $0x2b0] ss:$16 sps:$4 sm:$0xff]  }
  0x5b   :  { %636 = vmatmul.mubr.bf16.gmra.mxu0 %v3892_v56  ;;  %v3984_v56 = vld [vmem:[%s5528_s0 + $0x2d4] ss:$16 sps:$4 sm:$0xff]  }
  0x5c   :  { %643 = vmatprep.mubr.bf16.mxu0 %v3896_v57  ;;  %v3983_v57 = vld [vmem:[%s5528_s0 + $0x2b8] ss:$16 sps:$4 sm:$0xff]  }
  0x5e   :  { %772 = vmatmul.mubr.bf16.gmra.mxu1 %v3895_v58  ;;  %v3987_v58 = vld [vmem:[%s5528_s0 + $0x2dc] ss:$16 sps:$4 sm:$0xff]  }
  0x5f   :  { %2974 = vmatprep.mubr.msk.bf16.mxu1 %vm507_vm0, %v3899_v59  ;;  %v3986_v59 = vld [vmem:[%s5528_s0 + $0x2d0] ss:$16 sps:$4 sm:$0xff]  }
  0x63   :  { %644 = vmatmul.mubr.bf16.gmra.mxu0 %v3898_v60  ;;  %v3990_v60 = vld [vmem:[%s5528_s0 + $0x2f4] ss:$16 sps:$4 sm:$0xff]  }
  0x64   :  { %651 = vmatprep.mubr.bf16.mxu0 %v3902_v61  ;;  %v3989_v61 = vld [vmem:[%s5528_s0 + $0x2d8] ss:$16 sps:$4 sm:$0xff]  }
  0x66   :  { %780 = vmatmul.mubr.bf16.gmra.mxu1 %v3901_v62  ;;  %v3993_v62 = vld [vmem:[%s5528_s0 + $0x2fc] ss:$16 sps:$4 sm:$0xff]  }
  0x67   :  { %2975 = vmatprep.mubr.msk.bf16.mxu1 %vm507_vm0, %v3905_v63  ;;  %v3027_v63 = vld [vmem:[%s5528_s0 + $0x310] sm:$0xff] }
  0x6b   :  { %652 = vmatmul.mubr.bf16.gmra.mxu0 %v3904_v23  ;;  %v3992_v23 = vld [vmem:[%s5528_s0 + $0x2f0] ss:$16 sps:$4 sm:$0xff]  }
  0x6c   :  { %659 = vmatprep.mubr.bf16.mxu0 %v3908_v25  ;;  %v3078_v25 = vcombine.high %v3027_v63, %v3027_v63 }
  0x6e   :  { %788 = vmatmul.mubr.bf16.gmra.mxu1 %v3907_v27  ;;  %v3028_v27 = vld [vmem:[%s5528_s0 + $0x318] sm:$0xff] }
  0x6f   :  { %2976 = vmatprep.mubr.msk.bf16.mxu1 %vm507_vm0, %v3911_v29  ;;  %v3995_v29 = vld [vmem:[%s5528_s0 + $0x2f8] ss:$16 sps:$4 sm:$0xff]  }
  0x73   :  { %660 = vmatmul.mubr.bf16.gmra.mxu0 %v3910_v30 }
  0x74   :  { %667 = vmatprep.mubr.bf16.mxu0 %v3914_v31  ;;  %v3080_v31 = vcombine.high %v3028_v27, %v3028_v27 }
  0x76   :  { %796 = vmatmul.mubr.bf16.gmra.mxu1 %v3913_v32 }
  0x77   :  { %2977 = vmatprep.mubr.msk.bf16.mxu1 %vm507_vm0, %v3917_v33 }
  0x7b   :  { %668 = vmatmul.mubr.bf16.gmra.mxu0 %v3916_v35 }
  0x7c   :  { %675 = vmatprep.mubr.bf16.mxu0 %v2938_v36  ;;  %v3077_v36 = vcombine.low %v3027_v63, %v3027_v63  ;;  %v4159_v63 = vld [vmem:[%s5527_s1 + $0x60] sm:$0xff]  }
  0x7e   :  { %804 = vmatmul.mubr.bf16.gmra.mxu1 %v3919_v38 }
  0x7f   :  { %2978 = vmatprep.mubr.msk.bf16.mxu1 %vm507_vm0, %v2940_v39  ;;  %v4002_v39 = vld [vmem:[%s5528_s0 + $0x324] ss:$16 sps:$4 sm:$0xff]  }
  0x83   :  { %676 = vmatmul.mubr.bf16.gmra.mxu0 %v2937_v40 }
  0x84   :  { %1182 = vmatprep.mubr.bf16.mxu0 %v3926_v41 }
  0x86   :  { %812 = vmatmul.mubr.bf16.gmra.mxu1 %v2939_v42 }
  0x87   :  { %3081 = vmatprep.mubr.msk.bf16.mxu1 %vm507_vm0, %v3929_v43  ;;  %v3079_v43 = vcombine.low %v3028_v27, %v3028_v27 }
  0x8b   :  { %1183 = vmatmul.mubr.bf16.vlgmr.msra.gmra.mxu0 %v3924_v44 }
  0x8c   :  { %3635 = vmatpush3.bf16.msra.mxu0 %v4212_v3  ;;  %1190 = vmatprep.mubr.bf16.mxu0 %v3930_v45  ;;  %v3939_v3 = vld [vmem:[%s5528_s0 + $0x1dc] ss:$16 sps:$4 sm:$0xff]  }
  0x8d   :  { %3636 = vmatprep.subr.bf16.mxu0 %v4218_v4  ;;  %v3938_v4 = vld [vmem:[%s5528_s0 + $0x1d0] ss:$16 sps:$4 sm:$0xff]   ;;  %v4005_v45 = vld [vmem:[%s5528_s0 + $0x32c] ss:$16 sps:$4 sm:$0xff]  }
  0x8e   :  { %1319 = vmatmul.mubr.bf16.vlgmr.msra.gmra.mxu1 %v3927_v46 }
  0x8f   :  { %1915 = vmatpush1.bf16.msra.mxu1 %v4206_v2  ;;  %3082 = vmatprep.mubr.msk.bf16.mxu1 %vm507_vm0, %v3933_v47  ;;  %v3935_v2 = vld [vmem:[%s5528_s0 + $0x1b8] ss:$16 sps:$4 sm:$0xff]  }
  0x90   :  { %3637 = vmatpush3.bf16.msra.mxu0 %v4231_v6  ;;  %1916 = vmatprep.subr.bf16.mxu1 %v4176_v0  ;;  %v3941_v6 = vld [vmem:[%s5528_s0 + $0x1d8] ss:$16 sps:$4 sm:$0xff]  }
  0x91   :  { %3638 = vmatprep.subr.bf16.mxu0 %v4236_v7  ;;  %v3945_v7 = vld [vmem:[%s5528_s0 + $0x1fc] ss:$16 sps:$4 sm:$0xff]  }
  0x93   :  { %1191 = vmatmul.mubr.bf16.gmra.mxu0 %v3932_v48  ;;  %1917 = vmatpush1.bf16.msra.mxu1 %v4225_v5  ;;  %v3942_v5 = vld [vmem:[%s5528_s0 + $0x1f4] ss:$16 sps:$4 sm:$0xff]  }
  0x94   :  { %1198 = vmatprep.mubr.bf16.mxu0 %v3936_v49  ;;  %3639 = vmatpush3.bf16.msra.mxu0 %v4249_v9  ;;  %v3948_v9 = vld [vmem:[%s5528_s0 + $0x214] ss:$16 sps:$4 sm:$0xff]  }
  0x95   :  { %1918 = vmatprep.subr.bf16.mxu1 %v4176_v0  ;;  %3640 = vmatprep.subr.bf16.mxu0 %v4255_v10  ;;  %v3947_v10 = vld [vmem:[%s5528_s0 + $0x1f8] ss:$16 sps:$4 sm:$0xff]  }
  0x96   :  { %1327 = vmatmul.mubr.bf16.gmra.mxu1 %v3935_v2 }
  0x97   :  { %3083 = vmatprep.mubr.msk.bf16.mxu1 %vm507_vm0, %v3939_v3  ;;  %1919 = vmatpush1.bf16.msra.mxu1 %v4242_v8  ;;  %v3944_v8 = vld [vmem:[%s5528_s0 + $0x1f0] ss:$16 sps:$4 sm:$0xff]  }
  0x98   :  { %1920 = vmatprep.subr.bf16.mxu1 %v4176_v0  ;;  %3641 = vmatpush3.bf16.msra.mxu0 %v4268_v12  ;;  %v3950_v12 = vld [vmem:[%s5528_s0 + $0x210] ss:$16 sps:$4 sm:$0xff]  }
  0x99   :  { %3642 = vmatprep.subr.bf16.mxu0 %v4274_v13  ;;  %v3954_v13 = vld [vmem:[%s5528_s0 + $0x234] ss:$16 sps:$4 sm:$0xff]  }
  0x9b   :  { %1199 = vmatmul.mubr.bf16.gmra.mxu0 %v3938_v4  ;;  %1921 = vmatpush1.bf16.msra.mxu1 %v4261_v11  ;;  %v3951_v11 = vld [vmem:[%s5528_s0 + $0x21c] ss:$16 sps:$4 sm:$0xff]   ;;  %v4000_v4 = vld [vmem:[%s5528_s0 + $0x320] ss:$16 sps:$4 sm:$0xff]  }
  0x9c   :  { %1206 = vmatprep.mubr.bf16.mxu0 %v3942_v5  ;;  %1922 = vmatprep.subr.bf16.mxu1 %v4176_v0 }
  0x9d   :  { %3643 = vmatpush3.bf16.msra.mxu0 %v4287_v15  ;;  %v3957_v15 = vld [vmem:[%s5528_s0 + $0x23c] ss:$16 sps:$4 sm:$0xff]  }
  0x9e   :  { %1335 = vmatmul.mubr.bf16.gmra.mxu1 %v3941_v6  ;;  %3644 = vmatprep.subr.bf16.mxu0 %v4293_v16  ;;  %v3956_v16 = vld [vmem:[%s5528_s0 + $0x230] ss:$16 sps:$4 sm:$0xff]  }
  0x9f   :  { %3084 = vmatprep.mubr.msk.bf16.mxu1 %vm507_vm0, %v3945_v7  ;;  %1923 = vmatpush1.bf16.msra.mxu1 %v4280_v14  ;;  %v3953_v14 = vld [vmem:[%s5528_s0 + $0x218] ss:$16 sps:$4 sm:$0xff]   ;;  %v4006_v7 = vld [vmem:[%s5528_s0 + $0x344] ss:$16 sps:$4 sm:$0xff]  }
  0xa0   :  { %1924 = vmatprep.subr.bf16.mxu1 %v4176_v0 }
  0xa1   :  { %3645 = vmatpush3.bf16.msra.mxu0 %v4306_v18  ;;  %v3963_v18 = vld [vmem:[%s5528_s0 + $0x25c] ss:$16 sps:$4 sm:$0xff]  }
  0xa2   :  { %3646 = vmatprep.subr.bf16.mxu0 %v4312_v19  ;;  %v3962_v19 = vld [vmem:[%s5528_s0 + $0x250] ss:$16 sps:$4 sm:$0xff]  }
  0xa3   :  { %1207 = vmatmul.mubr.bf16.gmra.mxu0 %v3944_v8  ;;  %1925 = vmatpush1.bf16.msra.mxu1 %v4299_v17  ;;  %v3959_v17 = vld [vmem:[%s5528_s0 + $0x238] ss:$16 sps:$4 sm:$0xff]  }
  0xa4   :  { %1214 = vmatprep.mubr.bf16.mxu0 %v3948_v9  ;;  %1926 = vmatprep.subr.bf16.mxu1 %v4176_v0 }
  0xa5   :  { %3647 = vmatpush3.bf16.msra.mxu0 %v4323_v21  ;;  %v3965_v21 = vld [vmem:[%s5528_s0 + $0x258] ss:$16 sps:$4 sm:$0xff]  }
  0xa6   :  { %1343 = vmatmul.mubr.bf16.gmra.mxu1 %v3947_v10  ;;  %3648 = vmatprep.subr.bf16.mxu0 %v4330_v22  ;;  %v3969_v22 = vld [vmem:[%s5528_s0 + $0x27c] ss:$16 sps:$4 sm:$0xff]  }
  0xa7   :  { %3085 = vmatprep.mubr.msk.bf16.mxu1 %vm507_vm0, %v3951_v11  ;;  %1927 = vmatpush1.bf16.msra.mxu1 %v4317_v20  ;;  %v3966_v20 = vld [vmem:[%s5528_s0 + $0x274] ss:$16 sps:$4 sm:$0xff]   ;;  %v4003_v11 = vld [vmem:[%s5528_s0 + $0x328] ss:$16 sps:$4 sm:$0xff]  }
  0xa8   :  { %1928 = vmatprep.subr.bf16.mxu1 %v4176_v0 }
  0xa9   :  { %3649 = vmatpush3.bf16.msra.mxu0 %v4350_v26  ;;  %v3972_v26 = vld [vmem:[%s5528_s0 + $0x294] ss:$16 sps:$4 sm:$0xff]  }
  0xaa   :  { %3728 = vmatprep.subr.bf16.mxu0 %v4201_v1  ;;  %v3960_v1 = vld [vmem:[%s5528_s0 + $0x254] ss:$16 sps:$4 sm:$0xff]  }
  0xab   :  { %1215 = vmatmul.mubr.bf16.gmra.mxu0 %v3950_v12  ;;  %1929 = vmatpush1.bf16.msra.mxu1 %v4340_v24  ;;  %v3968_v24 = vld [vmem:[%s5528_s0 + $0x270] ss:$16 sps:$4 sm:$0xff]  }
  0xac   :  { %1222 = vmatprep.mubr.bf16.mxu0 %v3954_v13  ;;  %1944 = vmatprep.subr.bf16.mxu1 %v4176_v0  ;;  %v4009_v13 = vld [vmem:[%s5528_s0 + $0x34c] ss:$16 sps:$4 sm:$0xff]  }
  0xae   :  { %1351 = vmatmul.mubr.bf16.gmra.mxu1 %v3953_v14 }
  0xaf   :  { %3086 = vmatprep.mubr.msk.bf16.mxu1 %vm507_vm0, %v3957_v15  ;;  %1945 = vmatpush2.bf16.msra.mxu1 %v4361_v28  ;;  %v3971_v28 = vld [vmem:[%s5528_s0 + $0x278] ss:$16 sps:$4 sm:$0xff]  }
  0xb0   :  { %2542 = vmatprep.subr.bf16.mxu1 %v4176_v0 }
  0xb3   :  { %1223 = vmatmul.mubr.bf16.gmra.mxu0 %v3956_v16  ;;  %v4152_v16 = vld [vmem:[%s5527_s1 + $0x38] sm:$0xff]  }
  0xb4   :  { %1230 = vmatprep.mubr.bf16.mxu0 %v3960_v1 }
  0xb6   :  { %1359 = vmatmul.mubr.bf16.gmra.mxu1 %v3959_v17  ;;  %v4153_v17 = vld [vmem:[%s5527_s1 + $0x70] sm:$0xff]  }
  0xb7   :  { %3087 = vmatprep.mubr.msk.bf16.mxu1 %vm507_vm0, %v3963_v18 }
  0xbb   :  { %1231 = vmatmul.mubr.bf16.gmra.mxu0 %v3962_v19 }
  0xbc   :  { %1238 = vmatprep.mubr.bf16.mxu0 %v3966_v20 }
  0xbe   :  { %1367 = vmatmul.mubr.bf16.gmra.mxu1 %v3965_v21  ;;  %v4154_v21 = vld [vmem:[%s5527_s1 + $0xb8] sm:$0xff]  }
  0xbf   :  { %3088 = vmatprep.mubr.msk.bf16.mxu1 %vm507_vm0, %v3969_v22  ;;  %v4008_v22 = vld [vmem:[%s5528_s0 + $0x340] ss:$16 sps:$4 sm:$0xff]  }
  0xc3   :  { %1239 = vmatmul.mubr.bf16.gmra.mxu0 %v3968_v24 }
  0xc4   :  { %1246 = vmatprep.mubr.bf16.mxu0 %v3972_v26 }
  0xc6   :  { %1375 = vmatmul.mubr.bf16.gmra.mxu1 %v3971_v28  ;;  %v4155_v28 = vld [vmem:[%s5527_s1 + $0x30] sm:$0xff]  }
  0xc7   :  { %3089 = vmatprep.mubr.msk.bf16.mxu1 %vm507_vm0, %v3975_v50  ;;  %v4014_v50 = vld [vmem:[%s5528_s0 + $0x364] ss:$16 sps:$4 sm:$0xff]  }
  0xcb   :  { %1247 = vmatmul.mubr.bf16.gmra.mxu0 %v3974_v51 }
  0xcc   :  { %1254 = vmatprep.mubr.bf16.mxu0 %v3978_v52  ;;  %v4156_v52 = vld [vmem:[%s5527_s1 + $0x68] sm:$0xff]  }
  0xce   :  { %1383 = vmatmul.mubr.bf16.gmra.mxu1 %v3977_v53 }
  0xcf   :  { %3090 = vmatprep.mubr.msk.bf16.mxu1 %vm507_vm0, %v3981_v54 }
  0xd3   :  { %1255 = vmatmul.mubr.bf16.gmra.mxu0 %v3980_v55  ;;  %v4011_v55 = vld [vmem:[%s5528_s0 + $0x348] ss:$16 sps:$4 sm:$0xff]  }
  0xd4   :  { %1262 = vmatprep.mubr.bf16.mxu0 %v3984_v56 }
  0xd6   :  { %1391 = vmatmul.mubr.bf16.gmra.mxu1 %v3983_v57  ;;  %v4157_v57 = vld [vmem:[%s5527_s1 + $0xb0] sm:$0xff]  }
  0xd7   :  { %3091 = vmatprep.mubr.msk.bf16.mxu1 %vm507_vm0, %v3987_v58  ;;  %v4015_v58 = vld [vmem:[%s5528_s0 + $0x36c] ss:$16 sps:$4 sm:$0xff]  }
  0xdb   :  { %1263 = vmatmul.mubr.bf16.gmra.mxu0 %v3986_v59 }
  0xdc   :  { %1270 = vmatprep.mubr.bf16.mxu0 %v3990_v60 }
  0xde   :  { %1399 = vmatmul.mubr.bf16.gmra.mxu1 %v3989_v61  ;;  %v4158_v61 = vld [vmem:[%s5527_s1 + $0x28] sm:$0xff]  }
  0xdf   :  { %3092 = vmatprep.mubr.msk.bf16.mxu1 %vm507_vm0, %v3993_v62 }
  0xe3   :  { %v3462_v30 = vpop.f32.mrf.mxu0  ;;  %1271 = vmatmul.mubr.bf16.gmra.mxu0 %v3992_v23 }
  0xe4   :  { %1278 = vmatprep.mubr.bf16.mxu0 %v3078_v25 }
  0xe5   :  { %v3463_v32 = vpop.f32.mrf.mxu0 }
  0xe6   :  { %v3464_v33 = vadd.f32 %v3463_v32, %v3462_v30  ;;  %v717_v34 = vpop.f32.mrf.mxu1  ;;  %1407 = vmatmul.mubr.bf16.gmra.mxu1 %v3995_v29  ;;  %v4012_v29 = vld [vmem:[%s5528_s0 + $0x360] ss:$16 sps:$4 sm:$0xff]   ;;  %v4160_v30 = vld [vmem:[%s5527_s1 + $0xa8] sm:$0xff]  }
  0xe7   :  { %v3465_v35 = vpop.f32.mrf.mxu0  ;;  %3093 = vmatprep.mubr.msk.bf16.mxu1 %vm507_vm0, %v3080_v31 }
  0xe8   :  { %v4752_v37 = vadd.f32 %v3464_v33, %v717_v34  ;;  %v719_v38 = vpop.f32.mrf.mxu1  ;;  %v4020_v33 = vld [vmem:[%s5528_s0 + $0x384] ss:$16 sps:$4 sm:$0xff]  }
  0xe9   :  { %v3466_v40 = vpop.f32.mrf.mxu0  ;;  %v4161_v34 = vld [vmem:[%s5527_s1 + $0x20] sm:$0xff]  }
  0xea   :  { %v3467_v41 = vadd.f32 %v3466_v40, %v3465_v35  ;;  %v720_v42 = vpop.f32.mrf.mxu1  ;;  %v4017_v40 = vld [vmem:[%s5528_s0 + $0x368] ss:$16 sps:$4 sm:$0xff]  }
  0xeb   :  { %v3468_v44 = vpop.f32.mrf.mxu0  ;;  %1279 = vmatmul.mubr.bf16.gmra.mxu0 %v3077_v36  ;;  %v4162_v36 = vld [vmem:[%s5527_s1 + $0x58] sm:$0xff]  }
  0xec   :  { %v4760_v46 = vadd.f32 %v3467_v41, %v720_v42  ;;  %v722_v47 = vpop.f32.mrf.mxu1  ;;  %1810 = vmatprep.mubr.bf16.mxu0 %v4002_v39  ;;  %v4021_v42 = vld [vmem:[%s5528_s0 + $0x38c] ss:$16 sps:$4 sm:$0xff]  }
  0xed   :  { %v3469_v48 = vpop.f32.mrf.mxu0 }
  0xee   :  { %v3470_v49 = vadd.f32 %v3469_v48, %v3468_v44  ;;  %v725_v2 = vpop.f32.mrf.mxu1  ;;  %1415 = vmatmul.mubr.bf16.gmra.mxu1 %v3079_v43  ;;  %v4163_v43 = vld [vmem:[%s5527_s1 + $0xa0] sm:$0xff]   ;;  %v4164_v48 = vld [vmem:[%s5527_s1 + $0x18] sm:$0xff]  }
  0xef   :  { %v3471_v3 = vpop.f32.mrf.mxu0  ;;  %3196 = vmatprep.mubr.msk.bf16.mxu1 %vm507_vm0, %v4005_v45 }
  0xf0   :  { %v4766_v5 = vadd.f32 %v3470_v49, %v725_v2  ;;  %v727_v6 = vpop.f32.mrf.mxu1 }
  0xf1   :  { %v3472_v8 = vpop.f32.mrf.mxu0  ;;  %v4018_v6 = vld [vmem:[%s5528_s0 + $0x380] ss:$16 sps:$4 sm:$0xff]  }
  0xf2   :  { %v3473_v9 = vadd.f32 %v3472_v8, %v3471_v3  ;;  %v728_v10 = vpop.f32.mrf.mxu1  ;;  %v4165_v3 = vld [vmem:[%s5527_s1 + $0x50] sm:$0xff]  }
  0xf3   :  { %v3474_v12 = vpop.f32.mrf.mxu0  ;;  %1811 = vmatmul.mubr.bf16.vlgmr.msra.gmra.mxu0 %v4000_v4 }
  0xf4   :  { %v4777_v14 = vadd.f32 %v3473_v9, %v728_v10  ;;  %v730_v15 = vpop.f32.mrf.mxu1  ;;  %3729 = vmatpush3.bf16.msra.mxu0 %v4152_v16  ;;  %1818 = vmatprep.mubr.bf16.mxu0 %v4006_v7  ;;  %v4166_v7 = vld [vmem:[%s5527_s1 + $0x98] sm:$0xff]   ;;  %v4026_v10 = vld [vmem:[%s5528_s0 + $0x3a4] ss:$16 sps:$4 sm:$0xff]  }
  0xf5   :  { %v3475_v1 = vpop.f32.mrf.mxu0  ;;  %3730 = vmatprep.subr.bf16.mxu0 %v4153_v17  ;;  %v4023_v16 = vld [vmem:[%s5528_s0 + $0x388] ss:$16 sps:$4 sm:$0xff]  }
  0xf6   :  { %v3476_v18 = vadd.f32 %v3475_v1, %v3474_v12  ;;  %v733_v19 = vpop.f32.mrf.mxu1  ;;  %1947 = vmatmul.mubr.bf16.vlgmr.msra.gmra.mxu1 %v4003_v11  ;;  %v4167_v12 = vld [vmem:[%s5527_s1 + $0x10] sm:$0xff]   ;;  %v4168_v1 = vld [vmem:[%s5527_s1 + $0x48] sm:$0xff]  }
  0xf7   :  { %v3477_v20 = vpop.f32.mrf.mxu0  ;;  %2543 = vmatpush1.bf16.msra.mxu1 %v4154_v21  ;;  %3197 = vmatprep.mubr.msk.bf16.mxu1 %vm507_vm0, %v4009_v13 }
  0xf8   :  { %v4792_v24 = vadd.f32 %v3476_v18, %v733_v19  ;;  %v735_v26 = vpop.f32.mrf.mxu1  ;;  %3731 = vmatpush3.bf16.msra.mxu0 %v4155_v28  ;;  %2544 = vmatprep.subr.bf16.mxu1 %v4176_v0  ;;  %v4027_v18 = vld [vmem:[%s5528_s0 + $0x3ac] ss:$16 sps:$4 sm:$0xff]   ;;  %v4169_v19 = vld [vmem:[%s5527_s1 + $0x90] sm:$0xff]  }
  0xf9   :  { %v3478_v51 = vpop.f32.mrf.mxu0  ;;  %3732 = vmatprep.subr.bf16.mxu0 %v4156_v52  ;;  %v4170_v26 = vld [vmem:[%s5527_s1 + $0x8] sm:$0xff]  }
  0xfa   :  { %v3479_v53 = vadd.f32 %v3478_v51, %v3477_v20  ;;  %v736_v54 = vpop.f32.mrf.mxu1  ;;  %v4171_v51 = vld [vmem:[%s5527_s1 + $0x40] sm:$0xff]  }
  0xfb   :  { %v3480_v56 = vpop.f32.mrf.mxu0  ;;  %1819 = vmatmul.mubr.bf16.gmra.mxu0 %v4008_v22  ;;  %2545 = vmatpush1.bf16.msra.mxu1 %v4157_v57  ;;  %v4032_v57 = vld [vmem:[%s5528_s0 + $0x3c4] ss:$16 sps:$4 sm:$0xff]  }
  0xfc   :  { %v4813_v59 = vadd.f32 %v3479_v53, %v736_v54  ;;  %v738_v60 = vpop.f32.mrf.mxu1  ;;  %1826 = vmatprep.mubr.bf16.mxu0 %v4014_v50  ;;  %3733 = vmatpush3.bf16.msra.mxu0 %v4158_v61  ;;  %v4024_v53 = vld [vmem:[%s5528_s0 + $0x3a0] ss:$16 sps:$4 sm:$0xff]   ;;  %v4172_v54 = vld [vmem:[%s5527_s1 + $0x88] sm:$0xff]  }
  0xfd   :  { %v3481_v62 = vpop.f32.mrf.mxu0  ;;  %2546 = vmatprep.subr.bf16.mxu1 %v4176_v0  ;;  %3734 = vmatprep.subr.bf16.mxu0 %v4159_v63  ;;  %v4173_v60 = vld [vmem:[%s5527_s1] sm:$0xff]   ;;  %v4029_v63 = vld [vmem:[%s5528_s0 + $0x3a8] ss:$16 sps:$4 sm:$0xff]  }
  0xfe   :  { %v3482_v23 = vadd.f32 %v3481_v62, %v3480_v56  ;;  %v741_v25 = vpop.f32.mrf.mxu1  ;;  %1955 = vmatmul.mubr.bf16.gmra.mxu1 %v4011_v55 }
  0xff   :  { %v3483_v27 = vpop.f32.mrf.mxu0  ;;  %3198 = vmatprep.mubr.msk.bf16.mxu1 %vm507_vm0, %v4015_v58  ;;  %2547 = vmatpush1.bf16.msra.mxu1 %v4160_v30 }
 0x100   :  { %v4829_v31 = vadd.f32 %v3482_v23, %v741_v25  ;;  %v743_v32 = vpop.f32.mrf.mxu1  ;;  %2548 = vmatprep.subr.bf16.mxu1 %v4176_v0  ;;  %3735 = vmatpush3.bf16.msra.mxu0 %v4161_v34  ;;  %v4033_v25 = vld [vmem:[%s5528_s0 + $0x3cc] ss:$16 sps:$4 sm:$0xff]  }
 0x101   :  { %v3484_v35 = vpop.f32.mrf.mxu0  ;;  %3736 = vmatprep.subr.bf16.mxu0 %v4162_v36  ;;  %v4030_v36 = vld [vmem:[%s5528_s0 + $0x3c0] ss:$16 sps:$4 sm:$0xff]  }
 0x102   :  { %v3485_v38 = vadd.f32 %v3484_v35, %v3483_v27  ;;  %v744_v39 = vpop.f32.mrf.mxu1  ;;  %v4174_v27 = vld [vmem:[%s5527_s1 + $0x80] sm:$0xff]  }
 0x103   :  { %v3486_v41 = vpop.f32.mrf.mxu0  ;;  %1827 = vmatmul.mubr.bf16.gmra.mxu0 %v4012_v29  ;;  %2549 = vmatpush1.bf16.msra.mxu1 %v4163_v43 }
 0x104   :  { %v4850_v44 = vadd.f32 %v3485_v38, %v744_v39  ;;  %v746_v45 = vpop.f32.mrf.mxu1  ;;  %1834 = vmatprep.mubr.bf16.mxu0 %v4020_v33  ;;  %2550 = vmatprep.subr.bf16.mxu1 %v4176_v0  ;;  %v4175_v38 = vld [vmem:[%s5527_s1 + $0xc0] sm:$0xff]  }
 0x105   :  { %v3487_v47 = vpop.f32.mrf.mxu0  ;;  %3737 = vmatpush3.bf16.msra.mxu0 %v4164_v48  ;;  %v4035_v45 = vld [vmem:[%s5528_s0 + $0x3c8] ss:$16 sps:$4 sm:$0xff]   ;;  %v4039_v48 = vld [vmem:[%s5528_s0 + $0x3ec] ss:$16 sps:$4 sm:$0xff]  }
 0x106   :  { %v3488_v49 = vadd.f32 %v3487_v47, %v3486_v41  ;;  %v749_v2 = vpop.f32.mrf.mxu1  ;;  %1963 = vmatmul.mubr.bf16.gmra.mxu1 %v4017_v40  ;;  %3738 = vmatprep.subr.bf16.mxu0 %v4165_v3 }
 0x107   :  { %v3489_v4 = vpop.f32.mrf.mxu0  ;;  %3199 = vmatprep.mubr.msk.bf16.mxu1 %vm507_vm0, %v4021_v42  ;;  %2551 = vmatpush1.bf16.msra.mxu1 %v4166_v7 }
 0x108   :  { %v4866_v8 = vadd.f32 %v3488_v49, %v749_v2  ;;  %v751_v9 = vpop.f32.mrf.mxu1  ;;  %2552 = vmatprep.subr.bf16.mxu1 %v4176_v0 }
 0x109   :  { %v3490_v11 = vpop.f32.mrf.mxu0  ;;  %3739 = vmatpush3.bf16.msra.mxu0 %v4167_v12  ;;  %v4036_v9 = vld [vmem:[%s5528_s0 + $0x3e0] ss:$16 sps:$4 sm:$0xff]   ;;  %v4044_v12 = vld [vmem:[%s5528_s0 + $0x404] ss:$16 sps:$4 sm:$0xff]  }
 0x10a   :  { %v3491_v13 = vadd.f32 %v3490_v11, %v3489_v4  ;;  %v752_v15 = vpop.f32.mrf.mxu1  ;;  %3740 = vmatprep.subr.bf16.mxu0 %v4168_v1  ;;  %v4041_v1 = vld [vmem:[%s5528_s0 + $0x3e8] ss:$16 sps:$4 sm:$0xff]  }
 0x10b   :  { %v3492_v17 = vpop.f32.mrf.mxu0  ;;  %1835 = vmatmul.mubr.bf16.gmra.mxu0 %v4018_v6  ;;  %2553 = vmatpush1.bf16.msra.mxu1 %v4169_v19 }
 0x10c   :  { %v4887_v20 = vadd.f32 %v3491_v13, %v752_v15  ;;  %v754_v21 = vpop.f32.mrf.mxu1  ;;  %1842 = vmatprep.mubr.bf16.mxu0 %v4026_v10  ;;  %2554 = vmatprep.subr.bf16.mxu1 %v4176_v0 }
 0x10d   :  { %v3493_v22 = vpop.f32.mrf.mxu0  ;;  %3741 = vmatpush3.bf16.msra.mxu0 %v4170_v26 }
 0x10e   :  { %v3494_v28 = vadd.f32 %v3493_v22, %v3492_v17  ;;  %v757_v50 = vpop.f32.mrf.mxu1  ;;  %1971 = vmatmul.mubr.bf16.gmra.mxu1 %v4023_v16  ;;  %3742 = vmatprep.subr.bf16.mxu0 %v4171_v51  ;;  %v4042_v51 = vld [vmem:[%s5528_s0 + $0x400] ss:$16 sps:$4 sm:$0xff]  }
 0x10f   :  { %v3495_v52 = vpop.f32.mrf.mxu0  ;;  %3200 = vmatprep.mubr.msk.bf16.mxu1 %vm507_vm0, %v4027_v18  ;;  %2555 = vmatpush1.bf16.msra.mxu1 %v4172_v54  ;;  %v4045_v18 = vld [vmem:[%s5528_s0 + $0x40c] ss:$16 sps:$4 sm:$0xff]   ;;  %v4050_v54 = vld [vmem:[%s5528_s0 + $0x424] ss:$16 sps:$4 sm:$0xff]  }
 0x110   :  { %v4903_v55 = vadd.f32 %v3494_v28, %v757_v50  ;;  %v759_v56 = vpop.f32.mrf.mxu1  ;;  %2556 = vmatprep.subr.bf16.mxu1 %v4176_v0 }
 0x111   :  { %v3496_v58 = vpop.f32.mrf.mxu0  ;;  %3743 = vmatpush3.bf16.msra.mxu0 %v4173_v60  ;;  %v4047_v60 = vld [vmem:[%s5528_s0 + $0x408] ss:$16 sps:$4 sm:$0xff]  }
 0x112   :  { %v3497_v61 = vadd.f32 %v3496_v58, %v3495_v52  ;;  %v760_v62 = vpop.f32.mrf.mxu1 }
 0x113   :  { %v3498_v23 = vpop.f32.mrf.mxu0  ;;  %1843 = vmatmul.mubr.bf16.gmra.mxu0 %v4024_v53  ;;  %2557 = vmatpush1.bf16.msra.mxu1 %v4174_v27 }
 0x114   :  { %v4921_v29 = vadd.f32 %v3497_v61, %v760_v62  ;;  %v762_v30 = vpop.f32.mrf.mxu1  ;;  %1850 = vmatprep.mubr.bf16.mxu0 %v4032_v57  ;;  %2572 = vmatprep.subr.bf16.mxu1 %v4176_v0  ;;  %v4038_v0 = vld [vmem:[%s5528_s0 + $0x3e4] ss:$16 sps:$4 sm:$0xff]   ;;  %v4051_v62 = vld [vmem:[%s5528_s0 + $0x42c] ss:$16 sps:$4 sm:$0xff]  }
 0x115   :  { %v3499_v32 = vpop.f32.mrf.mxu0 }
 0x116   :  { %v3500_v33 = vadd.f32 %v3499_v32, %v3498_v23  ;;  %v765_v34 = vpop.f32.mrf.mxu1  ;;  %1979 = vmatmul.mubr.bf16.gmra.mxu1 %v4029_v63 }
 0x117   :  { %v3501_v35 = vpop.f32.mrf.mxu0  ;;  %3201 = vmatprep.mubr.msk.bf16.mxu1 %vm507_vm0, %v4033_v25  ;;  %2573 = vmatpush2.bf16.msra.mxu1 %v4175_v38 }
 0x118   :  { %v4931_v39 = vadd.f32 %v3500_v33, %v765_v34  ;;  %v767_v40 = vpop.f32.mrf.mxu1  ;;  %v4048_v33 = vld [vmem:[%s5528_s0 + $0x420] ss:$16 sps:$4 sm:$0xff]  }
 0x119   :  { %v3502_v41 = vpop.f32.mrf.mxu0 }
 0x11a   :  { %v3503_v42 = vadd.f32 %v3502_v41, %v3501_v35  ;;  %v768_v43 = vpop.f32.mrf.mxu1  ;;  %v4053_v41 = vld [vmem:[%s5528_s0 + $0x428] ss:$16 sps:$4 sm:$0xff]  }
 0x11b   :  { %v3504_v47 = vpop.f32.mrf.mxu0  ;;  %1851 = vmatmul.mubr.bf16.gmra.mxu0 %v4030_v36  ;;  %v4056_v36 = vld [vmem:[%s5528_s0 + $0x444] ss:$16 sps:$4 sm:$0xff]  }
 0x11c   :  { %v4942_v49 = vadd.f32 %v3503_v42, %v768_v43  ;;  %v770_v2 = vpop.f32.mrf.mxu1  ;;  %1858 = vmatprep.mubr.bf16.mxu0 %v4038_v0  ;;  %v4057_v43 = vld [vmem:[%s5528_s0 + $0x44c] ss:$16 sps:$4 sm:$0xff]  }
 0x11d   :  { %v3505_v3 = vpop.f32.mrf.mxu0 }
 0x11e   :  { %v3506_v4 = vadd.f32 %v3505_v3, %v3504_v47  ;;  %v773_v6 = vpop.f32.mrf.mxu1  ;;  %1987 = vmatmul.mubr.bf16.gmra.mxu1 %v4035_v45 }
 0x11f   :  { %v3507_v7 = vpop.f32.mrf.mxu0  ;;  %3202 = vmatprep.mubr.msk.bf16.mxu1 %vm507_vm0, %v4039_v48 }
 0x120   :  { %v4948_v10 = vadd.f32 %v3506_v4, %v773_v6  ;;  %v775_v11 = vpop.f32.mrf.mxu1  ;;  %v4054_v6 = vld [vmem:[%s5528_s0 + $0x440] ss:$16 sps:$4 sm:$0xff]  }
 0x121   :  { %v3508_v13 = vpop.f32.mrf.mxu0  ;;  %v4062_v11 = vld [vmem:[%s5528_s0 + $0x464] ss:$16 sps:$4 sm:$0xff]  }
 0x122   :  { %v3509_v15 = vadd.f32 %v3508_v13, %v3507_v7  ;;  %v776_v16 = vpop.f32.mrf.mxu1 }
 0x123   :  { %v3510_v17 = vpop.f32.mrf.mxu0  ;;  %1859 = vmatmul.mubr.bf16.gmra.mxu0 %v4036_v9 }
 0x124   :  { %v4959_v19 = vadd.f32 %v3509_v15, %v776_v16  ;;  %v778_v21 = vpop.f32.mrf.mxu1  ;;  %1866 = vmatprep.mubr.bf16.mxu0 %v4044_v12  ;;  %v4059_v16 = vld [vmem:[%s5528_s0 + $0x448] ss:$16 sps:$4 sm:$0xff]  }
 0x125   :  { %v3511_v22 = vpop.f32.mrf.mxu0 }
 0x126   :  { %v3512_v26 = vadd.f32 %v3511_v22, %v3510_v17  ;;  %v781_v28 = vpop.f32.mrf.mxu1  ;;  %1995 = vmatmul.mubr.bf16.gmra.mxu1 %v4041_v1  ;;  %v4063_v17 = vld [vmem:[%s5528_s0 + $0x46c] ss:$16 sps:$4 sm:$0xff]  }
 0x127   :  { %v3513_v50 = vpop.f32.mrf.mxu0  ;;  %3203 = vmatprep.mubr.msk.bf16.mxu1 %vm507_vm0, %v4045_v18 }
 0x128   :  { %v4965_v52 = vadd.f32 %v3512_v26, %v781_v28  ;;  %v783_v53 = vpop.f32.mrf.mxu1 }
 0x129   :  { %v3514_v56 = vpop.f32.mrf.mxu0 }
 0x12a   :  { %v3515_v57 = vadd.f32 %v3514_v56, %v3513_v50  ;;  %v784_v58 = vpop.f32.mrf.mxu1  ;;  %v4068_v56 = vld [vmem:[%s5528_s0 + $0x484] ss:$16 sps:$4 sm:$0xff]  }
 0x12b   :  { %v3516_v61 = vpop.f32.mrf.mxu0  ;;  %1867 = vmatmul.mubr.bf16.gmra.mxu0 %v4042_v51  ;;  %v4060_v51 = vld [vmem:[%s5528_s0 + $0x460] ss:$16 sps:$4 sm:$0xff]  }
 0x12c   :  { %v4976_v63 = vadd.f32 %v3515_v57, %v784_v58  ;;  %v786_v23 = vpop.f32.mrf.mxu1  ;;  %1874 = vmatprep.mubr.bf16.mxu0 %v4050_v54 }
 0x12d   :  { %v3517_v25 = vpop.f32.mrf.mxu0  ;;  %v4069_v23 = vld [vmem:[%s5528_s0 + $0x48c] ss:$16 sps:$4 sm:$0xff]  }
 0x12e   :  { %v3518_v27 = vadd.f32 %v3517_v25, %v3516_v61  ;;  %v789_v30 = vpop.f32.mrf.mxu1  ;;  %2003 = vmatmul.mubr.bf16.gmra.mxu1 %v4047_v60  ;;  %v4065_v61 = vld [vmem:[%s5528_s0 + $0x468] ss:$16 sps:$4 sm:$0xff]  }
 0x12f   :  { %v3519_v32 = vpop.f32.mrf.mxu0  ;;  %3204 = vmatprep.mubr.msk.bf16.mxu1 %vm507_vm0, %v4051_v62 }
 0x130   :  { %v4982_v34 = vadd.f32 %v3518_v27, %v789_v30  ;;  %v791_v35 = vpop.f32.mrf.mxu1 }
 0x131   :  { %v3520_v38 = vpop.f32.mrf.mxu0 }
 0x132   :  { %v3521_v40 = vadd.f32 %v3520_v38, %v3519_v32  ;;  %v792_v0 = vpop.f32.mrf.mxu1  ;;  %v3142_v32 = vld [vmem:[%s5528_s0 + $0x4a0] sm:$0xff] }
 0x133   :  { %v3522_v42 = vpop.f32.mrf.mxu0  ;;  %1875 = vmatmul.mubr.bf16.gmra.mxu0 %v4048_v33  ;;  %v4066_v38 = vld [vmem:[%s5528_s0 + $0x480] ss:$16 sps:$4 sm:$0xff]  }
 0x134   :  { %v4993_v45 = vadd.f32 %v3521_v40, %v792_v0  ;;  %v794_v47 = vpop.f32.mrf.mxu1  ;;  %1882 = vmatprep.mubr.bf16.mxu0 %v4056_v36 }
 0x135   :  { %v3523_v48 = vpop.f32.mrf.mxu0 }
 0x136   :  { %v3524_v2 = vadd.f32 %v3523_v48, %v3522_v42  ;;  %v797_v3 = vpop.f32.mrf.mxu1  ;;  %2011 = vmatmul.mubr.bf16.gmra.mxu1 %v4053_v41  ;;  %v3193_v41 = vcombine.high %v3142_v32, %v3142_v32  ;;  %v3143_v42 = vld [vmem:[%s5528_s0 + $0x4a8] sm:$0xff] }
 0x137   :  { %v3525_v4 = vpop.f32.mrf.mxu0  ;;  %3205 = vmatprep.mubr.msk.bf16.mxu1 %vm507_vm0, %v4057_v43  ;;  %v4071_v48 = vld [vmem:[%s5528_s0 + $0x488] ss:$16 sps:$4 sm:$0xff]  }
 0x138   :  { %v4999_v7 = vadd.f32 %v3524_v2, %v797_v3  ;;  %v799_v9 = vpop.f32.mrf.mxu1  ;;  %v3195_v3 = vcombine.high %v3143_v42, %v3143_v42 }
 0x139   :  { %v3526_v12 = vpop.f32.mrf.mxu0 }
 0x13a   :  { %v3527_v13 = vadd.f32 %v3526_v12, %v3525_v4  ;;  %v800_v15 = vpop.f32.mrf.mxu1 }
 0x13b   :  { %v3528_v1 = vpop.f32.mrf.mxu0  ;;  %1883 = vmatmul.mubr.bf16.gmra.mxu0 %v4054_v6 }
 0x13c   :  { %v5010_v18 = vadd.f32 %v3527_v13, %v800_v15  ;;  %v802_v21 = vpop.f32.mrf.mxu1  ;;  %1890 = vmatprep.mubr.bf16.mxu0 %v4062_v11  ;;  %v3192_v13 = vcombine.low %v3142_v32, %v3142_v32  ;;  %v4084_v32 = vld [vmem:[%s5528_s0 + $0x4d4] ss:$16 sps:$4 sm:$0xff]  }
 0x13d   :  { %v3529_v22 = vpop.f32.mrf.mxu0 }
 0x13e   :  { %v3530_v26 = vadd.f32 %v3529_v22, %v3528_v1  ;;  %v805_v28 = vpop.f32.mrf.mxu1  ;;  %2019 = vmatmul.mubr.bf16.gmra.mxu1 %v4059_v16  ;;  %v4078_v1 = vld [vmem:[%s5528_s0 + $0x4b4] ss:$16 sps:$4 sm:$0xff]  }
 0x13f   :  { %v3531_v50 = vpop.f32.mrf.mxu0  ;;  %3206 = vmatprep.mubr.msk.bf16.mxu1 %vm507_vm0, %v4063_v17 }
 0x140   :  { %v5016_v53 = vadd.f32 %v3530_v26, %v805_v28  ;;  %v807_v54 = vpop.f32.mrf.mxu1  ;;  %v3194_v28 = vcombine.low %v3143_v42, %v3143_v42  ;;  %v4085_v42 = vld [vmem:[%s5528_s0 + $0x4dc] ss:$16 sps:$4 sm:$0xff]  }
 0x141   :  { %v3532_v57 = vpop.f32.mrf.mxu0 }
 0x142   :  { %v3533_v58 = vadd.f32 %v3532_v57, %v3531_v50  ;;  %v808_v60 = vpop.f32.mrf.mxu1 }
 0x143   :  { %v3534_v62 = vpop.f32.mrf.mxu0  ;;  %1891 = vmatmul.mubr.bf16.gmra.mxu0 %v4060_v51  ;;  %v4081_v51 = vld [vmem:[%s5528_s0 + $0x4bc] ss:$16 sps:$4 sm:$0xff]  }
 0x144   :  { %v5027_v25 = vadd.f32 %v3533_v58, %v808_v60  ;;  %v810_v27 = vpop.f32.mrf.mxu1  ;;  %1898 = vmatprep.mubr.bf16.mxu0 %v4068_v56  ;;  %v4142_v58 = vld [vmem:[%s5528_s0 + $0x610] ss:$16 sps:$4 sm:$0xff]  }
 0x145   :  { %v3535_v30 = vpop.f32.mrf.mxu0 }
 0x146   :  { %5536 = vst [vmem:[#allocation2_spill] sm:$0xff] %v5027_v25  ;;  %v3536_v33 = vadd.f32 %v3535_v30, %v3534_v62  ;;  %v813_v35 = vpop.f32.mrf.mxu1  ;;  %2027 = vmatmul.mubr.bf16.gmra.mxu1 %v4065_v61 }
 0x147   :  { %v3537_v36 = vpop.f32.mrf.mxu0  ;;  %3207 = vmatprep.mubr.msk.bf16.mxu1 %vm507_vm0, %v4069_v23  ;;  %v4076_v23 = vld [vmem:[%s5528_s0 + $0x4b0] ss:$16 sps:$4 sm:$0xff]  }
 0x148   :  { %v5036_v40 = vadd.f32 %v3536_v33, %v813_v35  ;;  %v815_v0 = vpop.f32.mrf.mxu1 }
 0x149   :  { %v3538_v43 = vpop.f32.mrf.mxu0  ;;  %v4079_v0 = vld [vmem:[%s5528_s0 + $0x4b8] ss:$16 sps:$4 sm:$0xff]  }
 0x14a   :  { %5537 = vst [vmem:[#allocation3_spill] sm:$0xff] %v5036_v40  ;;  %v816_v47 = vpop.f32.mrf.mxu1 }
 0x14b   :  { %v3556_v2 = vpop.f32.mrf.mxu0  ;;  %1899 = vmatmul.mubr.bf16.gmra.mxu0 %v4066_v38 }
 0x14c   :  { %v817_v4 = vpop.f32.mrf.mxu1  ;;  %1906 = vmatprep.mubr.bf16.mxu0 %v3193_v41 }
 0x14d   :  { %v3557_v6 = vpop.f32.mrf.mxu0 }
 0x14e   :  { %v3558_v9 = vadd.f32 %v3557_v6, %v3556_v2  ;;  %v1320_v11 = vpop.f32.mrf.mxu1  ;;  %2035 = vmatmul.mubr.bf16.gmra.mxu1 %v4071_v48 }
 0x14f   :  { %v3559_v12 = vpop.f32.mrf.mxu0  ;;  %3208 = vmatprep.mubr.msk.bf16.mxu1 %vm507_vm0, %v3195_v3 }
 0x150   :  { %v5045_v15 = vadd.f32 %v3558_v9, %v1320_v11  ;;  %v1322_v16 = vpop.f32.mrf.mxu1  ;;  %v4082_v9 = vld [vmem:[%s5528_s0 + $0x4d0] ss:$16 sps:$4 sm:$0xff]  }
 0x151   :  { %v3560_v17 = vpop.f32.mrf.mxu0 }
 0x152   :  { %v3561_v22 = vadd.f32 %v3560_v17, %v3559_v12  ;;  %v1323_v26 = vpop.f32.mrf.mxu1 }
 0x153   :  { %v3562_v50 = vpop.f32.mrf.mxu0  ;;  %1907 = vmatmul.mubr.bf16.gmra.mxu0 %v3192_v13  ;;  %v4090_v13 = vld [vmem:[%s5528_s0 + $0x4f4] ss:$16 sps:$4 sm:$0xff]  }
 0x154   :  { %v5055_v54 = vadd.f32 %v3561_v22, %v1323_v26  ;;  %v1325_v56 = vpop.f32.mrf.mxu1  ;;  %2438 = vmatprep.mubr.bf16.mxu0 %v4078_v1  ;;  %v4087_v26 = vld [vmem:[%s5528_s0 + $0x4d8] ss:$16 sps:$4 sm:$0xff]  }
 0x155   :  { %v3563_v57 = vpop.f32.mrf.mxu0 }
 0x156   :  { %v3564_v60 = vadd.f32 %v3563_v57, %v3562_v50  ;;  %v1328_v61 = vpop.f32.mrf.mxu1  ;;  %2043 = vmatmul.mubr.bf16.gmra.mxu1 %v3194_v28  ;;  %v4091_v50 = vld [vmem:[%s5528_s0 + $0x4fc] ss:$16 sps:$4 sm:$0xff]  }
 0x157   :  { %v3565_v62 = vpop.f32.mrf.mxu0  ;;  %3311 = vmatprep.mubr.msk.bf16.mxu1 %vm507_vm0, %v4081_v51 }
 0x158   :  { %v5063_v27 = vadd.f32 %v3564_v60, %v1328_v61  ;;  %v1330_v30 = vpop.f32.mrf.mxu1 }
 0x159   :  { %v3566_v33 = vpop.f32.mrf.mxu0  ;;  %v4088_v30 = vld [vmem:[%s5528_s0 + $0x4f0] ss:$16 sps:$4 sm:$0xff]  }
 0x15a   :  { %v3567_v36 = vadd.f32 %v3566_v33, %v3565_v62  ;;  %v1331_v38 = vpop.f32.mrf.mxu1 }
 0x15b   :  { %v3568_v41 = vpop.f32.mrf.mxu0  ;;  %2439 = vmatmul.mubr.bf16.vlgmr.msra.gmra.mxu0 %v4076_v23 }
 0x15c   :  { %v5076_v43 = vadd.f32 %v3567_v36, %v1331_v38  ;;  %v1333_v47 = vpop.f32.mrf.mxu1  ;;  %2446 = vmatprep.mubr.bf16.mxu0 %v4084_v32  ;;  %v4096_v36 = vld [vmem:[%s5528_s0 + $0x514] ss:$16 sps:$4 sm:$0xff]  }
 0x15d   :  { %v3569_v48 = vpop.f32.mrf.mxu0  ;;  %v4093_v47 = vld [vmem:[%s5528_s0 + $0x4f8] ss:$16 sps:$4 sm:$0xff]  }
 0x15e   :  { %v3570_v3 = vadd.f32 %v3569_v48, %v3568_v41  ;;  %v1336_v4 = vpop.f32.mrf.mxu1  ;;  %2575 = vmatmul.mubr.bf16.vlgmr.msra.gmra.mxu1 %v4079_v0 }
 0x15f   :  { %v3571_v6 = vpop.f32.mrf.mxu0  ;;  %3312 = vmatprep.mubr.msk.bf16.mxu1 %vm507_vm0, %v4085_v42 }
 0x160   :  { %v5084_v11 = vadd.f32 %v3570_v3, %v1336_v4  ;;  %v1338_v12 = vpop.f32.mrf.mxu1  ;;  %v4097_v3 = vld [vmem:[%s5528_s0 + $0x51c] ss:$16 sps:$4 sm:$0xff]  }
 0x161   :  { %v3572_v16 = vpop.f32.mrf.mxu0 }
 0x162   :  { %v3573_v17 = vadd.f32 %v3572_v16, %v3571_v6  ;;  %v1339_v22 = vpop.f32.mrf.mxu1 }
 0x163   :  { %v3574_v28 = vpop.f32.mrf.mxu0  ;;  %2447 = vmatmul.mubr.bf16.gmra.mxu0 %v4082_v9 }
 0x164   :  { %v5097_v51 = vadd.f32 %v3573_v17, %v1339_v22  ;;  %v1341_v56 = vpop.f32.mrf.mxu1  ;;  %2454 = vmatprep.mubr.bf16.mxu0 %v4090_v13  ;;  %v4094_v22 = vld [vmem:[%s5528_s0 + $0x510] ss:$16 sps:$4 sm:$0xff]  }
 0x165   :  { %v3575_v57 = vpop.f32.mrf.mxu0 }
 0x166   :  { %v3576_v61 = vadd.f32 %v3575_v57, %v3574_v28  ;;  %v1344_v62 = vpop.f32.mrf.mxu1  ;;  %2583 = vmatmul.mubr.bf16.gmra.mxu1 %v4087_v26 }
 0x167   :  { %v3577_v23 = vpop.f32.mrf.mxu0  ;;  %3313 = vmatprep.mubr.msk.bf16.mxu1 %vm507_vm0, %v4091_v50  ;;  %v4102_v50 = vld [vmem:[%s5528_s0 + $0x534] ss:$16 sps:$4 sm:$0xff]  }
 0x168   :  { %v5105_v32 = vadd.f32 %v3576_v61, %v1344_v62  ;;  %v1346_v33 = vpop.f32.mrf.mxu1 }
 0x169   :  { %v3578_v38 = vpop.f32.mrf.mxu0  ;;  %v4103_v33 = vld [vmem:[%s5528_s0 + $0x53c] ss:$16 sps:$4 sm:$0xff]  }
 0x16a   :  { %v3579_v41 = vadd.f32 %v3578_v38, %v3577_v23  ;;  %v1347_v42 = vpop.f32.mrf.mxu1  ;;  %v4099_v23 = vld [vmem:[%s5528_s0 + $0x518] ss:$16 sps:$4 sm:$0xff]  }
 0x16b   :  { %v3580_v48 = vpop.f32.mrf.mxu0  ;;  %2455 = vmatmul.mubr.bf16.gmra.mxu0 %v4088_v30 }
 0x16c   :  { %v5118_v4 = vadd.f32 %v3579_v41, %v1347_v42  ;;  %v1349_v6 = vpop.f32.mrf.mxu1  ;;  %2462 = vmatprep.mubr.bf16.mxu0 %v4096_v36 }
 0x16d   :  { %v3581_v9 = vpop.f32.mrf.mxu0  ;;  %v4100_v6 = vld [vmem:[%s5528_s0 + $0x530] ss:$16 sps:$4 sm:$0xff]  }
 0x16e   :  { %v3582_v13 = vadd.f32 %v3581_v9, %v3580_v48  ;;  %v1352_v16 = vpop.f32.mrf.mxu1  ;;  %2591 = vmatmul.mubr.bf16.gmra.mxu1 %v4093_v47 }
 0x16f   :  { %v3583_v17 = vpop.f32.mrf.mxu0  ;;  %3314 = vmatprep.mubr.msk.bf16.mxu1 %vm507_vm0, %v4097_v3 }
 0x170   :  { %v5126_v26 = vadd.f32 %v3582_v13, %v1352_v16  ;;  %v1354_v28 = vpop.f32.mrf.mxu1  ;;  %v4108_v16 = vld [vmem:[%s5528_s0 + $0x554] ss:$16 sps:$4 sm:$0xff]  }
 0x171   :  { %v3584_v56 = vpop.f32.mrf.mxu0 }
 0x172   :  { %v3585_v61 = vadd.f32 %v3584_v56, %v3583_v17  ;;  %v1355_v62 = vpop.f32.mrf.mxu1  ;;  %v4105_v56 = vld [vmem:[%s5528_s0 + $0x538] ss:$16 sps:$4 sm:$0xff]  }
 0x173   :  { %v3586_v30 = vpop.f32.mrf.mxu0  ;;  %2463 = vmatmul.mubr.bf16.gmra.mxu0 %v4094_v22 }
 0x174   :  { %v5139_v36 = vadd.f32 %v3585_v61, %v1355_v62  ;;  %v1357_v38 = vpop.f32.mrf.mxu1  ;;  %2470 = vmatprep.mubr.bf16.mxu0 %v4102_v50  ;;  %v4109_v62 = vld [vmem:[%s5528_s0 + $0x55c] ss:$16 sps:$4 sm:$0xff]  }
 0x175   :  { %v3587_v41 = vpop.f32.mrf.mxu0 }
 0x176   :  { %v3588_v47 = vadd.f32 %v3587_v41, %v3586_v30  ;;  %v1360_v48 = vpop.f32.mrf.mxu1  ;;  %2599 = vmatmul.mubr.bf16.gmra.mxu1 %v4099_v23 }
 0x177   :  { %v3589_v3 = vpop.f32.mrf.mxu0  ;;  %3315 = vmatprep.mubr.msk.bf16.mxu1 %vm507_vm0, %v4103_v33 }
 0x178   :  { %v5147_v9 = vadd.f32 %v3588_v47, %v1360_v48  ;;  %v1362_v13 = vpop.f32.mrf.mxu1 }
 0x179   :  { %v3590_v17 = vpop.f32.mrf.mxu0 }
 0x17a   :  { %v3591_v28 = vadd.f32 %v3590_v17, %v3589_v3  ;;  %v1363_v50 = vpop.f32.mrf.mxu1  ;;  %v4106_v3 = vld [vmem:[%s5528_s0 + $0x550] ss:$16 sps:$4 sm:$0xff]  }
 0x17b   :  { %v3592_v61 = vpop.f32.mrf.mxu0  ;;  %2471 = vmatmul.mubr.bf16.gmra.mxu0 %v4100_v6 }
 0x17c   :  { %v5160_v23 = vadd.f32 %v3591_v28, %v1363_v50  ;;  %v1365_v30 = vpop.f32.mrf.mxu1  ;;  %2478 = vmatprep.mubr.bf16.mxu0 %v4108_v16  ;;  %v4114_v16 = vld [vmem:[%s5528_s0 + $0x574] ss:$16 sps:$4 sm:$0xff]  }
 0x17d   :  { %v3593_v33 = vpop.f32.mrf.mxu0 }
 0x17e   :  { %v3594_v41 = vadd.f32 %v3593_v33, %v3592_v61  ;;  %v1368_v47 = vpop.f32.mrf.mxu1  ;;  %2607 = vmatmul.mubr.bf16.gmra.mxu1 %v4105_v56  ;;  %v4111_v61 = vld [vmem:[%s5528_s0 + $0x558] ss:$16 sps:$4 sm:$0xff]  }
 0x17f   :  { %v3595_v48 = vpop.f32.mrf.mxu0  ;;  %3316 = vmatprep.mubr.msk.bf16.mxu1 %vm507_vm0, %v4109_v62  ;;  %v4115_v62 = vld [vmem:[%s5528_s0 + $0x57c] ss:$16 sps:$4 sm:$0xff]  }
 0x180   :  { %v5168_v6 = vadd.f32 %v3594_v41, %v1368_v47  ;;  %v1370_v13 = vpop.f32.mrf.mxu1 }
 0x181   :  { %v3596_v17 = vpop.f32.mrf.mxu0 }
 0x182   :  { %v3597_v50 = vadd.f32 %v3596_v17, %v3595_v48  ;;  %v1371_v56 = vpop.f32.mrf.mxu1 }
 0x183   :  { %v3598_v30 = vpop.f32.mrf.mxu0  ;;  %2479 = vmatmul.mubr.bf16.gmra.mxu0 %v4106_v3  ;;  %v4112_v3 = vld [vmem:[%s5528_s0 + $0x570] ss:$16 sps:$4 sm:$0xff]  }
 0x184   :  { %v5181_v33 = vadd.f32 %v3597_v50, %v1371_v56  ;;  %v1373_v41 = vpop.f32.mrf.mxu1  ;;  %2486 = vmatprep.mubr.bf16.mxu0 %v4114_v16  ;;  %v4120_v16 = vld [vmem:[%s5528_s0 + $0x594] ss:$16 sps:$4 sm:$0xff]  }
 0x185   :  { %v3599_v47 = vpop.f32.mrf.mxu0 }
 0x186   :  { %v3600_v48 = vadd.f32 %v3599_v47, %v3598_v30  ;;  %v1376_v17 = vpop.f32.mrf.mxu1  ;;  %2615 = vmatmul.mubr.bf16.gmra.mxu1 %v4111_v61  ;;  %v4117_v47 = vld [vmem:[%s5528_s0 + $0x578] ss:$16 sps:$4 sm:$0xff]  }
 0x187   :  { %v3601_v28 = vpop.f32.mrf.mxu0  ;;  %3317 = vmatprep.mubr.msk.bf16.mxu1 %vm507_vm0, %v4115_v62  ;;  %v4121_v62 = vld [vmem:[%s5528_s0 + $0x59c] ss:$16 sps:$4 sm:$0xff]  }
 0x188   :  { %v5189_v38 = vadd.f32 %v3600_v48, %v1376_v17  ;;  %v1378_v50 = vpop.f32.mrf.mxu1 }
 0x189   :  { %v3602_v56 = vpop.f32.mrf.mxu0 }
 0x18a   :  { %v3603_v41 = vadd.f32 %v3602_v56, %v3601_v28  ;;  %v1379_v61 = vpop.f32.mrf.mxu1 }
 0x18b   :  { %v3604_v13 = vpop.f32.mrf.mxu0  ;;  %2487 = vmatmul.mubr.bf16.gmra.mxu0 %v4112_v3  ;;  %v4118_v3 = vld [vmem:[%s5528_s0 + $0x590] ss:$16 sps:$4 sm:$0xff]  }
 0x18c   :  { %v5202_v48 = vadd.f32 %v3603_v41, %v1379_v61  ;;  %v1381_v17 = vpop.f32.mrf.mxu1  ;;  %2494 = vmatprep.mubr.bf16.mxu0 %v4120_v16  ;;  %v4126_v16 = vld [vmem:[%s5528_s0 + $0x5b4] ss:$16 sps:$4 sm:$0xff]  }
 0x18d   :  { %v3605_v50 = vpop.f32.mrf.mxu0 }
 0x18e   :  { %v3606_v28 = vadd.f32 %v3605_v50, %v3604_v13  ;;  %v1384_v56 = vpop.f32.mrf.mxu1  ;;  %2623 = vmatmul.mubr.bf16.gmra.mxu1 %v4117_v47  ;;  %v4123_v50 = vld [vmem:[%s5528_s0 + $0x598] ss:$16 sps:$4 sm:$0xff]  }
 0x18f   :  { %v3607_v22 = vpop.f32.mrf.mxu0  ;;  %3318 = vmatprep.mubr.msk.bf16.mxu1 %vm507_vm0, %v4121_v62  ;;  %v4127_v62 = vld [vmem:[%s5528_s0 + $0x5bc] ss:$16 sps:$4 sm:$0xff]  }
 0x190   :  { %v5210_v42 = vadd.f32 %v3606_v28, %v1384_v56  ;;  %v1386_v41 = vpop.f32.mrf.mxu1 }
 0x191   :  { %v3608_v61 = vpop.f32.mrf.mxu0 }
 0x192   :  { %v3609_v17 = vadd.f32 %v3608_v61, %v3607_v22  ;;  %v1387_v47 = vpop.f32.mrf.mxu1 }
 0x193   :  { %v3610_v30 = vpop.f32.mrf.mxu0  ;;  %2495 = vmatmul.mubr.bf16.gmra.mxu0 %v4118_v3  ;;  %v4124_v3 = vld [vmem:[%s5528_s0 + $0x5b0] ss:$16 sps:$4 sm:$0xff]  }
 0x194   :  { %v5223_v28 = vadd.f32 %v3609_v17, %v1387_v47  ;;  %v1389_v56 = vpop.f32.mrf.mxu1  ;;  %2502 = vmatprep.mubr.bf16.mxu0 %v4126_v16  ;;  %v4132_v16 = vld [vmem:[%s5528_s0 + $0x5d4] ss:$16 sps:$4 sm:$0xff]  }
 0x195   :  { %v3611_v41 = vpop.f32.mrf.mxu0 }
 0x196   :  { %v3612_v22 = vadd.f32 %v3611_v41, %v3610_v30  ;;  %v1392_v61 = vpop.f32.mrf.mxu1  ;;  %2631 = vmatmul.mubr.bf16.gmra.mxu1 %v4123_v50  ;;  %v4129_v41 = vld [vmem:[%s5528_s0 + $0x5b8] ss:$16 sps:$4 sm:$0xff]  }
 0x197   :  { %v3613_v57 = vpop.f32.mrf.mxu0  ;;  %3319 = vmatprep.mubr.msk.bf16.mxu1 %vm507_vm0, %v4127_v62  ;;  %v4133_v62 = vld [vmem:[%s5528_s0 + $0x5dc] ss:$16 sps:$4 sm:$0xff]  }
 0x198   :  { %v5231_v12 = vadd.f32 %v3612_v22, %v1392_v61  ;;  %v1394_v17 = vpop.f32.mrf.mxu1 }
 0x199   :  { %v3614_v47 = vpop.f32.mrf.mxu0 }
 0x19a   :  { %v3615_v56 = vadd.f32 %v3614_v47, %v3613_v57  ;;  %v1395_v50 = vpop.f32.mrf.mxu1 }
 0x19b   :  { %v3616_v13 = vpop.f32.mrf.mxu0  ;;  %2503 = vmatmul.mubr.bf16.gmra.mxu0 %v4124_v3  ;;  %v4130_v3 = vld [vmem:[%s5528_s0 + $0x5d0] ss:$16 sps:$4 sm:$0xff]  }
 0x19c   :  { %v5244_v22 = vadd.f32 %v3615_v56, %v1395_v50  ;;  %v1397_v61 = vpop.f32.mrf.mxu1  ;;  %2510 = vmatprep.mubr.bf16.mxu0 %v4132_v16  ;;  %v4138_v16 = vld [vmem:[%s5528_s0 + $0x5f4] ss:$16 sps:$4 sm:$0xff]  }
 0x19d   :  { %v3617_v17 = vpop.f32.mrf.mxu0 }
 0x19e   :  { %v3618_v57 = vadd.f32 %v3617_v17, %v3616_v13  ;;  %v1400_v47 = vpop.f32.mrf.mxu1  ;;  %2639 = vmatmul.mubr.bf16.gmra.mxu1 %v4129_v41  ;;  %v4135_v17 = vld [vmem:[%s5528_s0 + $0x5d8] ss:$16 sps:$4 sm:$0xff]  }
 0x19f   :  { %v3619_v0 = vpop.f32.mrf.mxu0  ;;  %3320 = vmatprep.mubr.msk.bf16.mxu1 %vm507_vm0, %v4133_v62  ;;  %v4139_v62 = vld [vmem:[%s5528_s0 + $0x5fc] ss:$16 sps:$4 sm:$0xff]  }
 0x1a0   :  { %v5252_v60 = vadd.f32 %v3618_v57, %v1400_v47  ;;  %v1402_v56 = vpop.f32.mrf.mxu1 }
 0x1a1   :  { %v3620_v50 = vpop.f32.mrf.mxu0 }
 0x1a2   :  { %v3621_v61 = vadd.f32 %v3620_v50, %v3619_v0  ;;  %v1403_v41 = vpop.f32.mrf.mxu1 }
 0x1a3   :  { %v3622_v30 = vpop.f32.mrf.mxu0  ;;  %2511 = vmatmul.mubr.bf16.gmra.mxu0 %v4130_v3  ;;  %v4136_v3 = vld [vmem:[%s5528_s0 + $0x5f0] ss:$16 sps:$4 sm:$0xff]  }
 0x1a4   :  { %v5265_v57 = vadd.f32 %v3621_v61, %v1403_v41  ;;  %v1405_v47 = vpop.f32.mrf.mxu1  ;;  %2518 = vmatprep.mubr.bf16.mxu0 %v4138_v16  ;;  %v4144_v16 = vld [vmem:[%s5528_s0 + $0x614] ss:$16 sps:$4 sm:$0xff]  }
 0x1a5   :  { %v3623_v56 = vpop.f32.mrf.mxu0 }
 0x1a6   :  { %v3624_v0 = vadd.f32 %v3623_v56, %v3622_v30  ;;  %v1408_v50 = vpop.f32.mrf.mxu1  ;;  %2647 = vmatmul.mubr.bf16.gmra.mxu1 %v4135_v17  ;;  %v4141_v56 = vld [vmem:[%s5528_s0 + $0x5f8] ss:$16 sps:$4 sm:$0xff]  }
 0x1a7   :  { %v3625_v1 = vpop.f32.mrf.mxu0  ;;  %3321 = vmatprep.mubr.msk.bf16.mxu1 %vm507_vm0, %v4139_v62  ;;  %v4145_v62 = vld [vmem:[%s5528_s0 + $0x61c] ss:$16 sps:$4 sm:$0xff]  }
 0x1a8   :  { %v5273_v2 = vadd.f32 %v3624_v0, %v1408_v50  ;;  %v1410_v61 = vpop.f32.mrf.mxu1 }
 0x1a9   :  { %v3626_v41 = vpop.f32.mrf.mxu0 }
 0x1aa   :  { %5538 = vst [vmem:[#allocation4_spill] sm:$0xff] %v5273_v2  ;;  %v3627_v47 = vadd.f32 %v3626_v41, %v3625_v1  ;;  %v1411_v17 = vpop.f32.mrf.mxu1  ;;  %v3257_v1 = vld [vmem:[%s5528_s0 + $0x630] sm:$0xff] }
 0x1ab   :  { %v3628_v13 = vpop.f32.mrf.mxu0  ;;  %2519 = vmatmul.mubr.bf16.gmra.mxu0 %v4136_v3  ;;  %v3307_v25 = vcombine.low %v3257_v1, %v3257_v1 }
 0x1ac   :  { %v5286_v0 = vadd.f32 %v3627_v47, %v1411_v17  ;;  %v1413_v50 = vpop.f32.mrf.mxu1  ;;  %2526 = vmatprep.mubr.bf16.mxu0 %v4144_v16  ;;  %v3308_v17 = vcombine.high %v3257_v1, %v3257_v1  ;;  %v5542_v1 = vmax.f32 %v4760_v46, %v5055_v54  ;;  %v5544_v54 = vmax.f32 %v4777_v14, %v5076_v43 }
 0x1ad   :  { %v3629_v61 = vpop.f32.mrf.mxu0  ;;  %v3258_v50 = vld [vmem:[%s5528_s0 + $0x638] sm:$0xff]  ;;  %v5546_v14 = vmax.f32 %v4813_v59, %v5097_v51  ;;  %v5548_v59 = vmax.f32 %v4850_v44, %v5118_v4  ;;  %v5550_v44 = vmax.f32 %v4887_v20, %v5139_v36  ;;  %v5552_v20 = vmax.f32 %v4921_v29, %v5160_v23 }
 0x1ae   :  { %5539 = vst [vmem:[#allocation5_spill] sm:$0xff] %v5286_v0  ;;  %v3630_v30 = vadd.f32 %v3629_v61, %v3628_v13  ;;  %v1416_v35 = vpop.f32.mrf.mxu1  ;;  %2655 = vmatmul.mubr.bf16.gmra.mxu1 %v4141_v56  ;;  %v4147_v61 = vld [vmem:[%s5528_s0 + $0x618] ss:$16 sps:$4 sm:$0xff]   ;;  %v5554_v29 = vmax.f32 %v4942_v49, %v5181_v33  ;;  %v5556_v49 = vmax.f32 %v4959_v19, %v5202_v48 }
 0x1af   :  { %v3631_v3 = vpop.f32.mrf.mxu0  ;;  %3322 = vmatprep.mubr.msk.bf16.mxu1 %vm507_vm0, %v4145_v62  ;;  %v3310_v62 = vcombine.high %v3258_v50, %v3258_v50  ;;  %v5558_v19 = vmax.f32 %v4976_v63, %v5223_v28  ;;  %v5560_v63 = vmax.f32 %v4993_v45, %v5244_v22  ;;  %v5562_v45 = vmax.f32 %v5010_v18, %v5265_v57  ;;  %v5565_v18 = vld [vmem:[#allocation2_spill] sm:$0xff] }
 0x1b0   :  { %v5297_v47 = vadd.f32 %v3630_v30, %v1416_v35  ;;  %v1418_v16 = vpop.f32.mrf.mxu1 }
 0x1b1   :  { %v3632_v21 = vpop.f32.mrf.mxu0 }
 0x1b2   :  { %5540 = vst [vmem:[#allocation6_spill] sm:$0xff] %v5297_v47  ;;  %v1419_v56 = vpop.f32.mrf.mxu1  ;;  %v5541_v47 = vmax.f32 %v4752_v37, %v5045_v15 }
 0x1b3   :  { %v3650_v3 = vpop.f32.mrf.mxu0  ;;  %2527 = vmatmul.mubr.bf16.gmra.mxu0 %v4142_v58 }
 0x1b4   :  { %v1420_v35 = vpop.f32.mrf.mxu1  ;;  %2534 = vmatprep.mubr.bf16.mxu0 %v3308_v17 }
 0x1b5   :  { %v3651_v30 = vpop.f32.mrf.mxu0  ;;  %v3309_v35 = vcombine.low %v3258_v50, %v3258_v50  ;;  %v5566_v57 = vld [vmem:[#allocation5_spill] sm:$0xff] }
 0x1b6   :  { %v3652_v16 = vadd.f32 %v3651_v30, %v3650_v3  ;;  %v1948_v41 = vpop.f32.mrf.mxu1  ;;  %2663 = vmatmul.mubr.bf16.gmra.mxu1 %v4147_v61 }
 0x1b7   :  { %v3653_v0 = vpop.f32.mrf.mxu0  ;;  %3323 = vmatprep.mubr.msk.bf16.mxu1 %vm507_vm0, %v3310_v62 }
 0x1b8   :  { %v1949_v21 = vadd.f32 %v3652_v16, %v1948_v41  ;;  %v1950_v13 = vpop.f32.mrf.mxu1 }
 0x1b9   :  { %v3654_v56 = vpop.f32.mrf.mxu0 }
 0x1ba   :  { %v5311_v40 = vmax.f32 %v5541_v47, %v1949_v21  ;;  %v3655_v58 = vadd.f32 %v3654_v56, %v3653_v0  ;;  %v1951_v2 = vpop.f32.mrf.mxu1  ;;  %v5543_v0 = vmax.f32 %v4766_v5, %v5063_v27  ;;  %v5545_v5 = vmax.f32 %v4792_v24, %v5084_v11 }
 0x1bb   :  { %v3656_v17 = vpop.f32.mrf.mxu0  ;;  %2535 = vmatmul.mubr.bf16.gmra.mxu0 %v3307_v25  ;;  %v5547_v24 = vmax.f32 %v4829_v31, %v5105_v32  ;;  %v5549_v31 = vmax.f32 %v4866_v8, %v5126_v26  ;;  %v5551_v8 = vmax.f32 %v4903_v55, %v5147_v9  ;;  %v5553_v55 = vmax.f32 %v4931_v39, %v5168_v6 }
 0x1bc   :  { %v1952_v3 = vadd.f32 %v3655_v58, %v1951_v2  ;;  %v1953_v30 = vpop.f32.mrf.mxu1  ;;  %v5555_v39 = vmax.f32 %v4948_v10, %v5189_v38  ;;  %v5557_v10 = vmax.f32 %v4965_v52, %v5210_v42  ;;  %v5559_v52 = vmax.f32 %v4982_v34, %v5231_v12 }
 0x1bd   :  { %v3657_v61 = vpop.f32.mrf.mxu0  ;;  %v5561_v34 = vmax.f32 %v4999_v7, %v5252_v60  ;;  %v5563_v7 = vld [vmem:[#allocation4_spill] sm:$0xff] }
 0x1be   :  { %v5316_v62 = vmax.f32 %v5542_v1, %v1952_v3  ;;  %v3658_v41 = vadd.f32 %v3657_v61, %v3656_v17  ;;  %v1956_v13 = vpop.f32.mrf.mxu1  ;;  %2671 = vmatmul.mubr.bf16.gmra.mxu1 %v3309_v35  ;;  %v5564_v60 = vmax.f32 %v5016_v53, %v5563_v7  ;;  %v5568_v53 = vld [vmem:[#allocation3_spill] sm:$0xff] }
 0x1bf   :  { %v3659_v16 = vpop.f32.mrf.mxu0 }
 0x1c0   :  { %v1957_v37 = vadd.f32 %v3658_v41, %v1956_v13  ;;  %v1958_v15 = vpop.f32.mrf.mxu1 }
 0x1c1   :  { %v3660_v47 = vpop.f32.mrf.mxu0 }
 0x1c2   :  { %v5321_v50 = vmax.f32 %v5543_v0, %v1957_v37  ;;  %v3661_v25 = vadd.f32 %v3660_v47, %v3659_v16  ;;  %v1959_v2 = vpop.f32.mrf.mxu1 }
 0x1c3   :  { %v3662_v21 = vpop.f32.mrf.mxu0 }
 0x1c4   :  { %v1960_v56 = vadd.f32 %v3661_v25, %v1959_v2  ;;  %v1961_v58 = vpop.f32.mrf.mxu1 }
 0x1c5   :  { %v3663_v46 = vpop.f32.mrf.mxu0 }
 0x1c6   :  { %v5326_v17 = vmax.f32 %v5544_v54, %v1960_v56  ;;  %v3664_v35 = vadd.f32 %v3663_v46, %v3662_v21  ;;  %v1964_v3 = vpop.f32.mrf.mxu1 }
 0x1c7   :  { %v3665_v30 = vpop.f32.mrf.mxu0 }
 0x1c8   :  { %v1965_v61 = vadd.f32 %v3664_v35, %v1964_v3  ;;  %v1966_v1 = vpop.f32.mrf.mxu1 }
 0x1c9   :  { %v3666_v41 = vpop.f32.mrf.mxu0 }
 0x1ca   :  { %v5331_v27 = vmax.f32 %v5545_v5, %v1965_v61  ;;  %v3667_v13 = vadd.f32 %v3666_v41, %v3665_v30  ;;  %v1967_v16 = vpop.f32.mrf.mxu1 }
 0x1cb   :  { %v3668_v37 = vpop.f32.mrf.mxu0 }
 0x1cc   :  { %v1968_v15 = vadd.f32 %v3667_v13, %v1967_v16  ;;  %v1969_v47 = vpop.f32.mrf.mxu1 }
 0x1cd   :  { %v3669_v0 = vpop.f32.mrf.mxu0 }
 0x1ce   :  { %v5336_v43 = vmax.f32 %v5546_v14, %v1968_v15  ;;  %v3670_v25 = vadd.f32 %v3669_v0, %v3668_v37  ;;  %v1972_v2 = vpop.f32.mrf.mxu1 }
 0x1cf   :  { %v3671_v21 = vpop.f32.mrf.mxu0 }
 0x1d0   :  { %v1973_v56 = vadd.f32 %v3670_v25, %v1972_v2  ;;  %v1974_v58 = vpop.f32.mrf.mxu1 }
 0x1d1   :  { %v3672_v46 = vpop.f32.mrf.mxu0 }
 0x1d2   :  { %v5341_v11 = vmax.f32 %v5547_v24, %v1973_v56  ;;  %v3673_v54 = vadd.f32 %v3672_v46, %v3671_v21  ;;  %v1975_v35 = vpop.f32.mrf.mxu1 }
 0x1d3   :  { %v3674_v3 = vpop.f32.mrf.mxu0 }
 0x1d4   :  { %v1976_v30 = vadd.f32 %v3673_v54, %v1975_v35  ;;  %v1977_v61 = vpop.f32.mrf.mxu1 }
 0x1d5   :  { %v3675_v1 = vpop.f32.mrf.mxu0 }
 0x1d6   :  { %v5346_v51 = vmax.f32 %v5548_v59, %v1976_v30  ;;  %v3676_v41 = vadd.f32 %v3675_v1, %v3674_v3  ;;  %v1980_v5 = vpop.f32.mrf.mxu1 }
 0x1d7   :  { %v3677_v13 = vpop.f32.mrf.mxu0 }
 0x1d8   :  { %v1981_v16 = vadd.f32 %v3676_v41, %v1980_v5  ;;  %v1982_v37 = vpop.f32.mrf.mxu1 }
 0x1d9   :  { %v3678_v15 = vpop.f32.mrf.mxu0 }
 0x1da   :  { %v5351_v32 = vmax.f32 %v5549_v31, %v1981_v16  ;;  %v3679_v47 = vadd.f32 %v3678_v15, %v3677_v13  ;;  %v1983_v0 = vpop.f32.mrf.mxu1 }
 0x1db   :  { %v3680_v14 = vpop.f32.mrf.mxu0 }
 0x1dc   :  { %v1984_v25 = vadd.f32 %v3679_v47, %v1983_v0  ;;  %v1985_v2 = vpop.f32.mrf.mxu1 }
 0x1dd   :  { %v3681_v21 = vpop.f32.mrf.mxu0 }
 0x1de   :  { %v5356_v4 = vmax.f32 %v5550_v44, %v1984_v25  ;;  %v3682_v56 = vadd.f32 %v3681_v21, %v3680_v14  ;;  %v1988_v58 = vpop.f32.mrf.mxu1 }
 0x1df   :  { %v3683_v46 = vpop.f32.mrf.mxu0 }
 0x1e0   :  { %v1989_v24 = vadd.f32 %v3682_v56, %v1988_v58  ;;  %v1990_v54 = vpop.f32.mrf.mxu1 }
 0x1e1   :  { %v3684_v35 = vpop.f32.mrf.mxu0 }
 0x1e2   :  { %v5361_v26 = vmax.f32 %v5551_v8, %v1989_v24  ;;  %v3685_v3 = vadd.f32 %v3684_v35, %v3683_v46  ;;  %v1991_v30 = vpop.f32.mrf.mxu1 }
 0x1e3   :  { %v3686_v61 = vpop.f32.mrf.mxu0 }
 0x1e4   :  { %v1992_v1 = vadd.f32 %v3685_v3, %v1991_v30  ;;  %v1993_v59 = vpop.f32.mrf.mxu1 }
 0x1e5   :  { %v3687_v41 = vpop.f32.mrf.mxu0 }
 0x1e6   :  { %v5366_v36 = vmax.f32 %v5552_v20, %v1992_v1  ;;  %v3688_v5 = vadd.f32 %v3687_v41, %v3686_v61  ;;  %v1996_v13 = vpop.f32.mrf.mxu1 }
 0x1e7   :  { %v3689_v16 = vpop.f32.mrf.mxu0 }
 0x1e8   :  { %v1997_v37 = vadd.f32 %v3688_v5, %v1996_v13  ;;  %v1998_v15 = vpop.f32.mrf.mxu1 }
 0x1e9   :  { %v3690_v31 = vpop.f32.mrf.mxu0 }
 0x1ea   :  { %v5371_v9 = vmax.f32 %v5553_v55, %v1997_v37  ;;  %v3691_v47 = vadd.f32 %v3690_v31, %v3689_v16  ;;  %v1999_v0 = vpop.f32.mrf.mxu1 }
 0x1eb   :  { %v3692_v14 = vpop.f32.mrf.mxu0 }
 0x1ec   :  { %v2000_v25 = vadd.f32 %v3691_v47, %v1999_v0  ;;  %v2001_v2 = vpop.f32.mrf.mxu1 }
 0x1ed   :  { %v3693_v21 = vpop.f32.mrf.mxu0 }
 0x1ee   :  { %v5376_v23 = vmax.f32 %v5554_v29, %v2000_v25  ;;  %v3694_v44 = vadd.f32 %v3693_v21, %v3692_v14  ;;  %v2004_v56 = vpop.f32.mrf.mxu1 }
 0x1ef   :  { %v3695_v58 = vpop.f32.mrf.mxu0 }
 0x1f0   :  { %v2005_v46 = vadd.f32 %v3694_v44, %v2004_v56  ;;  %v2006_v24 = vpop.f32.mrf.mxu1 }
 0x1f1   :  { %v3696_v54 = vpop.f32.mrf.mxu0 }
 0x1f2   :  { %v5381_v6 = vmax.f32 %v5555_v39, %v2005_v46  ;;  %v3697_v35 = vadd.f32 %v3696_v54, %v3695_v58  ;;  %v2007_v8 = vpop.f32.mrf.mxu1 }
 0x1f3   :  { %v3698_v3 = vpop.f32.mrf.mxu0 }
 0x1f4   :  { %v2008_v30 = vadd.f32 %v3697_v35, %v2007_v8  ;;  %v2009_v61 = vpop.f32.mrf.mxu1 }
 0x1f5   :  { %v3699_v1 = vpop.f32.mrf.mxu0 }
 0x1f6   :  { %v5386_v33 = vmax.f32 %v5556_v49, %v2008_v30  ;;  %v3700_v59 = vadd.f32 %v3699_v1, %v3698_v3  ;;  %v2012_v41 = vpop.f32.mrf.mxu1 }
 0x1f7   :  { %v3701_v20 = vpop.f32.mrf.mxu0 }
 0x1f8   :  { %v2013_v5 = vadd.f32 %v3700_v59, %v2012_v41  ;;  %v2014_v13 = vpop.f32.mrf.mxu1 }
 0x1f9   :  { %v3702_v16 = vpop.f32.mrf.mxu0 }
 0x1fa   :  { %v5391_v38 = vmax.f32 %v5557_v10, %v2013_v5  ;;  %v3703_v37 = vadd.f32 %v3702_v16, %v3701_v20  ;;  %v2015_v15 = vpop.f32.mrf.mxu1 }
 0x1fb   :  { %v3704_v31 = vpop.f32.mrf.mxu0 }
 0x1fc   :  { %v2016_v55 = vadd.f32 %v3703_v37, %v2015_v15  ;;  %v2017_v47 = vpop.f32.mrf.mxu1 }
 0x1fd   :  { %v3705_v0 = vpop.f32.mrf.mxu0 }
 0x1fe   :  { %v5396_v48 = vmax.f32 %v5558_v19, %v2016_v55  ;;  %v3706_v14 = vadd.f32 %v3705_v0, %v3704_v31  ;;  %v2020_v25 = vpop.f32.mrf.mxu1 }
 0x1ff   :  { %v3707_v2 = vpop.f32.mrf.mxu0 }
 0x200   :  { %v2021_v21 = vadd.f32 %v3706_v14, %v2020_v25  ;;  %v2022_v29 = vpop.f32.mrf.mxu1 }
 0x201   :  { %v3708_v44 = vpop.f32.mrf.mxu0  ;;  %v5567_v29 = vmax.f32 %v5565_v18, %v5566_v57 }
 0x202   :  { %v5401_v42 = vmax.f32 %v5559_v52, %v2021_v21  ;;  %v3709_v56 = vadd.f32 %v3708_v44, %v3707_v2  ;;  %v2023_v58 = vpop.f32.mrf.mxu1 }
 0x203   :  { %v3710_v46 = vpop.f32.mrf.mxu0 }
 0x204   :  { %v2024_v24 = vadd.f32 %v3709_v56, %v2023_v58  ;;  %v2025_v54 = vpop.f32.mrf.mxu1 }
 0x205   :  { %v3711_v39 = vpop.f32.mrf.mxu0 }
 0x206   :  { %v5406_v28 = vmax.f32 %v5560_v63, %v2024_v24  ;;  %v3712_v35 = vadd.f32 %v3711_v39, %v3710_v46  ;;  %v2028_v8 = vpop.f32.mrf.mxu1  ;;  %v5569_v39 = vld [vmem:[#allocation6_spill] sm:$0xff] }
 0x207   :  { %v3713_v3 = vpop.f32.mrf.mxu0  ;;  %v5570_v63 = vmax.f32 %v5568_v53, %v5569_v39 }
 0x208   :  { %v2029_v30 = vadd.f32 %v3712_v35, %v2028_v8  ;;  %v2030_v61 = vpop.f32.mrf.mxu1 }
 0x209   :  { %v3714_v1 = vpop.f32.mrf.mxu0 }
 0x20a   :  { %v5411_v12 = vmax.f32 %v5561_v34, %v2029_v30  ;;  %v3715_v49 = vadd.f32 %v3714_v1, %v3713_v3  ;;  %v2031_v59 = vpop.f32.mrf.mxu1 }
 0x20b   :  { %v3716_v41 = vpop.f32.mrf.mxu0 }
 0x20c   :  { %v2032_v20 = vadd.f32 %v3715_v49, %v2031_v59  ;;  %v2033_v5 = vpop.f32.mrf.mxu1 }
 0x20d   :  { %v3717_v13 = vpop.f32.mrf.mxu0 }
 0x20e   :  { %v5416_v22 = vmax.f32 %v5562_v45, %v2032_v20  ;;  %v3718_v16 = vadd.f32 %v3717_v13, %v3716_v41  ;;  %v2036_v10 = vpop.f32.mrf.mxu1 }
 0x20f   :  { %v3719_v37 = vpop.f32.mrf.mxu0 }
 0x210   :  { %v2037_v15 = vadd.f32 %v3718_v16, %v2036_v10  ;;  %v2038_v31 = vpop.f32.mrf.mxu1  ;;  %v5437_v16 = vld [vmem:[%s5529_s2] ss:$0 sm:$0xff] }
 0x211   :  { %v3720_v55 = vpop.f32.mrf.mxu0 }
 0x212   :  { %v5421_v47 = vmax.f32 %v5564_v60, %v2037_v15  ;;  %v3721_v0 = vadd.f32 %v3720_v55, %v3719_v37  ;;  %v2039_v19 = vpop.f32.mrf.mxu1 }
 0x213   :  { %v3722_v14 = vpop.f32.mrf.mxu0 }
 0x214   :  { %v2040_v25 = vadd.f32 %v3721_v0, %v2039_v19  ;;  %v2041_v2 = vpop.f32.mrf.mxu1 }
 0x215   :  { %v3723_v21 = vpop.f32.mrf.mxu0 }
 0x216   :  { %v5426_v44 = vmax.f32 %v5567_v29, %v2040_v25  ;;  %v3724_v52 = vadd.f32 %v3723_v21, %v3722_v14  ;;  %v2044_v56 = vpop.f32.mrf.mxu1 }
 0x217   :  { %v3725_v58 = vpop.f32.mrf.mxu0 }
 0x218   :  { %v2045_v46 = vadd.f32 %v3724_v52, %v2044_v56  ;;  %v2046_v24 = vpop.f32.mrf.mxu1 }
 0x219   :  { %v3726_v54 = vpop.f32.mrf.mxu0 }
 0x21a   :  { %v5431_v35 = vmax.f32 %v5570_v63, %v2045_v46  ;;  %v2047_v8 = vpop.f32.mrf.mxu1 }
 0x21b   :  { %v3744_v3 = vpop.f32.mrf.mxu0 }
 0x21c   :  { %v2048_v30 = vpop.f32.mrf.mxu1 }
 0x21d   :  { %v3745_v61 = vpop.f32.mrf.mxu0 }
 0x21e   :  { %v3746_v1 = vadd.f32 %v3745_v61, %v3744_v3  ;;  %v2576_v34 = vpop.f32.mrf.mxu1 }
 0x21f   :  { %v3747_v49 = vpop.f32.mrf.mxu0 }
 0x220   :  { %v2577_v59 = vadd.f32 %v3746_v1, %v2576_v34  ;;  %v2578_v41 = vpop.f32.mrf.mxu1 }
 0x221   :  { %v3748_v20 = vpop.f32.mrf.mxu0 }
 0x222   :  { %v2678_v5 = vmax.f32 %v5311_v40, %v2577_v59  ;;  %v3749_v13 = vadd.f32 %v3748_v20, %v3747_v49  ;;  %v2579_v45 = vpop.f32.mrf.mxu1 }
 0x223   :  { %v3750_v10 = vpop.f32.mrf.mxu0 }
 0x224   :  { %v2580_v37 = vadd.f32 %v3749_v13, %v2579_v45  ;;  %v2581_v15 = vpop.f32.mrf.mxu1  ;;  %v2709_v55 = vadd.f32 %v5437_v16, %v2678_v5 }
 0x225   :  { %v3751_v31 = vpop.f32.mrf.mxu0 }
 0x226   :  { %v2679_v7 = vmax.f32 %v5316_v62, %v2580_v37  ;;  %v3752_v60 = vadd.f32 %v3751_v31, %v3750_v10  ;;  %v2584_v0 = vpop.f32.mrf.mxu1  ;;  %v2734_v21 = vmax.f32 %v2709_v55, 0.0 }
 0x227   :  { %v3753_v19 = vpop.f32.mrf.mxu0 }
 0x228   :  { %v2710_v40 = vadd.f32 %v5437_v16, %v2679_v7  ;;  %v2585_v14 = vadd.f32 %v3752_v60, %v2584_v0  ;;  %v2586_v25 = vpop.f32.mrf.mxu1 }
 0x229   :  { %v3754_v2 = vpop.f32.mrf.mxu0 }
 0x22a   :  { %v2735_v18 = vmax.f32 %v2710_v40, 0.0  ;;  %v2680_v57 = vmax.f32 %v5321_v50, %v2585_v14  ;;  %v3755_v29 = vadd.f32 %v3754_v2, %v3753_v19  ;;  %v2587_v52 = vpop.f32.mrf.mxu1 }
 0x22b   :  { %v3756_v56 = vpop.f32.mrf.mxu0 }
 0x22c   :  { %v3378_v58 = vpack.c.bf16 %v2735_v18, %v2734_v21  ;;  %v2588_v46 = vadd.f32 %v3755_v29, %v2587_v52  ;;  %v2589_v24 = vpop.f32.mrf.mxu1  ;;  %v2711_v62 = vadd.f32 %v5437_v16, %v2680_v57 }
 0x22d   :  { %v3757_v54 = vpop.f32.mrf.mxu0 }
 0x22e   :  { %3379 = vst [vmem:[%s5530_s3] sm:$0xff] %v3378_v58   ;;  %v2681_v53 = vmax.f32 %v5326_v17, %v2588_v46  ;;  %v3758_v39 = vadd.f32 %v3757_v54, %v3756_v56  ;;  %v2592_v63 = vpop.f32.mrf.mxu1  ;;  %v2736_v1 = vmax.f32 %v2711_v62, 0.0 }
 0x22f   :  { %v3759_v8 = vpop.f32.mrf.mxu0 }
 0x230   :  { %v2712_v50 = vadd.f32 %v5437_v16, %v2681_v53  ;;  %v2593_v3 = vadd.f32 %v3758_v39, %v2592_v63  ;;  %v2594_v30 = vpop.f32.mrf.mxu1 }
 0x231   :  { %v3760_v61 = vpop.f32.mrf.mxu0 }
 0x232   :  { %v2737_v34 = vmax.f32 %v2712_v50, 0.0  ;;  %v2682_v49 = vmax.f32 %v5331_v27, %v2593_v3  ;;  %v3761_v59 = vadd.f32 %v3760_v61, %v3759_v8  ;;  %v2595_v41 = vpop.f32.mrf.mxu1 }
 0x233   :  { %v3762_v20 = vpop.f32.mrf.mxu0 }
 0x234   :  { %v3383_v5 = vpack.c.bf16 %v2737_v34, %v2736_v1  ;;  %v2596_v13 = vadd.f32 %v3761_v59, %v2595_v41  ;;  %v2597_v45 = vpop.f32.mrf.mxu1  ;;  %v2713_v17 = vadd.f32 %v5437_v16, %v2682_v49 }
 0x235   :  { %v3763_v10 = vpop.f32.mrf.mxu0 }
 0x236   :  { %3435 = vst [vmem:[%s5530_s3 + $0x8] sm:$0xff] %v3383_v5   ;;  %v2683_v37 = vmax.f32 %v5336_v43, %v2596_v13  ;;  %v3764_v15 = vadd.f32 %v3763_v10, %v3762_v20  ;;  %v2600_v31 = vpop.f32.mrf.mxu1  ;;  %v2738_v19 = vmax.f32 %v2713_v17, 0.0 }
 0x237   :  { %v3765_v55 = vpop.f32.mrf.mxu0 }
 0x238   :  { %v2714_v27 = vadd.f32 %v5437_v16, %v2683_v37  ;;  %v2601_v7 = vadd.f32 %v3764_v15, %v2600_v31  ;;  %v2602_v60 = vpop.f32.mrf.mxu1 }
 0x239   :  { %v3766_v0 = vpop.f32.mrf.mxu0 }
 0x23a   :  { %v2739_v40 = vmax.f32 %v2714_v27, 0.0  ;;  %v2684_v14 = vmax.f32 %v5341_v11, %v2601_v7  ;;  %v3767_v25 = vadd.f32 %v3766_v0, %v3765_v55  ;;  %v2603_v2 = vpop.f32.mrf.mxu1 }
 0x23b   :  { %v3768_v21 = vpop.f32.mrf.mxu0 }
 0x23c   :  { %v3388_v18 = vpack.c.bf16 %v2739_v40, %v2738_v19  ;;  %v2604_v57 = vadd.f32 %v3767_v25, %v2603_v2  ;;  %v2605_v29 = vpop.f32.mrf.mxu1  ;;  %v2715_v43 = vadd.f32 %v5437_v16, %v2684_v14 }
 0x23d   :  { %v3769_v52 = vpop.f32.mrf.mxu0 }
 0x23e   :  { %3436 = vst [vmem:[%s5530_s3 + $0x10] sm:$0xff] %v3388_v18   ;;  %v2685_v56 = vmax.f32 %v5346_v51, %v2604_v57  ;;  %v3770_v58 = vadd.f32 %v3769_v52, %v3768_v21  ;;  %v2608_v46 = vpop.f32.mrf.mxu1  ;;  %v2740_v39 = vmax.f32 %v2715_v43, 0.0 }
 0x23f   :  { %v3771_v24 = vpop.f32.mrf.mxu0 }
 0x240   :  { %v2716_v11 = vadd.f32 %v5437_v16, %v2685_v56  ;;  %v2609_v54 = vadd.f32 %v3770_v58, %v2608_v46  ;;  %v2610_v62 = vpop.f32.mrf.mxu1 }
 0x241   :  { %v3772_v53 = vpop.f32.mrf.mxu0 }
 0x242   :  { %v2741_v63 = vmax.f32 %v2716_v11, 0.0  ;;  %v2686_v8 = vmax.f32 %v5351_v32, %v2609_v54  ;;  %v3773_v50 = vadd.f32 %v3772_v53, %v3771_v24  ;;  %v2611_v3 = vpop.f32.mrf.mxu1 }
 0x243   :  { %v3774_v30 = vpop.f32.mrf.mxu0 }
 0x244   :  { %v3393_v61 = vpack.c.bf16 %v2741_v63, %v2740_v39  ;;  %v2612_v1 = vadd.f32 %v3773_v50, %v2611_v3  ;;  %v2613_v34 = vpop.f32.mrf.mxu1  ;;  %v2717_v51 = vadd.f32 %v5437_v16, %v2686_v8 }
 0x245   :  { %v3775_v49 = vpop.f32.mrf.mxu0 }
 0x246   :  { %3437 = vst [vmem:[%s5530_s3 + $0x18] sm:$0xff] %v3393_v61   ;;  %v2687_v59 = vmax.f32 %v5356_v4, %v2612_v1  ;;  %v3776_v41 = vadd.f32 %v3775_v49, %v3774_v30  ;;  %v2616_v20 = vpop.f32.mrf.mxu1  ;;  %v2742_v17 = vmax.f32 %v2717_v51, 0.0 }
 0x247   :  { %v3777_v5 = vpop.f32.mrf.mxu0 }
 0x248   :  { %v2718_v32 = vadd.f32 %v5437_v16, %v2687_v59  ;;  %v2617_v13 = vadd.f32 %v3776_v41, %v2616_v20  ;;  %v2618_v45 = vpop.f32.mrf.mxu1 }
 0x249   :  { %v3778_v10 = vpop.f32.mrf.mxu0 }
 0x24a   :  { %v2743_v37 = vmax.f32 %v2718_v32, 0.0  ;;  %v2688_v15 = vmax.f32 %v5361_v26, %v2617_v13  ;;  %v3779_v31 = vadd.f32 %v3778_v10, %v3777_v5  ;;  %v2619_v55 = vpop.f32.mrf.mxu1 }
 0x24b   :  { %v3780_v27 = vpop.f32.mrf.mxu0 }
 0x24c   :  { %v3398_v7 = vpack.c.bf16 %v2743_v37, %v2742_v17  ;;  %v2620_v60 = vadd.f32 %v3779_v31, %v2619_v55  ;;  %v2621_v0 = vpop.f32.mrf.mxu1  ;;  %v2719_v4 = vadd.f32 %v5437_v16, %v2688_v15 }
 0x24d   :  { %v3781_v19 = vpop.f32.mrf.mxu0 }
 0x24e   :  { %3438 = vst [vmem:[%s5530_s3 + $0x20] sm:$0xff] %v3398_v7   ;;  %v2689_v40 = vmax.f32 %v5366_v36, %v2620_v60  ;;  %v3782_v14 = vadd.f32 %v3781_v19, %v3780_v27  ;;  %v2624_v25 = vpop.f32.mrf.mxu1  ;;  %v2744_v29 = vmax.f32 %v2719_v4, 0.0 }
 0x24f   :  { %v3783_v2 = vpop.f32.mrf.mxu0 }
 0x250   :  { %v2720_v26 = vadd.f32 %v5437_v16, %v2689_v40  ;;  %v2625_v21 = vadd.f32 %v3782_v14, %v2624_v25  ;;  %v2626_v18 = vpop.f32.mrf.mxu1 }
 0x251   :  { %v3784_v57 = vpop.f32.mrf.mxu0 }
 0x252   :  { %v2745_v52 = vmax.f32 %v2720_v26, 0.0  ;;  %v2690_v43 = vmax.f32 %v5371_v9, %v2625_v21  ;;  %v3785_v56 = vadd.f32 %v3784_v57, %v3783_v2  ;;  %v2627_v58 = vpop.f32.mrf.mxu1 }
 0x253   :  { %v3786_v46 = vpop.f32.mrf.mxu0 }
 0x254   :  { %v3403_v24 = vpack.c.bf16 %v2745_v52, %v2744_v29  ;;  %v2628_v11 = vadd.f32 %v3785_v56, %v2627_v58  ;;  %v2629_v54 = vpop.f32.mrf.mxu1  ;;  %v2721_v36 = vadd.f32 %v5437_v16, %v2690_v43 }
 0x255   :  { %v3787_v62 = vpop.f32.mrf.mxu0 }
 0x256   :  { %3439 = vst [vmem:[%s5530_s3 + $0x28] sm:$0xff] %v3403_v24   ;;  %v2691_v53 = vmax.f32 %v5376_v23, %v2628_v11  ;;  %v3788_v39 = vadd.f32 %v3787_v62, %v3786_v46  ;;  %v2632_v63 = vpop.f32.mrf.mxu1  ;;  %v2746_v61 = vmax.f32 %v2721_v36, 0.0 }
 0x257   :  { %v3789_v8 = vpop.f32.mrf.mxu0 }
 0x258   :  { %v2722_v9 = vadd.f32 %v5437_v16, %v2691_v53  ;;  %v2633_v50 = vadd.f32 %v3788_v39, %v2632_v63  ;;  %v2634_v3 = vpop.f32.mrf.mxu1 }
 0x259   :  { %v3790_v30 = vpop.f32.mrf.mxu0 }
 0x25a   :  { %v2747_v1 = vmax.f32 %v2722_v9, 0.0  ;;  %v2692_v34 = vmax.f32 %v5381_v6, %v2633_v50  ;;  %v3791_v49 = vadd.f32 %v3790_v30, %v3789_v8  ;;  %v2635_v51 = vpop.f32.mrf.mxu1 }
 0x25b   :  { %v3792_v59 = vpop.f32.mrf.mxu0 }
 0x25c   :  { %v3408_v41 = vpack.c.bf16 %v2747_v1, %v2746_v61  ;;  %v2636_v20 = vadd.f32 %v3791_v49, %v2635_v51  ;;  %v2637_v5 = vpop.f32.mrf.mxu1  ;;  %v2723_v23 = vadd.f32 %v5437_v16, %v2692_v34 }
 0x25d   :  { %v3793_v32 = vpop.f32.mrf.mxu0 }
 0x25e   :  { %3440 = vst [vmem:[%s5530_s3 + $0x30] sm:$0xff] %v3408_v41   ;;  %v2693_v13 = vmax.f32 %v5386_v33, %v2636_v20  ;;  %v3794_v45 = vadd.f32 %v3793_v32, %v3792_v59  ;;  %v2640_v10 = vpop.f32.mrf.mxu1  ;;  %v2748_v55 = vmax.f32 %v2723_v23, 0.0 }
 0x25f   :  { %v3795_v17 = vpop.f32.mrf.mxu0 }
 0x260   :  { %v2724_v6 = vadd.f32 %v5437_v16, %v2693_v13  ;;  %v2641_v37 = vadd.f32 %v3794_v45, %v2640_v10  ;;  %v2642_v15 = vpop.f32.mrf.mxu1 }
 0x261   :  { %v3796_v31 = vpop.f32.mrf.mxu0 }
 0x262   :  { %v2749_v27 = vmax.f32 %v2724_v6, 0.0  ;;  %v2694_v7 = vmax.f32 %v5391_v38, %v2641_v37  ;;  %v3797_v60 = vadd.f32 %v3796_v31, %v3795_v17  ;;  %v2643_v0 = vpop.f32.mrf.mxu1 }
 0x263   :  { %v3798_v19 = vpop.f32.mrf.mxu0 }
 0x264   :  { %v3413_v4 = vpack.c.bf16 %v2749_v27, %v2748_v55  ;;  %v2644_v40 = vadd.f32 %v3797_v60, %v2643_v0  ;;  %v2645_v14 = vpop.f32.mrf.mxu1  ;;  %v2725_v33 = vadd.f32 %v5437_v16, %v2694_v7 }
 0x265   :  { %v3799_v25 = vpop.f32.mrf.mxu0 }
 0x266   :  { %3441 = vst [vmem:[%s5530_s3 + $0x38] sm:$0xff] %v3413_v4   ;;  %v2695_v2 = vmax.f32 %v5396_v48, %v2644_v40  ;;  %v3800_v26 = vadd.f32 %v3799_v25, %v3798_v19  ;;  %v2648_v21 = vpop.f32.mrf.mxu1  ;;  %v2750_v43 = vmax.f32 %v2725_v33, 0.0 }
 0x267   :  { %v3801_v18 = vpop.f32.mrf.mxu0 }
 0x268   :  { %v2726_v38 = vadd.f32 %v5437_v16, %v2695_v2  ;;  %v2649_v57 = vadd.f32 %v3800_v26, %v2648_v21  ;;  %v2650_v29 = vpop.f32.mrf.mxu1 }
 0x269   :  { %v3802_v52 = vpop.f32.mrf.mxu0 }
 0x26a   :  { %v2751_v56 = vmax.f32 %v2726_v38, 0.0  ;;  %v2696_v58 = vmax.f32 %v5401_v42, %v2649_v57  ;;  %v3803_v46 = vadd.f32 %v3802_v52, %v3801_v18  ;;  %v2651_v24 = vpop.f32.mrf.mxu1 }
 0x26b   :  { %v3804_v11 = vpop.f32.mrf.mxu0 }
 0x26c   :  { %v3418_v54 = vpack.c.bf16 %v2751_v56, %v2750_v43  ;;  %v2652_v62 = vadd.f32 %v3803_v46, %v2651_v24  ;;  %v2653_v36 = vpop.f32.mrf.mxu1  ;;  %v2727_v48 = vadd.f32 %v5437_v16, %v2696_v58 }
 0x26d   :  { %v3805_v53 = vpop.f32.mrf.mxu0 }
 0x26e   :  { %3442 = vst [vmem:[%s5530_s3 + $0x40] sm:$0xff] %v3418_v54   ;;  %v2697_v39 = vmax.f32 %v5406_v28, %v2652_v62  ;;  %v3806_v63 = vadd.f32 %v3805_v53, %v3804_v11  ;;  %v2656_v8 = vpop.f32.mrf.mxu1  ;;  %v2752_v61 = vmax.f32 %v2727_v48, 0.0 }
 0x26f   :  { %v3807_v9 = vpop.f32.mrf.mxu0 }
 0x270   :  { %v2728_v42 = vadd.f32 %v5437_v16, %v2697_v39  ;;  %v2657_v50 = vadd.f32 %v3806_v63, %v2656_v8  ;;  %v2658_v3 = vpop.f32.mrf.mxu1 }
 0x271   :  { %v3808_v30 = vpop.f32.mrf.mxu0 }
 0x272   :  { %v2753_v1 = vmax.f32 %v2728_v42, 0.0  ;;  %v2698_v34 = vmax.f32 %v5411_v12, %v2657_v50  ;;  %v3809_v49 = vadd.f32 %v3808_v30, %v3807_v9  ;;  %v2659_v51 = vpop.f32.mrf.mxu1 }
 0x273   :  { %v3810_v59 = vpop.f32.mrf.mxu0 }
 0x274   :  { %v3423_v41 = vpack.c.bf16 %v2753_v1, %v2752_v61  ;;  %v2660_v20 = vadd.f32 %v3809_v49, %v2659_v51  ;;  %v2661_v5 = vpop.f32.mrf.mxu1  ;;  %v2729_v28 = vadd.f32 %v5437_v16, %v2698_v34 }
 0x275   :  { %v3811_v32 = vpop.f32.mrf.mxu0 }
 0x276   :  { %3443 = vst [vmem:[%s5530_s3 + $0x48] sm:$0xff] %v3423_v41   ;;  %v2699_v23 = vmax.f32 %v5416_v22, %v2660_v20  ;;  %v3812_v13 = vadd.f32 %v3811_v32, %v3810_v59  ;;  %v2664_v45 = vpop.f32.mrf.mxu1  ;;  %v2754_v15 = vmax.f32 %v2729_v28, 0.0 }
 0x277   :  { %v3813_v10 = vpop.f32.mrf.mxu0 }
 0x278   :  { %v2730_v12 = vadd.f32 %v5437_v16, %v2699_v23  ;;  %v2665_v17 = vadd.f32 %v3812_v13, %v2664_v45  ;;  %v2666_v6 = vpop.f32.mrf.mxu1 }
 0x279   :  { %v3814_v37 = vpop.f32.mrf.mxu0 }
 0x27a   :  { %v2755_v31 = vmax.f32 %v2730_v12, 0.0  ;;  %v2700_v55 = vmax.f32 %v5421_v47, %v2665_v17  ;;  %v3815_v27 = vadd.f32 %v3814_v37, %v3813_v10  ;;  %v2667_v7 = vpop.f32.mrf.mxu1 }
 0x27b   :  { %v3816_v60 = vpop.f32.mrf.mxu0 }
 0x27c   :  { %v3428_v0 = vpack.c.bf16 %v2755_v31, %v2754_v15  ;;  %v2668_v19 = vadd.f32 %v3815_v27, %v2667_v7  ;;  %v2669_v4 = vpop.f32.mrf.mxu1  ;;  %v2731_v22 = vadd.f32 %v5437_v16, %v2700_v55 }
 0x27d   :  { %v3817_v40 = vpop.f32.mrf.mxu0 }
 0x27e   :  { %3444 = vst [vmem:[%s5530_s3 + $0x50] sm:$0xff] %v3428_v0   ;;  %v2701_v14 = vmax.f32 %v5426_v44, %v2668_v19  ;;  %v3818_v25 = vadd.f32 %v3817_v40, %v3816_v60  ;;  %v2672_v33 = vpop.f32.mrf.mxu1  ;;  %v2756_v38 = vmax.f32 %v2731_v22, 0.0 }
 0x27f   :  { %v3819_v2 = vpop.f32.mrf.mxu0 }
 0x280   :  { %v2732_v47 = vadd.f32 %v5437_v16, %v2701_v14  ;;  %v2673_v26 = vadd.f32 %v3818_v25, %v2672_v33  ;;  %v2674_v21 = vpop.f32.mrf.mxu1 }
 0x281   :  { %v3820_v18 = vpop.f32.mrf.mxu0 }
 0x282   :  { %v2757_v57 = vmax.f32 %v2732_v47, 0.0  ;;  %v2702_v29 = vmax.f32 %v5431_v35, %v2673_v26  ;;  %v2675_v52 = vpop.f32.mrf.mxu1 }
 0x284   :  { %v3433_v43 = vpack.c.bf16 %v2757_v57, %v2756_v38  ;;  %v2733_v56 = vadd.f32 %v5437_v16, %v2702_v29  ;;  %v2676_v58 = vpop.f32.mrf.mxu1 }
 0x286   :  { %3445 = vst [vmem:[%s5530_s3 + $0x58] sm:$0xff] %v3433_v43   ;;  %v2758_v44 = vmax.f32 %v2733_v56, 0.0 }
 0x288   :  { %v3374_v46 = vpack.c.bf16 %v2758_v44, %v2758_v44 }
 0x28a   :  { %2884 = vst [vmem:[%s5530_s3 + $0x60] sm:$0xf] %v3374_v46 }

// kernel: forward.7
= control target key start
LH: loop header
LB: loop body
LE: loop exit
PB: predicated region body
PF: predicated region fallthrough
CT: control target
= control target key end

     0   :  { %vm318_vm0 = vcmask 261120   ;;  %s1150_s1 = inlined_call_operand.vmem [shape: bf16[288,128], index: 1, kind: input, shape index: {}]   ;;  %s1151_s0 = inlined_call_operand.vmem [shape: bf16[128,288], index: 0, kind: input, shape index: {}]   ;;  %s1152_s2 = inlined_call_operand.vmem [shape: f32[1,128], index: 2, kind: input, shape index: {}]   ;;  %s1153_s3 = inlined_call_operand.vmem [shape: bf16[128,128], index: 3, kind: output, shape index: {}]  }
   0x1   :  { %v877_v0 = vld [vmem:[%s1150_s1 + $0x78] sm:$0xff]   ;;  %v879_v2 = vld [vmem:[%s1150_s1 + $0x70] sm:$0xff]   ;;  %v881_v4 = vld [vmem:[%s1150_s1 + $0x68] sm:$0xff]  }
   0x2   :  { %v878_v1 = vld [vmem:[%s1150_s1 + $0x38] sm:$0xff]   ;;  %767 = vmatprep.subr.bf16.mxu0 %v877_v0  ;;  %861 = vmatprep.subr.bf16.mxu1 %v877_v0  ;;  %v880_v3 = vld [vmem:[%s1150_s1 + $0x30] sm:$0xff]   ;;  %v882_v5 = vld [vmem:[%s1150_s1 + $0x28] sm:$0xff]  }
   0x3   :  { %768 = vmatpush3.bf16.msra.mxu0 %v878_v1  ;;  %869 = vmatpush3.bf16.msra.mxu1 %v878_v1  ;;  %v883_v6 = vld [vmem:[%s1150_s1 + $0x60] sm:$0xff]   ;;  %v885_v8 = vld [vmem:[%s1150_s1 + $0x58] sm:$0xff]   ;;  %v887_v10 = vld [vmem:[%s1150_s1 + $0x50] sm:$0xff]  }
   0x4   :  { %769 = vmatprep.subr.bf16.mxu0 %v879_v2  ;;  %862 = vmatprep.subr.bf16.mxu1 %v879_v2  ;;  %v884_v7 = vld [vmem:[%s1150_s1 + $0x20] sm:$0xff]   ;;  %v886_v9 = vld [vmem:[%s1150_s1 + $0x18] sm:$0xff]   ;;  %v888_v13 = vld [vmem:[%s1150_s1 + $0x10] sm:$0xff]  }
   0x5   :  { %v895_v11 = vld [vmem:[%s1151_s0 + $0x4] ss:$12 sps:$4 sm:$0xff]   ;;  %v898_v12 = vld [vmem:[%s1151_s0 + $0x94] ss:$12 sps:$4 sm:$0xff]   ;;  %v889_v14 = vld [vmem:[%s1150_s1 + $0x48] sm:$0xff]  }
   0x6   :  { %375 = vmatprep.mubr.bf16.mxu0 %v895_v11  ;;  %423 = vmatprep.mubr.bf16.mxu1 %v898_v12  ;;  %v890_v15 = vld [vmem:[%s1150_s1 + $0x8] sm:$0xff]   ;;  %v891_v16 = vld [vmem:[%s1150_s1 + $0x40] sm:$0xff]   ;;  %v896_v20 = vld [vmem:[%s1151_s0 + $0x90] ss:$12 sps:$4 sm:$0xff]  }
   0x7   :  { %770 = vmatpush3.bf16.msra.mxu0 %v880_v3  ;;  %870 = vmatpush3.bf16.msra.mxu1 %v880_v3  ;;  %v892_v17 = vld [vmem:[%s1150_s1] sm:$0xff]   ;;  %v899_v19 = vld [vmem:[%s1150_s1 + $0x88] sm:$0xff]   ;;  %v910_v28 = vld [vmem:[%s1151_s0 + $0x30] ss:$12 sps:$4 sm:$0xff]  }
   0x8   :  { %771 = vmatprep.subr.bf16.mxu0 %v881_v4  ;;  %863 = vmatprep.subr.bf16.mxu1 %v881_v4  ;;  %v893_v18 = vld [vmem:[%s1151_s0] ss:$12 sps:$4 sm:$0xff]   ;;  %v900_v21 = vld [vmem:[%s1151_s0 + $0x1c] ss:$12 sps:$4 sm:$0xff]   ;;  %v904_v24 = vld [vmem:[%s1151_s0 + $0x18] ss:$12 sps:$4 sm:$0xff]  }
   0x9   :  { %v902_v22 = vld [vmem:[%s1151_s0 + $0xac] ss:$12 sps:$4 sm:$0xff]   ;;  %v906_v23 = vld [vmem:[%s1150_s1 + $0x80] sm:$0xff]   ;;  %v905_v25 = vld [vmem:[%s1151_s0 + $0xa8] ss:$12 sps:$4 sm:$0xff]  }
   0xa   :  { %v907_v26 = vld [vmem:[%s1151_s0 + $0x34] ss:$12 sps:$4 sm:$0xff]   ;;  %v912_v30 = vld [vmem:[%s1151_s0 + $0x4c] ss:$12 sps:$4 sm:$0xff]   ;;  %v916_v33 = vld [vmem:[%s1151_s0 + $0x50] ss:$12 sps:$4 sm:$0xff]  }
   0xb   :  { %772 = vmatpush3.bf16.msra.mxu0 %v882_v5  ;;  %871 = vmatpush3.bf16.msra.mxu1 %v882_v5  ;;  %v909_v27 = vld [vmem:[%s1151_s0 + $0x8] ss:$12 sps:$4 sm:$0xff]   ;;  %v911_v29 = vld [vmem:[%s1151_s0 + $0x20] ss:$12 sps:$4 sm:$0xff]   ;;  %v914_v31 = vld [vmem:[%s1151_s0 + $0x38] ss:$12 sps:$4 sm:$0xff]  }
   0xc   :  { %773 = vmatprep.subr.bf16.mxu0 %v883_v6  ;;  %864 = vmatprep.subr.bf16.mxu1 %v883_v6  ;;  %v915_v32 = vld [vmem:[%s1151_s0 + $0x48] ss:$12 sps:$4 sm:$0xff]   ;;  %v917_v34 = vld [vmem:[%s1151_s0 + $0x64] ss:$12 sps:$4 sm:$0xff]   ;;  %v920_v36 = vld [vmem:[%s1151_s0 + $0x60] ss:$12 sps:$4 sm:$0xff]  }
   0xd   :  { %v919_v35 = vld [vmem:[%s1151_s0 + $0x68] ss:$12 sps:$4 sm:$0xff]   ;;  %v921_v37 = vld [vmem:[%s1151_s0 + $0x80] ss:$12 sps:$4 sm:$0xff]   ;;  %v924_v39 = vld [vmem:[%s1151_s0 + $0x98] ss:$12 sps:$4 sm:$0xff]  }
   0xe   :  { %v922_v38 = vld [vmem:[%s1151_s0 + $0x7c] ss:$12 sps:$4 sm:$0xff]   ;;  %v925_v40 = vld [vmem:[%s1151_s0 + $0x78] ss:$12 sps:$4 sm:$0xff]   ;;  %v1100_v62 = vld [vmem:[%s1152_s2] ss:$0 sm:$0xff] }
   0xf   :  { %774 = vmatpush3.bf16.msra.mxu0 %v884_v7  ;;  %872 = vmatpush3.bf16.msra.mxu1 %v884_v7  ;;  %v926_v41 = vld [vmem:[%s1151_s0 + $0xb0] ss:$12 sps:$4 sm:$0xff]  }
  0x10   :  { %775 = vmatprep.subr.bf16.mxu0 %v885_v8  ;;  %865 = vmatprep.subr.bf16.mxu1 %v885_v8 }
  0x13   :  { %776 = vmatpush3.bf16.msra.mxu0 %v886_v9  ;;  %873 = vmatpush3.bf16.msra.mxu1 %v886_v9 }
  0x14   :  { %777 = vmatprep.subr.bf16.mxu0 %v887_v10  ;;  %866 = vmatprep.subr.bf16.mxu1 %v887_v10 }
  0x17   :  { %778 = vmatpush3.bf16.msra.mxu0 %v888_v13  ;;  %874 = vmatpush3.bf16.msra.mxu1 %v888_v13 }
  0x18   :  { %779 = vmatprep.subr.bf16.mxu0 %v889_v14  ;;  %867 = vmatprep.subr.bf16.mxu1 %v889_v14 }
  0x1b   :  { %780 = vmatpush3.bf16.msra.mxu0 %v890_v15  ;;  %875 = vmatpush3.bf16.msra.mxu1 %v890_v15 }
  0x1c   :  { %781 = vmatprep.subr.bf16.mxu0 %v891_v16  ;;  %868 = vmatprep.subr.bf16.mxu1 %v891_v16 }
  0x1f   :  { %782 = vmatpush3.bf16.msra.mxu0 %v892_v17  ;;  %876 = vmatpush3.bf16.msra.mxu1 %v892_v17 }
  0x20   :  { %841 = vmatprep.subr.bf16.mxu1 %v899_v19 }
  0x22   :  { %376 = vmatmul.mubr.bf16.vlgmr.msra.gmra.mxu0 %v893_v18  ;;  %424 = vmatmul.mubr.bf16.vlgmr.msra.gmra.mxu1 %v896_v20 }
  0x23   :  { %842 = vmatpush3.bf16.msra.mxu1 %v899_v19  ;;  %383 = vmatprep.mubr.bf16.mxu0 %v900_v21 }
  0x24   :  { %431 = vmatprep.mubr.bf16.mxu1 %v902_v22  ;;  %843 = vmatprep.subr.bf16.mxu1 %v906_v23 }
  0x27   :  { %844 = vmatpush3.bf16.msra.mxu1 %v906_v23 }
  0x2a   :  { %384 = vmatmul.mubr.bf16.gmra.mxu0 %v904_v24  ;;  %432 = vmatmul.mubr.bf16.gmra.mxu1 %v905_v25 }
  0x2b   :  { %391 = vmatprep.mubr.bf16.mxu0 %v907_v26  ;;  %845 = vmatprep.mubr.msk.bf16.mxu1 %vm318_vm0, %v909_v27 }
  0x32   :  { %392 = vmatmul.mubr.bf16.gmra.mxu0 %v910_v28  ;;  %846 = vmatmul.mubr.msk.bf16.vlgmr.msra.gmra.mxu1 %vm318_vm0, %v911_v29 }
  0x33   :  { %399 = vmatprep.mubr.bf16.mxu0 %v912_v30  ;;  %849 = vmatprep.mubr.msk.bf16.mxu1 %vm318_vm0, %v914_v31 }
  0x3a   :  { %400 = vmatmul.mubr.bf16.gmra.mxu0 %v915_v32  ;;  %850 = vmatmul.mubr.msk.bf16.gmra.mxu1 %vm318_vm0, %v916_v33 }
  0x3b   :  { %407 = vmatprep.mubr.bf16.mxu0 %v917_v34  ;;  %853 = vmatprep.mubr.msk.bf16.mxu1 %vm318_vm0, %v919_v35 }
  0x42   :  { %408 = vmatmul.mubr.bf16.gmra.mxu0 %v920_v36  ;;  %854 = vmatmul.mubr.msk.bf16.gmra.mxu1 %vm318_vm0, %v921_v37 }
  0x43   :  { %415 = vmatprep.mubr.bf16.mxu0 %v922_v38  ;;  %857 = vmatprep.mubr.msk.bf16.mxu1 %vm318_vm0, %v924_v39 }
  0x4a   :  { %416 = vmatmul.mubr.bf16.gmra.mxu0 %v925_v40  ;;  %858 = vmatmul.mubr.msk.bf16.gmra.mxu1 %vm318_vm0, %v926_v41 }
  0xe2   :  { %v783_v42 = vpop.f32.mrf.mxu0  ;;  %v1081_v43 = vpop.f32.mrf.mxu1 }
  0xe4   :  { %v784_v44 = vpop.f32.mrf.mxu0  ;;  %v1083_v45 = vpop.f32.mrf.mxu1 }
  0xe5   :  { %v785_v59 = vadd.f32 %v784_v44, %v783_v42 }
  0xe6   :  { %v786_v46 = vpop.f32.mrf.mxu0  ;;  %v1085_v47 = vpop.f32.mrf.mxu1 }
  0xe7   :  { %v378_v5 = vadd.f32 %v785_v59, %v1100_v62 }
  0xe8   :  { %v787_v48 = vpop.f32.mrf.mxu0  ;;  %v1087_v49 = vpop.f32.mrf.mxu1 }
  0xe9   :  { %v788_v0 = vadd.f32 %v787_v48, %v786_v46 }
  0xea   :  { %v789_v50 = vpop.f32.mrf.mxu0  ;;  %v1089_v51 = vpop.f32.mrf.mxu1 }
  0xeb   :  { %v381_v11 = vadd.f32 %v788_v0, %v1100_v62 }
  0xec   :  { %v790_v52 = vpop.f32.mrf.mxu0  ;;  %v1091_v53 = vpop.f32.mrf.mxu1 }
  0xed   :  { %v791_v56 = vadd.f32 %v790_v52, %v789_v50  ;;  %v827_v59 = vadd.f32 %v1091_v53, %v1089_v51 }
  0xee   :  { %v792_v54 = vpop.f32.mrf.mxu0  ;;  %v1093_v55 = vpop.f32.mrf.mxu1 }
  0xef   :  { %v386_v1 = vadd.f32 %v791_v56, %v1100_v62 }
  0xf0   :  { %v793_v57 = vpop.f32.mrf.mxu0  ;;  %v1095_v58 = vpop.f32.mrf.mxu1 }
  0xf1   :  { %v794_v60 = vadd.f32 %v793_v57, %v792_v54 }
  0xf2   :  { %v795_v61 = vpop.f32.mrf.mxu0  ;;  %v847_v63 = vpop.f32.mrf.mxu1 }
  0xf3   :  { %v483_v4 = vadd.f32 %v847_v63, %v386_v1  ;;  %v389_v6 = vadd.f32 %v794_v60, %v1100_v62 }
  0xf4   :  { %v796_v2 = vpop.f32.mrf.mxu0  ;;  %v474_v3 = vpop.f32.mrf.mxu1 }
  0xf5   :  { %v475_v9 = vadd.f32 %v474_v3, %v378_v5  ;;  %v539_v14 = vmax.f32 %v483_v4, 0.0  ;;  %v797_v15 = vadd.f32 %v796_v2, %v795_v61  ;;  %v830_v2 = vadd.f32 %v1095_v58, %v1093_v55 }
  0xf6   :  { %v798_v7 = vpop.f32.mrf.mxu0  ;;  %v848_v8 = vpop.f32.mrf.mxu1  ;;  %v821_v5 = vadd.f32 %v1083_v45, %v1081_v43 }
  0xf7   :  { %v486_v10 = vadd.f32 %v848_v8, %v389_v6  ;;  %v537_v20 = vmax.f32 %v475_v9, 0.0  ;;  %v394_v28 = vadd.f32 %v797_v15, %v1100_v62  ;;  %v434_v8 = vadd.f32 %v827_v59, %v1100_v62 }
  0xf8   :  { %v799_v12 = vpop.f32.mrf.mxu0  ;;  %v477_v13 = vpop.f32.mrf.mxu1  ;;  %v824_v9 = vadd.f32 %v1087_v49, %v1085_v47  ;;  %v437_v43 = vadd.f32 %v830_v2, %v1100_v62  ;;  %v426_v45 = vadd.f32 %v821_v5, %v1100_v62 }
  0xf9   :  { %v540_v16 = vmax.f32 %v486_v10, 0.0  ;;  %v478_v17 = vadd.f32 %v477_v13, %v381_v11  ;;  %v800_v22 = vadd.f32 %v799_v12, %v798_v7 }
  0xfa   :  { %v801_v18 = vpop.f32.mrf.mxu0  ;;  %v851_v19 = vpop.f32.mrf.mxu1  ;;  %v429_v47 = vadd.f32 %v824_v9, %v1100_v62 }
  0xfb   :  { %v728_v21 = vpack.c.bf16 %v540_v16, %v539_v14  ;;  %v538_v23 = vmax.f32 %v478_v17, 0.0  ;;  %v397_v33 = vadd.f32 %v800_v22, %v1100_v62 }
  0xfc   :  { %v802_v24 = vpop.f32.mrf.mxu0  ;;  %v490_v25 = vpop.f32.mrf.mxu1 }
  0xfd   :  { %760 = vst [vmem:[%s1153_s3 + $0x8] sm:$0xff] %v728_v21   ;;  %v723_v26 = vpack.c.bf16 %v538_v23, %v537_v20  ;;  %v803_v27 = vadd.f32 %v802_v24, %v801_v18  ;;  %v491_v32 = vadd.f32 %v490_v25, %v394_v28 }
  0xfe   :  { %v804_v29 = vpop.f32.mrf.mxu0  ;;  %v852_v30 = vpop.f32.mrf.mxu1 }
  0xff   :  { %724 = vst [vmem:[%s1153_s3] sm:$0xff] %v723_v26   ;;  %v402_v31 = vadd.f32 %v803_v27, %v1100_v62  ;;  %v541_v41 = vmax.f32 %v491_v32, 0.0 }
 0x100   :  { %v805_v34 = vpop.f32.mrf.mxu0  ;;  %v493_v35 = vpop.f32.mrf.mxu1 }
 0x101   :  { %v806_v36 = vadd.f32 %v805_v34, %v804_v29  ;;  %v494_v37 = vadd.f32 %v493_v35, %v397_v33  ;;  %v499_v40 = vadd.f32 %v851_v19, %v402_v31 }
 0x102   :  { %v807_v38 = vpop.f32.mrf.mxu0  ;;  %v855_v39 = vpop.f32.mrf.mxu1 }
 0x103   :  { %v405_v42 = vadd.f32 %v806_v36, %v1100_v62  ;;  %v542_v44 = vmax.f32 %v494_v37, 0.0  ;;  %v543_v60 = vmax.f32 %v499_v40, 0.0 }
 0x104   :  { %v808_v46 = vpop.f32.mrf.mxu0  ;;  %v506_v48 = vpop.f32.mrf.mxu1 }
 0x105   :  { %v502_v50 = vadd.f32 %v852_v30, %v405_v42  ;;  %v733_v52 = vpack.c.bf16 %v542_v44, %v541_v41  ;;  %v809_v54 = vadd.f32 %v808_v46, %v807_v38 }
 0x106   :  { %v810_v56 = vpop.f32.mrf.mxu0  ;;  %v856_v57 = vpop.f32.mrf.mxu1 }
 0x107   :  { %v544_v61 = vmax.f32 %v502_v50, 0.0  ;;  %761 = vst [vmem:[%s1153_s3 + $0x10] sm:$0xff] %v733_v52   ;;  %v410_v63 = vadd.f32 %v809_v54, %v1100_v62 }
 0x108   :  { %v811_v0 = vpop.f32.mrf.mxu0  ;;  %v509_v1 = vpop.f32.mrf.mxu1 }
 0x109   :  { %v738_v3 = vpack.c.bf16 %v544_v61, %v543_v60  ;;  %v812_v4 = vadd.f32 %v811_v0, %v810_v56  ;;  %v507_v53 = vadd.f32 %v506_v48, %v410_v63 }
 0x10a   :  { %v813_v6 = vpop.f32.mrf.mxu0  ;;  %v859_v51 = vpop.f32.mrf.mxu1 }
 0x10b   :  { %762 = vst [vmem:[%s1153_s3 + $0x18] sm:$0xff] %v738_v3   ;;  %v413_v7 = vadd.f32 %v812_v4, %v1100_v62  ;;  %v531_v11 = vadd.f32 %v859_v51, %v434_v8  ;;  %v545_v15 = vmax.f32 %v507_v53, 0.0 }
 0x10c   :  { %v814_v55 = vpop.f32.mrf.mxu0  ;;  %v522_v58 = vpop.f32.mrf.mxu1 }
 0x10d   :  { %v510_v10 = vadd.f32 %v509_v1, %v413_v7  ;;  %v815_v12 = vadd.f32 %v814_v55, %v813_v6  ;;  %v523_v19 = vadd.f32 %v522_v58, %v426_v45  ;;  %v551_v22 = vmax.f32 %v531_v11, 0.0 }
 0x10e   :  { %v816_v13 = vpop.f32.mrf.mxu0  ;;  %v860_v14 = vpop.f32.mrf.mxu1 }
 0x10f   :  { %v546_v16 = vmax.f32 %v510_v10, 0.0  ;;  %v418_v17 = vadd.f32 %v815_v12, %v1100_v62  ;;  %v534_v18 = vadd.f32 %v860_v14, %v437_v43  ;;  %v549_v29 = vmax.f32 %v523_v19, 0.0 }
 0x110   :  { %v817_v20 = vpop.f32.mrf.mxu0  ;;  %v525_v49 = vpop.f32.mrf.mxu1 }
 0x111   :  { %v743_v21 = vpack.c.bf16 %v546_v16, %v545_v15  ;;  %v552_v23 = vmax.f32 %v534_v18, 0.0  ;;  %v818_v24 = vadd.f32 %v817_v20, %v816_v13  ;;  %v526_v25 = vadd.f32 %v525_v49, %v429_v47 }
 0x112   :  { %v515_v26 = vadd.f32 %v855_v39, %v418_v17 }
 0x113   :  { %763 = vst [vmem:[%s1153_s3 + $0x20] sm:$0xff] %v743_v21   ;;  %v758_v27 = vpack.c.bf16 %v552_v23, %v551_v22  ;;  %v421_v28 = vadd.f32 %v818_v24, %v1100_v62  ;;  %v550_v30 = vmax.f32 %v526_v25, 0.0 }
 0x114   :  { %v547_v33 = vmax.f32 %v515_v26, 0.0 }
 0x115   :  { %766 = vst [vmem:[%s1153_s3 + $0x38] sm:$0xff] %v758_v27   ;;  %v518_v31 = vadd.f32 %v856_v57, %v421_v28  ;;  %v753_v32 = vpack.c.bf16 %v550_v30, %v549_v29 }
 0x117   :  { %v548_v34 = vmax.f32 %v518_v31, 0.0  ;;  %765 = vst [vmem:[%s1153_s3 + $0x30] sm:$0xff] %v753_v32  }
 0x119   :  { %v748_v35 = vpack.c.bf16 %v548_v34, %v547_v33 }
 0x11b   :  { %764 = vst [vmem:[%s1153_s3 + $0x28] sm:$0xff] %v748_v35  }

// kernel: forward.8
= control target key start
LH: loop header
LB: loop body
LE: loop exit
PB: predicated region body
PF: predicated region fallthrough
CT: control target
= control target key end

     0   :  { %vm355_vm0 = vcmask 523264   ;;  %s2150_s1 = inlined_call_operand.vmem [shape: bf16[576,128], index: 1, kind: input, shape index: {}]   ;;  %s2151_s0 = inlined_call_operand.vmem [shape: bf16[4,18,576], index: 0, kind: input, shape index: {}]   ;;  %s2152_s2 = inlined_call_operand.vmem [shape: f32[1,128], index: 2, kind: input, shape index: {}]   ;;  %s2153_s3 = inlined_call_operand.vmem [shape: bf16[18,128], index: 3, kind: output, shape index: {}]  }
   0x1   :  { %v1679_v0 = vld [vmem:[%s2150_s1 + $0x78] sm:$0xff]   ;;  %v1702_v4 = vld [vmem:[%s2150_s1 + $0x70] sm:$0xff]   ;;  %v1726_v8 = vld [vmem:[%s2150_s1 + $0x68] sm:$0xff]  }
   0x2   :  { %v1684_v1 = vld [vmem:[%s2150_s1 + $0xf8] sm:$0xff]   ;;  %1276 = vmatprep.subr.bf16.mxu0 %v1679_v0  ;;  %v1708_v5 = vld [vmem:[%s2150_s1 + $0xf0] sm:$0xff]   ;;  %v1732_v9 = vld [vmem:[%s2150_s1 + $0xe8] sm:$0xff]  }
   0x3   :  { %v1690_v2 = vld [vmem:[%s2150_s1 + $0x38] sm:$0xff]   ;;  %1304 = vmatprep.subr.bf16.mxu1 %v1684_v1  ;;  %v1714_v6 = vld [vmem:[%s2150_s1 + $0x30] sm:$0xff]   ;;  %v1738_v10 = vld [vmem:[%s2150_s1 + $0x28] sm:$0xff]  }
   0x4   :  { %v1696_v3 = vld [vmem:[%s2150_s1 + $0xb8] sm:$0xff]   ;;  %1277 = vmatpush3.bf16.msra.mxu0 %v1690_v2  ;;  %v1720_v7 = vld [vmem:[%s2150_s1 + $0xb0] sm:$0xff]   ;;  %v1744_v11 = vld [vmem:[%s2150_s1 + $0xa8] sm:$0xff]  }
   0x5   :  { %1305 = vmatpush3.bf16.msra.mxu1 %v1696_v3  ;;  %1278 = vmatprep.subr.bf16.mxu0 %v1702_v4  ;;  %v1750_v12 = vld [vmem:[%s2150_s1 + $0x60] sm:$0xff]   ;;  %v1774_v16 = vld [vmem:[%s2150_s1 + $0x58] sm:$0xff]   ;;  %v1798_v20 = vld [vmem:[%s2150_s1 + $0x50] sm:$0xff]  }
   0x6   :  { %1306 = vmatprep.subr.bf16.mxu1 %v1708_v5  ;;  %v1756_v13 = vld [vmem:[%s2150_s1 + $0xe0] sm:$0xff]   ;;  %v1780_v17 = vld [vmem:[%s2150_s1 + $0xd8] sm:$0xff]   ;;  %v1804_v21 = vld [vmem:[%s2150_s1 + $0xd0] sm:$0xff]  }
   0x7   :  { %v1762_v14 = vld [vmem:[%s2150_s1 + $0x20] sm:$0xff]   ;;  %v1786_v18 = vld [vmem:[%s2150_s1 + $0x18] sm:$0xff]   ;;  %v1810_v22 = vld [vmem:[%s2150_s1 + $0x10] sm:$0xff]  }
   0x8   :  { %1279 = vmatpush3.bf16.msra.mxu0 %v1714_v6  ;;  %v1768_v15 = vld [vmem:[%s2150_s1 + $0xa0] sm:$0xff]   ;;  %v1792_v19 = vld [vmem:[%s2150_s1 + $0x98] sm:$0xff]   ;;  %v1816_v23 = vld [vmem:[%s2150_s1 + $0x90] sm:$0xff]  }
   0x9   :  { %1307 = vmatpush3.bf16.msra.mxu1 %v1720_v7  ;;  %1280 = vmatprep.subr.bf16.mxu0 %v1726_v8  ;;  %v1822_v24 = vld [vmem:[%s2150_s1 + $0x48] sm:$0xff]   ;;  %v1846_v28 = vld [vmem:[%s2150_s1 + $0x40] sm:$0xff]   ;;  %v1884_v36 = vld [vmem:[%s2150_s1 + $0x118] sm:$0xff]  }
   0xa   :  { %1308 = vmatprep.subr.bf16.mxu1 %v1732_v9  ;;  %v1828_v25 = vld [vmem:[%s2150_s1 + $0xc8] sm:$0xff]   ;;  %v1852_v29 = vld [vmem:[%s2150_s1 + $0xc0] sm:$0xff]   ;;  %v1889_v37 = vld [vmem:[%s2150_s1 + $0x110] sm:$0xff]  }
   0xb   :  { %v1834_v26 = vld [vmem:[%s2150_s1 + $0x8] sm:$0xff]   ;;  %v1858_v30 = vld [vmem:[%s2150_s1] sm:$0xff]   ;;  %v95_v40 = vld [vmem:[%s2151_s0 + $0x30] sm:$0x11] }
   0xc   :  { %1281 = vmatpush3.bf16.msra.mxu0 %v1738_v10  ;;  %v1840_v27 = vld [vmem:[%s2150_s1 + $0x88] sm:$0xff]   ;;  %v1864_v31 = vld [vmem:[%s2150_s1 + $0x80] sm:$0xff]   ;;  %v1161_v41 = vcombine.high %v95_v40, %v95_v40  ;;  %v1160_v44 = vcombine.low %v95_v40, %v95_v40  ;;  %v1619_v48 = vld [vmem:[%s2151_s0 + $0x38] ss:$0 sps:$4 sm:$0x11]  }
   0xd   :  { %1309 = vmatpush3.bf16.msra.mxu1 %v1744_v11  ;;  %1282 = vmatprep.subr.bf16.mxu0 %v1750_v12  ;;  %v1604_v32 = vld [vmem:[%s2151_s0] ss:$20 sps:$4 sm:$0xff]   ;;  %v1606_v33 = vld [vmem:[%s2151_s0 + $0x4] ss:$20 sps:$4 sm:$0xff]   ;;  %v1607_v34 = vld [vmem:[%s2151_s0 + $0x8] ss:$20 sps:$4 sm:$0xff]  }
   0xe   :  { %1310 = vmatprep.subr.bf16.mxu1 %v1756_v13  ;;  %v1609_v35 = vld [vmem:[%s2151_s0 + $0xc] ss:$20 sps:$4 sm:$0xff]   ;;  %394 = vmatprep.mubr.bf16.mxu0 %v1606_v33  ;;  %v1618_v45 = vld [vmem:[%s2151_s0 + $0x10] ss:$20 sps:$4 sm:$0xff]   ;;  %v1627_v49 = vld [vmem:[%s2151_s0 + $0x48] ss:$20 sps:$4 sm:$0xff]  }
   0xf   :  { %442 = vmatprep.mubr.bf16.mxu1 %v1609_v35  ;;  %v94_v38 = vld [vmem:[%s2151_s0 + $0x28] sm:$0x11]  ;;  %v1917_v46 = vld [vmem:[%s2150_s1 + $0x100] sm:$0xff]   ;;  %v1620_v50 = vld [vmem:[%s2151_s0 + $0x3c] ss:$20 sps:$4 sm:$0xff]  }
  0x10   :  { %1283 = vmatpush3.bf16.msra.mxu0 %v1762_v14  ;;  %v1159_v39 = vcombine.high %v94_v38, %v94_v38  ;;  %v1905_v42 = vld [vmem:[%s2150_s1 + $0x108] sm:$0xff]   ;;  %v1158_v43 = vcombine.low %v94_v38, %v94_v38  ;;  %v1622_v47 = vld [vmem:[%s2151_s0 + $0x40] ss:$20 sps:$4 sm:$0xff]   ;;  %v1625_v55 = vld [vmem:[%s2151_s0 + $0x44] ss:$20 sps:$4 sm:$0xff]  }
  0x11   :  { %1311 = vmatpush3.bf16.msra.mxu1 %v1768_v15  ;;  %1284 = vmatprep.subr.bf16.mxu0 %v1774_v16  ;;  %v1207_v51 = vld [vmem:[%s2151_s0 + $0x64] sm:$0x11]  ;;  %v1628_v54 = vld [vmem:[%s2151_s0 + $0x4c] ss:$20 sps:$4 sm:$0xff]   ;;  %v1634_v61 = vld [vmem:[%s2151_s0 + $0x7c] ss:$20 sps:$4 sm:$0xff]  }
  0x12   :  { %1312 = vmatprep.subr.bf16.mxu1 %v1780_v17  ;;  %v1216_v52 = vcombine.high %v1207_v51, %v1207_v51  ;;  %v1215_v53 = vcombine.low %v1207_v51, %v1207_v51  ;;  %v1629_v56 = vld [vmem:[%s2151_s0 + $0x74] ss:$0 sps:$4 sm:$0x11]   ;;  %v1208_v57 = vld [vmem:[%s2151_s0 + $0x6c] sm:$0x11] }
  0x13   :  { %v1218_v58 = vcombine.high %v1208_v57, %v1208_v57  ;;  %v1637_v59 = vld [vmem:[%s2151_s0 + $0x84] ss:$20 sps:$4 sm:$0xff]   ;;  %v1217_v60 = vcombine.low %v1208_v57, %v1208_v57  ;;  %v1635_v63 = vld [vmem:[%s2151_s0 + $0x80] ss:$20 sps:$4 sm:$0xff]   ;;  %v1229_v33 = vld [vmem:[%s2151_s0 + $0xa8] sm:$0x11] }
  0x14   :  { %1285 = vmatpush3.bf16.msra.mxu0 %v1786_v18  ;;  %v1632_v62 = vld [vmem:[%s2151_s0 + $0x78] ss:$20 sps:$4 sm:$0xff]   ;;  %v1239_v35 = vcombine.high %v1229_v33, %v1229_v33 }
  0x15   :  { %1313 = vmatpush3.bf16.msra.mxu1 %v1792_v19  ;;  %1286 = vmatprep.subr.bf16.mxu0 %v1798_v20 }
  0x16   :  { %1314 = vmatprep.subr.bf16.mxu1 %v1804_v21 }
  0x18   :  { %1287 = vmatpush3.bf16.msra.mxu0 %v1810_v22 }
  0x19   :  { %1315 = vmatpush3.bf16.msra.mxu1 %v1816_v23  ;;  %1288 = vmatprep.subr.bf16.mxu0 %v1822_v24 }
  0x1a   :  { %1316 = vmatprep.subr.bf16.mxu1 %v1828_v25 }
  0x1c   :  { %1289 = vmatpush3.bf16.msra.mxu0 %v1834_v26 }
  0x1d   :  { %1317 = vmatpush3.bf16.msra.mxu1 %v1840_v27  ;;  %1290 = vmatprep.subr.bf16.mxu0 %v1846_v28 }
  0x1e   :  { %1318 = vmatprep.subr.bf16.mxu1 %v1852_v29 }
  0x20   :  { %1291 = vmatpush3.bf16.msra.mxu0 %v1858_v30 }
  0x21   :  { %1319 = vmatpush3.bf16.msra.mxu1 %v1864_v31  ;;  %1524 = vmatprep.subr.bf16.mxu0 %v1884_v36 }
  0x22   :  { %1338 = vmatprep.subr.bf16.mxu1 %v1679_v0 }
  0x23   :  { %395 = vmatmul.mubr.bf16.vlgmr.msra.gmra.mxu0 %v1604_v32  ;;  %v1228_v32 = vld [vmem:[%s2151_s0 + $0xa0] sm:$0x11] }
  0x24   :  { %443 = vmatmul.mubr.bf16.vlgmr.msra.gmra.mxu1 %v1607_v34  ;;  %1525 = vmatpush3.bf16.msra.mxu0 %v1884_v36  ;;  %v1237_v34 = vcombine.high %v1228_v32, %v1228_v32  ;;  %v1236_v38 = vcombine.low %v1228_v32, %v1228_v32 }
  0x25   :  { %1339 = vmatpush3.bf16.msra.mxu1 %v1690_v2  ;;  %1526 = vmatprep.subr.bf16.mxu0 %v1889_v37 }
  0x26   :  { %1340 = vmatprep.subr.bf16.mxu1 %v1702_v4  ;;  %402 = vmatprep.mubr.bf16.mxu0 %v1159_v39  ;;  %v1238_v39 = vcombine.low %v1229_v33, %v1229_v33 }
  0x27   :  { %450 = vmatprep.mubr.bf16.mxu1 %v1161_v41 }
  0x28   :  { %1527 = vmatpush3.bf16.msra.mxu0 %v1889_v37 }
  0x29   :  { %1341 = vmatpush3.bf16.msra.mxu1 %v1714_v6  ;;  %1528 = vmatprep.subr.bf16.mxu0 %v1905_v42 }
  0x2a   :  { %1342 = vmatprep.subr.bf16.mxu1 %v1726_v8 }
  0x2b   :  { %403 = vmatmul.mubr.bf16.gmra.mxu0 %v1158_v43 }
  0x2c   :  { %451 = vmatmul.mubr.bf16.gmra.mxu1 %v1160_v44  ;;  %1532 = vmatprep.mubr.msk.bf16.mxu0 %vm355_vm0, %v1618_v45 }
  0x2d   :  { %1529 = vmatpush3.bf16.msra.mxu0 %v1905_v42  ;;  %1343 = vmatpush3.bf16.msra.mxu1 %v1738_v10 }
  0x2e   :  { %1530 = vmatprep.subr.bf16.mxu0 %v1917_v46  ;;  %1344 = vmatprep.subr.bf16.mxu1 %v1750_v12 }
  0x2f   :  { %596 = vmatprep.mubr.bf16.mxu1 %v1622_v47 }
  0x31   :  { %1531 = vmatpush3.bf16.msra.mxu0 %v1917_v46  ;;  %1345 = vmatpush3.bf16.msra.mxu1 %v1762_v14 }
  0x32   :  { %1346 = vmatprep.subr.bf16.mxu1 %v1774_v16  ;;  %1366 = vmatprep.subr.bf16.mxu0 %v1684_v1 }
  0x34   :  { %1533 = vmatmul.mubr.msk.bf16.vlgmr.msra.gmra.mxu0 %vm355_vm0, %v1619_v48 }
  0x35   :  { %1347 = vmatpush3.bf16.msra.mxu1 %v1786_v18  ;;  %1367 = vmatpush3.bf16.msra.mxu0 %v1696_v3 }
  0x36   :  { %1348 = vmatprep.subr.bf16.mxu1 %v1798_v20  ;;  %1368 = vmatprep.subr.bf16.mxu0 %v1708_v5 }
  0x37   :  { %644 = vmatprep.mubr.bf16.mxu0 %v1627_v49 }
  0x39   :  { %1349 = vmatpush3.bf16.msra.mxu1 %v1810_v22  ;;  %1369 = vmatpush3.bf16.msra.mxu0 %v1720_v7 }
  0x3a   :  { %1350 = vmatprep.subr.bf16.mxu1 %v1822_v24  ;;  %1370 = vmatprep.subr.bf16.mxu0 %v1732_v9 }
  0x3d   :  { %1351 = vmatpush3.bf16.msra.mxu1 %v1834_v26  ;;  %1371 = vmatpush3.bf16.msra.mxu0 %v1744_v11 }
  0x3e   :  { %1352 = vmatprep.subr.bf16.mxu1 %v1846_v28  ;;  %1372 = vmatprep.subr.bf16.mxu0 %v1756_v13 }
  0x41   :  { %1353 = vmatpush3.bf16.msra.mxu1 %v1858_v30  ;;  %1373 = vmatpush3.bf16.msra.mxu0 %v1768_v15 }
  0x42   :  { %1374 = vmatprep.subr.bf16.mxu0 %v1780_v17  ;;  %1536 = vmatprep.subr.bf16.mxu1 %v1884_v36 }
  0x44   :  { %597 = vmatmul.mubr.bf16.vlgmr.msra.gmra.mxu1 %v1620_v50 }
  0x45   :  { %1375 = vmatpush3.bf16.msra.mxu0 %v1792_v19  ;;  %1537 = vmatpush3.bf16.msra.mxu1 %v1884_v36 }
  0x46   :  { %1376 = vmatprep.subr.bf16.mxu0 %v1804_v21  ;;  %1538 = vmatprep.subr.bf16.mxu1 %v1889_v37 }
  0x47   :  { %604 = vmatprep.mubr.bf16.mxu1 %v1216_v52 }
  0x49   :  { %1377 = vmatpush3.bf16.msra.mxu0 %v1816_v23  ;;  %1539 = vmatpush3.bf16.msra.mxu1 %v1889_v37 }
  0x4a   :  { %1378 = vmatprep.subr.bf16.mxu0 %v1828_v25  ;;  %1540 = vmatprep.subr.bf16.mxu1 %v1905_v42 }
  0x4c   :  { %605 = vmatmul.mubr.bf16.gmra.mxu1 %v1215_v53 }
  0x4d   :  { %1379 = vmatpush3.bf16.msra.mxu0 %v1840_v27  ;;  %1541 = vmatpush3.bf16.msra.mxu1 %v1905_v42 }
  0x4e   :  { %1380 = vmatprep.subr.bf16.mxu0 %v1852_v29  ;;  %1542 = vmatprep.subr.bf16.mxu1 %v1917_v46 }
  0x4f   :  { %1544 = vmatprep.mubr.msk.bf16.mxu1 %vm355_vm0, %v1628_v54 }
  0x51   :  { %1381 = vmatpush3.bf16.msra.mxu0 %v1864_v31  ;;  %1543 = vmatpush3.bf16.msra.mxu1 %v1917_v46 }
  0x52   :  { %1400 = vmatprep.subr.bf16.mxu0 %v1679_v0  ;;  %1428 = vmatprep.subr.bf16.mxu1 %v1684_v1 }
  0x54   :  { %645 = vmatmul.mubr.bf16.vlgmr.msra.gmra.mxu0 %v1625_v55  ;;  %1545 = vmatmul.mubr.msk.bf16.vlgmr.msra.gmra.mxu1 %vm355_vm0, %v1629_v56 }
  0x55   :  { %1401 = vmatpush3.bf16.msra.mxu0 %v1690_v2  ;;  %1429 = vmatpush3.bf16.msra.mxu1 %v1696_v3 }
  0x56   :  { %1402 = vmatprep.subr.bf16.mxu0 %v1702_v4  ;;  %1430 = vmatprep.subr.bf16.mxu1 %v1708_v5 }
  0x57   :  { %652 = vmatprep.mubr.bf16.mxu0 %v1218_v58  ;;  %849 = vmatprep.mubr.bf16.mxu1 %v1637_v59 }
  0x59   :  { %1403 = vmatpush3.bf16.msra.mxu0 %v1714_v6  ;;  %1431 = vmatpush3.bf16.msra.mxu1 %v1720_v7 }
  0x5a   :  { %1404 = vmatprep.subr.bf16.mxu0 %v1726_v8  ;;  %1432 = vmatprep.subr.bf16.mxu1 %v1732_v9 }
  0x5c   :  { %653 = vmatmul.mubr.bf16.gmra.mxu0 %v1217_v60 }
  0x5d   :  { %1405 = vmatpush3.bf16.msra.mxu0 %v1738_v10  ;;  %1433 = vmatpush3.bf16.msra.mxu1 %v1744_v11 }
  0x5e   :  { %1406 = vmatprep.subr.bf16.mxu0 %v1750_v12  ;;  %1434 = vmatprep.subr.bf16.mxu1 %v1756_v13 }
  0x5f   :  { %801 = vmatprep.mubr.bf16.mxu0 %v1634_v61 }
  0x61   :  { %1407 = vmatpush3.bf16.msra.mxu0 %v1762_v14  ;;  %1435 = vmatpush3.bf16.msra.mxu1 %v1768_v15 }
  0x62   :  { %1408 = vmatprep.subr.bf16.mxu0 %v1774_v16  ;;  %1436 = vmatprep.subr.bf16.mxu1 %v1780_v17 }
  0x65   :  { %1409 = vmatpush3.bf16.msra.mxu0 %v1786_v18  ;;  %1437 = vmatpush3.bf16.msra.mxu1 %v1792_v19 }
  0x66   :  { %1410 = vmatprep.subr.bf16.mxu0 %v1798_v20  ;;  %1438 = vmatprep.subr.bf16.mxu1 %v1804_v21 }
  0x69   :  { %1411 = vmatpush3.bf16.msra.mxu0 %v1810_v22  ;;  %1439 = vmatpush3.bf16.msra.mxu1 %v1816_v23 }
  0x6a   :  { %1412 = vmatprep.subr.bf16.mxu0 %v1822_v24  ;;  %1440 = vmatprep.subr.bf16.mxu1 %v1828_v25 }
  0x6d   :  { %1413 = vmatpush3.bf16.msra.mxu0 %v1834_v26  ;;  %1441 = vmatpush3.bf16.msra.mxu1 %v1840_v27 }
  0x6e   :  { %1414 = vmatprep.subr.bf16.mxu0 %v1846_v28  ;;  %1442 = vmatprep.subr.bf16.mxu1 %v1852_v29 }
  0x71   :  { %1415 = vmatpush3.bf16.msra.mxu0 %v1858_v30  ;;  %1443 = vmatpush3.bf16.msra.mxu1 %v1864_v31 }
  0x72   :  { %1548 = vmatprep.subr.bf16.mxu0 %v1884_v36  ;;  %1462 = vmatprep.subr.bf16.mxu1 %v1679_v0  ;;  %v1642_v0 = vld [vmem:[%s2151_s0 + $0x88] ss:$20 sps:$4 sm:$0xff]  }
  0x74   :  { %802 = vmatmul.mubr.bf16.vlgmr.msra.gmra.mxu0 %v1632_v62  ;;  %850 = vmatmul.mubr.bf16.vlgmr.msra.gmra.mxu1 %v1635_v63 }
  0x75   :  { %1549 = vmatpush3.bf16.msra.mxu0 %v1884_v36  ;;  %1463 = vmatpush3.bf16.msra.mxu1 %v1690_v2  ;;  %v1646_v2 = vld [vmem:[%s2151_s0 + $0xb8] ss:$20 sps:$4 sm:$0xff]  }
  0x76   :  { %1550 = vmatprep.subr.bf16.mxu0 %v1889_v37  ;;  %1464 = vmatprep.subr.bf16.mxu1 %v1702_v4  ;;  %v1643_v4 = vld [vmem:[%s2151_s0 + $0xb0] ss:$0 sps:$4 sm:$0x11]  }
  0x77   :  { %809 = vmatprep.mubr.bf16.mxu0 %v1237_v34  ;;  %857 = vmatprep.mubr.bf16.mxu1 %v1239_v35 }
  0x79   :  { %1551 = vmatpush3.bf16.msra.mxu0 %v1889_v37  ;;  %1465 = vmatpush3.bf16.msra.mxu1 %v1714_v6  ;;  %v1651_v6 = vld [vmem:[%s2151_s0 + $0xc0] ss:$20 sps:$4 sm:$0xff]  }
  0x7a   :  { %1552 = vmatprep.subr.bf16.mxu0 %v1905_v42  ;;  %1466 = vmatprep.subr.bf16.mxu1 %v1726_v8  ;;  %v1652_v8 = vld [vmem:[%s2151_s0 + $0xc4] ss:$20 sps:$4 sm:$0xff]  }
  0x7c   :  { %810 = vmatmul.mubr.bf16.gmra.mxu0 %v1236_v38  ;;  %858 = vmatmul.mubr.bf16.gmra.mxu1 %v1238_v39 }
  0x7d   :  { %1553 = vmatpush3.bf16.msra.mxu0 %v1905_v42  ;;  %1467 = vmatpush3.bf16.msra.mxu1 %v1738_v10  ;;  %v1649_v10 = vld [vmem:[%s2151_s0 + $0xbc] ss:$20 sps:$4 sm:$0xff]  }
  0x7e   :  { %1554 = vmatprep.subr.bf16.mxu0 %v1917_v46  ;;  %1468 = vmatprep.subr.bf16.mxu1 %v1750_v12 }
  0x7f   :  { %1556 = vmatprep.mubr.msk.bf16.mxu0 %vm355_vm0, %v1642_v0  ;;  %1006 = vmatprep.mubr.bf16.mxu1 %v1646_v2 }
  0x81   :  { %1555 = vmatpush3.bf16.msra.mxu0 %v1917_v46  ;;  %1469 = vmatpush3.bf16.msra.mxu1 %v1762_v14 }
  0x82   :  { %1490 = vmatprep.subr.bf16.mxu0 %v1684_v1  ;;  %1470 = vmatprep.subr.bf16.mxu1 %v1774_v16  ;;  %v1644_v1 = vld [vmem:[%s2151_s0 + $0xb4] ss:$20 sps:$4 sm:$0xff]  }
  0x84   :  { %1557 = vmatmul.mubr.msk.bf16.vlgmr.msra.gmra.mxu0 %vm355_vm0, %v1643_v4 }
  0x85   :  { %1491 = vmatpush3.bf16.msra.mxu0 %v1696_v3  ;;  %1471 = vmatpush3.bf16.msra.mxu1 %v1786_v18  ;;  %v1249_v3 = vld [vmem:[%s2151_s0 + $0xdc] sm:$0x11] }
  0x86   :  { %1492 = vmatprep.subr.bf16.mxu0 %v1708_v5  ;;  %1472 = vmatprep.subr.bf16.mxu1 %v1798_v20  ;;  %v1258_v5 = vcombine.high %v1249_v3, %v1249_v3 }
  0x87   :  { %1054 = vmatprep.mubr.bf16.mxu0 %v1651_v6 }
  0x89   :  { %1493 = vmatpush3.bf16.msra.mxu0 %v1720_v7  ;;  %1473 = vmatpush3.bf16.msra.mxu1 %v1810_v22  ;;  %v1257_v7 = vcombine.low %v1249_v3, %v1249_v3 }
  0x8a   :  { %1494 = vmatprep.subr.bf16.mxu0 %v1732_v9  ;;  %1474 = vmatprep.subr.bf16.mxu1 %v1822_v24  ;;  %v1250_v9 = vld [vmem:[%s2151_s0 + $0xe4] sm:$0x11] }
  0x8b   :  { %v1260_v12 = vcombine.high %v1250_v9, %v1250_v9 }
  0x8d   :  { %1495 = vmatpush3.bf16.msra.mxu0 %v1744_v11  ;;  %1475 = vmatpush3.bf16.msra.mxu1 %v1834_v26  ;;  %v1653_v11 = vld [vmem:[%s2151_s0 + $0xec] ss:$0 sps:$4 sm:$0x11]  }
  0x8e   :  { %1496 = vmatprep.subr.bf16.mxu0 %v1756_v13  ;;  %1476 = vmatprep.subr.bf16.mxu1 %v1846_v28  ;;  %v1259_v13 = vcombine.low %v1250_v9, %v1250_v9 }
  0x91   :  { %1497 = vmatpush3.bf16.msra.mxu0 %v1768_v15  ;;  %1477 = vmatpush3.bf16.msra.mxu1 %v1858_v30 }
  0x92   :  { %1498 = vmatprep.subr.bf16.mxu0 %v1780_v17  ;;  %1560 = vmatprep.subr.bf16.mxu1 %v1884_v36 }
  0x94   :  { %1007 = vmatmul.mubr.bf16.vlgmr.msra.gmra.mxu1 %v1644_v1 }
  0x95   :  { %1499 = vmatpush3.bf16.msra.mxu0 %v1792_v19  ;;  %1561 = vmatpush3.bf16.msra.mxu1 %v1884_v36 }
  0x96   :  { %1500 = vmatprep.subr.bf16.mxu0 %v1804_v21  ;;  %1562 = vmatprep.subr.bf16.mxu1 %v1889_v37 }
  0x97   :  { %1014 = vmatprep.mubr.bf16.mxu1 %v1258_v5 }
  0x99   :  { %1501 = vmatpush3.bf16.msra.mxu0 %v1816_v23  ;;  %1563 = vmatpush3.bf16.msra.mxu1 %v1889_v37 }
  0x9a   :  { %1502 = vmatprep.subr.bf16.mxu0 %v1828_v25  ;;  %1564 = vmatprep.subr.bf16.mxu1 %v1905_v42 }
  0x9c   :  { %1015 = vmatmul.mubr.bf16.gmra.mxu1 %v1257_v7 }
  0x9d   :  { %1503 = vmatpush3.bf16.msra.mxu0 %v1840_v27  ;;  %1565 = vmatpush3.bf16.msra.mxu1 %v1905_v42 }
  0x9e   :  { %1504 = vmatprep.subr.bf16.mxu0 %v1852_v29  ;;  %1566 = vmatprep.subr.bf16.mxu1 %v1917_v46 }
  0x9f   :  { %1568 = vmatprep.mubr.msk.bf16.mxu1 %vm355_vm0, %v1652_v8 }
  0xa1   :  { %1505 = vmatpush3.bf16.msra.mxu0 %v1864_v31  ;;  %1567 = vmatpush3.bf16.msra.mxu1 %v1917_v46 }
  0xa4   :  { %1055 = vmatmul.mubr.bf16.vlgmr.msra.gmra.mxu0 %v1649_v10  ;;  %1569 = vmatmul.mubr.msk.bf16.vlgmr.msra.gmra.mxu1 %vm355_vm0, %v1653_v11 }
  0xa5   :  { %1062 = vmatprep.mubr.bf16.mxu0 %v1260_v12 }
  0xac   :  { %1063 = vmatmul.mubr.bf16.gmra.mxu0 %v1259_v13 }
  0xe3   :  { %v1292_v14 = vpop.f32.mrf.mxu0 }
  0xe4   :  { %v1320_v15 = vpop.f32.mrf.mxu1 }
  0xe5   :  { %v1293_v16 = vpop.f32.mrf.mxu0 }
  0xe6   :  { %v1294_v17 = vadd.f32 %v1293_v16, %v1292_v14  ;;  %v1321_v18 = vpop.f32.mrf.mxu1 }
  0xe7   :  { %v1322_v19 = vadd.f32 %v1321_v18, %v1320_v15  ;;  %v1295_v20 = vpop.f32.mrf.mxu0 }
  0xe8   :  { %v1323_v21 = vpop.f32.mrf.mxu1 }
  0xe9   :  { %v1296_v22 = vpop.f32.mrf.mxu0  ;;  %v445_v23 = vadd.f32 %v1322_v19, %v1294_v17 }
  0xea   :  { %v1297_v24 = vadd.f32 %v1296_v22, %v1295_v20  ;;  %v1324_v25 = vpop.f32.mrf.mxu1 }
  0xeb   :  { %v1325_v26 = vadd.f32 %v1324_v25, %v1323_v21  ;;  %v1298_v27 = vpop.f32.mrf.mxu0 }
  0xec   :  { %v1326_v28 = vpop.f32.mrf.mxu1 }
  0xed   :  { %v1299_v29 = vpop.f32.mrf.mxu0  ;;  %v448_v30 = vadd.f32 %v1325_v26, %v1297_v24 }
  0xee   :  { %v1300_v31 = vadd.f32 %v1299_v29, %v1298_v27  ;;  %v1327_v36 = vpop.f32.mrf.mxu1 }
  0xef   :  { %v1328_v37 = vadd.f32 %v1327_v36, %v1326_v28  ;;  %v1301_v40 = vpop.f32.mrf.mxu0 }
  0xf0   :  { %v1329_v41 = vpop.f32.mrf.mxu1 }
  0xf1   :  { %v1302_v42 = vpop.f32.mrf.mxu0  ;;  %v453_v43 = vadd.f32 %v1328_v37, %v1300_v31 }
  0xf2   :  { %v1330_v44 = vpop.f32.mrf.mxu1 }
  0xf4   :  { %v1534_v45 = vpop.f32.mrf.mxu0 }
  0xf5   :  { %v2120_v46 = vadd.f32 %v1534_v45, %v453_v43 }
  0xf6   :  { %v492_v47 = vpop.f32.mrf.mxu0 }
  0xf7   :  { %v2122_v48 = vadd.f32 %v492_v47, %v445_v23 }
  0xf8   :  { %v1535_v49 = vpop.f32.mrf.mxu0 }
  0xfa   :  { %v495_v50 = vpop.f32.mrf.mxu0 }
  0xfb   :  { %v2124_v51 = vadd.f32 %v495_v50, %v448_v30 }
 0x104   :  { %v1354_v52 = vpop.f32.mrf.mxu1 }
 0x106   :  { %v1355_v53 = vpop.f32.mrf.mxu1 }
 0x107   :  { %v1356_v54 = vadd.f32 %v1355_v53, %v1354_v52 }
 0x108   :  { %v1357_v55 = vpop.f32.mrf.mxu1 }
 0x10a   :  { %v1358_v56 = vpop.f32.mrf.mxu1 }
 0x10b   :  { %v1359_v57 = vadd.f32 %v1358_v56, %v1357_v55 }
 0x10c   :  { %v1360_v58 = vpop.f32.mrf.mxu1 }
 0x10e   :  { %v1361_v59 = vpop.f32.mrf.mxu1 }
 0x10f   :  { %v1362_v60 = vadd.f32 %v1361_v59, %v1360_v58 }
 0x110   :  { %v1363_v61 = vpop.f32.mrf.mxu1 }
 0x112   :  { %v1364_v62 = vpop.f32.mrf.mxu1 }
 0x114   :  { %v1382_v63 = vpop.f32.mrf.mxu0  ;;  %v1546_v32 = vpop.f32.mrf.mxu1 }
 0x116   :  { %v1383_v33 = vpop.f32.mrf.mxu0  ;;  %v694_v34 = vpop.f32.mrf.mxu1 }
 0x117   :  { %v1384_v35 = vadd.f32 %v1383_v33, %v1382_v63 }
 0x118   :  { %v1385_v38 = vpop.f32.mrf.mxu0  ;;  %v1547_v39 = vpop.f32.mrf.mxu1 }
 0x119   :  { %v647_v0 = vadd.f32 %v1384_v35, %v1356_v54 }
 0x11a   :  { %v1386_v2 = vpop.f32.mrf.mxu0  ;;  %v697_v3 = vpop.f32.mrf.mxu1 }
 0x11b   :  { %v695_v4 = vadd.f32 %v694_v34, %v647_v0  ;;  %v1387_v6 = vadd.f32 %v1386_v2, %v1385_v38 }
 0x11c   :  { %v1388_v1 = vpop.f32.mrf.mxu0 }
 0x11d   :  { %v708_v5 = vmax.f32 %v2122_v48, %v695_v4  ;;  %v650_v7 = vadd.f32 %v1387_v6, %v1359_v57 }
 0x11e   :  { %v1389_v8 = vpop.f32.mrf.mxu0 }
 0x11f   :  { %v2127_v9 = vadd.f32 %v697_v3, %v650_v7  ;;  %v1390_v10 = vadd.f32 %v1389_v8, %v1388_v1 }
 0x120   :  { %v1391_v11 = vpop.f32.mrf.mxu0 }
 0x121   :  { %v709_v12 = vmax.f32 %v2124_v51, %v2127_v9  ;;  %v655_v13 = vadd.f32 %v1390_v10, %v1362_v60 }
 0x122   :  { %v1392_v14 = vpop.f32.mrf.mxu0 }
 0x123   :  { %v2131_v15 = vadd.f32 %v1546_v32, %v655_v13 }
 0x125   :  { %v710_v16 = vmax.f32 %v2120_v46, %v2131_v15 }
 0x134   :  { %v1416_v17 = vpop.f32.mrf.mxu0  ;;  %v1444_v18 = vpop.f32.mrf.mxu1 }
 0x136   :  { %v1417_v19 = vpop.f32.mrf.mxu0  ;;  %v1445_v20 = vpop.f32.mrf.mxu1 }
 0x137   :  { %v1418_v49 = vadd.f32 %v1417_v19, %v1416_v17  ;;  %v1446_v50 = vadd.f32 %v1445_v20, %v1444_v18  ;;  %v1264_v17 = vld [vmem:[%s2152_s2] ss:$0 sm:$0xff] }
 0x138   :  { %v1419_v21 = vpop.f32.mrf.mxu0  ;;  %v1447_v22 = vpop.f32.mrf.mxu1 }
 0x139   :  { %v852_v55 = vadd.f32 %v1446_v50, %v1418_v49 }
 0x13a   :  { %v1420_v23 = vpop.f32.mrf.mxu0  ;;  %v1448_v24 = vpop.f32.mrf.mxu1 }
 0x13b   :  { %v1421_v58 = vadd.f32 %v1420_v23, %v1419_v21  ;;  %v1449_v59 = vadd.f32 %v1448_v24, %v1447_v22 }
 0x13c   :  { %v1422_v25 = vpop.f32.mrf.mxu0  ;;  %v1450_v26 = vpop.f32.mrf.mxu1 }
 0x13d   :  { %v855_v39 = vadd.f32 %v1449_v59, %v1421_v58 }
 0x13e   :  { %v1423_v27 = vpop.f32.mrf.mxu0  ;;  %v1451_v28 = vpop.f32.mrf.mxu1 }
 0x13f   :  { %v1424_v33 = vadd.f32 %v1423_v27, %v1422_v25  ;;  %v1452_v34 = vadd.f32 %v1451_v28, %v1450_v26 }
 0x140   :  { %v1425_v29 = vpop.f32.mrf.mxu0  ;;  %v1453_v30 = vpop.f32.mrf.mxu1 }
 0x141   :  { %v860_v8 = vadd.f32 %v1452_v34, %v1424_v33 }
 0x142   :  { %v1426_v31 = vpop.f32.mrf.mxu0  ;;  %v1454_v36 = vpop.f32.mrf.mxu1 }
 0x144   :  { %v1558_v37 = vpop.f32.mrf.mxu0 }
 0x145   :  { %v908_v14 = vadd.f32 %v1558_v37, %v860_v8 }
 0x146   :  { %v899_v40 = vpop.f32.mrf.mxu0 }
 0x147   :  { %v900_v60 = vadd.f32 %v899_v40, %v852_v55  ;;  %v915_v28 = vmax.f32 %v710_v16, %v908_v14 }
 0x148   :  { %v1559_v41 = vpop.f32.mrf.mxu0 }
 0x149   :  { %v913_v2 = vmax.f32 %v708_v5, %v900_v60 }
 0x14a   :  { %v902_v53 = vpop.f32.mrf.mxu0 }
 0x14b   :  { %v903_v6 = vadd.f32 %v902_v53, %v855_v39 }
 0x14d   :  { %v914_v5 = vmax.f32 %v709_v12, %v903_v6 }
 0x154   :  { %v1478_v42 = vpop.f32.mrf.mxu1 }
 0x156   :  { %v1479_v43 = vpop.f32.mrf.mxu1 }
 0x157   :  { %v1480_v63 = vadd.f32 %v1479_v43, %v1478_v42 }
 0x158   :  { %v1481_v44 = vpop.f32.mrf.mxu1 }
 0x15a   :  { %v1482_v45 = vpop.f32.mrf.mxu1 }
 0x15b   :  { %v1483_v1 = vadd.f32 %v1482_v45, %v1481_v44 }
 0x15c   :  { %v1484_v47 = vpop.f32.mrf.mxu1 }
 0x15e   :  { %v1485_v48 = vpop.f32.mrf.mxu1 }
 0x15f   :  { %v1486_v20 = vadd.f32 %v1485_v48, %v1484_v47 }
 0x160   :  { %v1487_v52 = vpop.f32.mrf.mxu1 }
 0x162   :  { %v1488_v54 = vpop.f32.mrf.mxu1 }
 0x164   :  { %v1506_v56 = vpop.f32.mrf.mxu0  ;;  %v1570_v57 = vpop.f32.mrf.mxu1 }
 0x166   :  { %v1507_v61 = vpop.f32.mrf.mxu0  ;;  %v1104_v62 = vpop.f32.mrf.mxu1 }
 0x167   :  { %v1508_v32 = vadd.f32 %v1507_v61, %v1506_v56 }
 0x168   :  { %v1509_v35 = vpop.f32.mrf.mxu0  ;;  %v1571_v38 = vpop.f32.mrf.mxu1 }
 0x169   :  { %v1057_v0 = vadd.f32 %v1508_v32, %v1480_v63 }
 0x16a   :  { %v1510_v4 = vpop.f32.mrf.mxu0  ;;  %v1107_v18 = vpop.f32.mrf.mxu1 }
 0x16b   :  { %v1105_v3 = vadd.f32 %v1104_v62, %v1057_v0  ;;  %v1511_v7 = vadd.f32 %v1510_v4, %v1509_v35 }
 0x16c   :  { %v1512_v10 = vpop.f32.mrf.mxu0 }
 0x16d   :  { %v1118_v11 = vmax.f32 %v913_v2, %v1105_v3  ;;  %v1060_v13 = vadd.f32 %v1511_v7, %v1483_v1 }
 0x16e   :  { %v1513_v19 = vpop.f32.mrf.mxu0 }
 0x16f   :  { %v1108_v21 = vadd.f32 %v1107_v18, %v1060_v13  ;;  %v1514_v22 = vadd.f32 %v1513_v19, %v1512_v10  ;;  %v1127_v24 = vadd.f32 %v1264_v17, %v1118_v11 }
 0x170   :  { %v1515_v23 = vpop.f32.mrf.mxu0 }
 0x171   :  { %v1119_v25 = vmax.f32 %v914_v5, %v1108_v21  ;;  %v1065_v26 = vadd.f32 %v1514_v22, %v1486_v20  ;;  %v1130_v31 = vmax.f32 %v1127_v24, 0.0 }
 0x172   :  { %v1516_v27 = vpop.f32.mrf.mxu0 }
 0x173   :  { %v1128_v29 = vadd.f32 %v1264_v17, %v1119_v25  ;;  %v1113_v30 = vadd.f32 %v1570_v57, %v1065_v26 }
 0x175   :  { %v1131_v36 = vmax.f32 %v1128_v29, 0.0  ;;  %v1120_v37 = vmax.f32 %v915_v28, %v1113_v30 }
 0x177   :  { %v1274_v40 = vpack.c.bf16 %v1131_v36, %v1130_v31  ;;  %v1129_v51 = vadd.f32 %v1264_v17, %v1120_v37 }
 0x179   :  { %1275 = vst [vmem:[%s2153_s3] sm:$0xff] %v1274_v40   ;;  %v1132_v9 = vmax.f32 %v1129_v51, 0.0 }
 0x17b   :  { %v1270_v12 = vpack.c.bf16 %v1132_v9, %v1132_v9 }
 0x17d   :  { %1148 = vst [vmem:[%s2153_s3 + $0x8] sm:$0x1] %v1270_v12 }

// kernel: forward.9
= control target key start
LH: loop header
LB: loop body
LE: loop exit
PB: predicated region body
PF: predicated region fallthrough
CT: control target
= control target key end

     0   :  { %v181_v35 = vlaneseq  ;;  %v2113_v36 = vmov 1966171168   ;;  %vm2116_vm0 = vmmov 0   ;;  %s2759_s1 = inlined_call_operand.vmem [shape: bf16[1152,256], index: 1, kind: input, shape index: {}]   ;;  %s2760_s0 = inlined_call_operand.vmem [shape: bf16[2,1152], index: 0, kind: input, shape index: {}]   ;;  %s2761_s3 = inlined_call_operand.vmem [shape: bf16[256,128], index: 3, kind: input, shape index: {}]   ;;  %s2762_s5 = inlined_call_operand.vmem [shape: bf16[128,128], index: 5, kind: input, shape index: {}]   ;;  %s2763_s2 = inlined_call_operand.vmem [shape: f32[1,256], index: 2, kind: input, shape index: {}]   ;;  %s2764_s7 = inlined_call_operand.vmem [shape: bf16[128,128], index: 7, kind: input, shape index: {}]   ;;  %s2765_s4 = inlined_call_operand.vmem [shape: f32[1,128], index: 4, kind: input, shape index: {}]   ;;  %s2766_s6 = inlined_call_operand.vmem [shape: f32[1,128], index: 6, kind: input, shape index: {}]   ;;  %s2767_s8 = inlined_call_operand.vmem [shape: f32[1,128], index: 8, kind: input, shape index: {}]   ;;  %s2768_s9 = inlined_call_operand.vmem [shape: f32[2,128], index: 9, kind: output, shape index: {}]  }
   0x1   :  { %v1864_v0 = vld [vmem:[%s2759_s1 + $0x74] ss:$8 sps:$4 sm:$0xff]   ;;  %v1866_v1 = vld [vmem:[%s2759_s1 + $0x70] ss:$8 sps:$4 sm:$0xff]   ;;  %v1870_v4 = vld [vmem:[%s2759_s1 + $0x64] ss:$8 sps:$4 sm:$0xff]   ;;  %v195_v37 = vunpack.c.l.s4 %v2113_v36 }
   0x2   :  { %985 = vmatprep.subr.bf16.mxu0 %v1864_v0  ;;  %v1867_v2 = vld [vmem:[%s2759_s1 + $0x174] ss:$8 sps:$4 sm:$0xff]   ;;  %v1869_v3 = vld [vmem:[%s2759_s1 + $0x170] ss:$8 sps:$4 sm:$0xff]   ;;  %v1872_v5 = vld [vmem:[%s2759_s1 + $0x60] ss:$8 sps:$4 sm:$0xff]  }
   0x3   :  { %986 = vmatpush1.bf16.msra.mxu0 %v1866_v1  ;;  %1026 = vmatprep.subr.bf16.mxu1 %v1867_v2  ;;  %v1873_v6 = vld [vmem:[%s2759_s1 + $0x164] ss:$8 sps:$4 sm:$0xff]   ;;  %v1875_v7 = vld [vmem:[%s2759_s1 + $0x160] ss:$8 sps:$4 sm:$0xff]   ;;  %v1876_v8 = vld [vmem:[%s2759_s1 + $0x54] ss:$8 sps:$4 sm:$0xff]   ;;  %v196_v43 = vunpack.c.0.s8 %v195_v37 }
   0x4   :  { %1027 = vmatpush1.bf16.msra.mxu1 %v1869_v3  ;;  %987 = vmatprep.subr.bf16.mxu0 %v1870_v4  ;;  %v1878_v9 = vld [vmem:[%s2759_s1 + $0x50] ss:$8 sps:$4 sm:$0xff]   ;;  %v1879_v10 = vld [vmem:[%s2759_s1 + $0x154] ss:$8 sps:$4 sm:$0xff]   ;;  %v1882_v11 = vld [vmem:[%s2759_s1 + $0x44] ss:$8 sps:$4 sm:$0xff]  }
   0x5   :  { %1028 = vmatprep.subr.bf16.mxu1 %v1873_v6  ;;  %v1881_v12 = vld [vmem:[%s2759_s1 + $0x150] ss:$8 sps:$4 sm:$0xff]   ;;  %v1885_v13 = vld [vmem:[%s2759_s1 + $0x144] ss:$8 sps:$4 sm:$0xff]   ;;  %v1884_v14 = vld [vmem:[%s2759_s1 + $0x40] ss:$8 sps:$4 sm:$0xff]  }
   0x6   :  { %v1888_v15 = vld [vmem:[%s2759_s1 + $0x34] ss:$8 sps:$4 sm:$0xff]   ;;  %v1887_v16 = vld [vmem:[%s2759_s1 + $0x140] ss:$8 sps:$4 sm:$0xff]   ;;  %v1890_v18 = vld [vmem:[%s2759_s1 + $0x30] ss:$8 sps:$4 sm:$0xff]  }
   0x7   :  { %988 = vmatpush1.bf16.msra.mxu0 %v1872_v5  ;;  %v1891_v17 = vld [vmem:[%s2759_s1 + $0x134] ss:$8 sps:$4 sm:$0xff]   ;;  %v1894_v19 = vld [vmem:[%s2759_s1 + $0x24] ss:$8 sps:$4 sm:$0xff]   ;;  %v1893_v20 = vld [vmem:[%s2759_s1 + $0x130] ss:$8 sps:$4 sm:$0xff]  }
   0x8   :  { %989 = vmatprep.subr.bf16.mxu0 %v1876_v8  ;;  %1029 = vmatpush1.bf16.msra.mxu1 %v1875_v7  ;;  %v1897_v21 = vld [vmem:[%s2759_s1 + $0x124] ss:$8 sps:$4 sm:$0xff]   ;;  %v1896_v22 = vld [vmem:[%s2759_s1 + $0x20] ss:$8 sps:$4 sm:$0xff]   ;;  %v1900_v23 = vld [vmem:[%s2759_s1 + $0x14] ss:$8 sps:$4 sm:$0xff]  }
   0x9   :  { %1030 = vmatprep.subr.bf16.mxu1 %v1879_v10  ;;  %v1899_v24 = vld [vmem:[%s2759_s1 + $0x120] ss:$8 sps:$4 sm:$0xff]   ;;  %v1903_v25 = vld [vmem:[%s2759_s1 + $0x114] ss:$8 sps:$4 sm:$0xff]   ;;  %v1902_v26 = vld [vmem:[%s2759_s1 + $0x10] ss:$8 sps:$4 sm:$0xff]  }
   0xa   :  { %v1906_v27 = vld [vmem:[%s2759_s1 + $0x4] ss:$8 sps:$4 sm:$0xff]   ;;  %v1905_v28 = vld [vmem:[%s2759_s1 + $0x110] ss:$8 sps:$4 sm:$0xff]   ;;  %v1908_v30 = vld [vmem:[%s2759_s1] ss:$8 sps:$4 sm:$0xff]  }
   0xb   :  { %990 = vmatpush1.bf16.msra.mxu0 %v1878_v9  ;;  %v1909_v29 = vld [vmem:[%s2759_s1 + $0x104] ss:$8 sps:$4 sm:$0xff]   ;;  %v1912_v31 = vld [vmem:[%s2759_s1 + $0xf4] ss:$8 sps:$4 sm:$0xff]   ;;  %v1911_v32 = vld [vmem:[%s2759_s1 + $0x100] ss:$8 sps:$4 sm:$0xff]  }
   0xc   :  { %991 = vmatprep.subr.bf16.mxu0 %v1882_v11  ;;  %1031 = vmatpush1.bf16.msra.mxu1 %v1881_v12  ;;  %v1915_v33 = vld [vmem:[%s2759_s1 + $0x1f4] ss:$8 sps:$4 sm:$0xff]   ;;  %v1914_v34 = vld [vmem:[%s2759_s1 + $0xf0] ss:$8 sps:$4 sm:$0xff]   ;;  %v1918_v38 = vld [vmem:[%s2759_s1 + $0xe4] ss:$8 sps:$4 sm:$0xff]  }
   0xd   :  { %1032 = vmatprep.subr.bf16.mxu1 %v1885_v13  ;;  %v1917_v39 = vld [vmem:[%s2759_s1 + $0x1f0] ss:$8 sps:$4 sm:$0xff]   ;;  %v1921_v40 = vld [vmem:[%s2759_s1 + $0x1e4] ss:$8 sps:$4 sm:$0xff]   ;;  %v1920_v41 = vld [vmem:[%s2759_s1 + $0xe0] ss:$8 sps:$4 sm:$0xff]  }
   0xe   :  { %v2284_v42 = vshrl.u32 %v181_v35, 7  ;;  %v1924_v44 = vld [vmem:[%s2759_s1 + $0xd4] ss:$8 sps:$4 sm:$0xff]   ;;  %v1923_v45 = vld [vmem:[%s2759_s1 + $0x1e0] ss:$8 sps:$4 sm:$0xff]  }
   0xf   :  { %992 = vmatpush1.bf16.msra.mxu0 %v1884_v14  ;;  %v1927_v46 = vld [vmem:[%s2759_s1 + $0x1d4] ss:$8 sps:$4 sm:$0xff]   ;;  %v1926_v47 = vld [vmem:[%s2759_s1 + $0xd0] ss:$8 sps:$4 sm:$0xff]   ;;  %v1930_v49 = vld [vmem:[%s2759_s1 + $0xc4] ss:$8 sps:$4 sm:$0xff]  }
  0x10   :  { %993 = vmatprep.subr.bf16.mxu0 %v1888_v15  ;;  %1033 = vmatpush1.bf16.msra.mxu1 %v1887_v16  ;;  %v2299_v48 = vsub.s32 %v196_v43, %v2284_v42  ;;  %v1929_v50 = vld [vmem:[%s2759_s1 + $0x1d0] ss:$8 sps:$4 sm:$0xff]   ;;  %v1933_v51 = vld [vmem:[%s2759_s1 + $0x1c4] ss:$8 sps:$4 sm:$0xff]   ;;  %v1932_v53 = vld [vmem:[%s2759_s1 + $0xc0] ss:$8 sps:$4 sm:$0xff]  }
  0x11   :  { %1034 = vmatprep.subr.bf16.mxu1 %v1891_v17  ;;  %v178_v52 = vld [vmem:[%s2760_s0] sm:$0xff]  ;;  %v1936_v56 = vld [vmem:[%s2759_s1 + $0xb4] ss:$8 sps:$4 sm:$0xff]   ;;  %v1938_v61 = vld [vmem:[%s2759_s1 + $0xb0] ss:$8 sps:$4 sm:$0xff]  }
  0x12   :  { %v193_v54 = vcombine.high %v178_v52, %v178_v52  ;;  %v200_v55 = vrot.slane %v178_v52, %v2299_v48  ;;  %v1935_v57 = vld [vmem:[%s2759_s1 + $0x1c0] ss:$8 sps:$4 sm:$0xff]   ;;  %v1939_v60 = vld [vmem:[%s2759_s1 + $0x1b4] ss:$8 sps:$4 sm:$0xff]   ;;  %v1942_v0 = vld [vmem:[%s2759_s1 + $0xa4] ss:$8 sps:$4 sm:$0xff]  }
  0x13   :  { %994 = vmatpush1.bf16.msra.mxu0 %v1890_v18  ;;  %v1941_v1 = vld [vmem:[%s2759_s1 + $0x1b0] ss:$8 sps:$4 sm:$0xff]   ;;  %v1945_v3 = vld [vmem:[%s2759_s1 + $0x1a4] ss:$8 sps:$4 sm:$0xff]   ;;  %v1944_v4 = vld [vmem:[%s2759_s1 + $0xa0] ss:$8 sps:$4 sm:$0xff]  }
  0x14   :  { %995 = vmatprep.subr.bf16.mxu0 %v1894_v19  ;;  %1035 = vmatpush1.bf16.msra.mxu1 %v1893_v20  ;;  %v208_v58 = vcombine.high %v200_v55, %v200_v55  ;;  %v207_v59 = vrot.slane %v193_v54, %v2299_v48  ;;  %v1948_v5 = vld [vmem:[%s2759_s1 + $0x94] ss:$8 sps:$4 sm:$0xff]   ;;  %v1947_v6 = vld [vmem:[%s2759_s1 + $0x1a0] ss:$8 sps:$4 sm:$0xff]   ;;  %v1950_v8 = vld [vmem:[%s2759_s1 + $0x90] ss:$8 sps:$4 sm:$0xff]   ;;  %v216_v14 = vrot.slane %v200_v55, %v2299_v48 }
  0x15   :  { %1036 = vmatprep.subr.bf16.mxu1 %v1897_v21  ;;  %v1951_v7 = vld [vmem:[%s2759_s1 + $0x194] ss:$8 sps:$4 sm:$0xff]   ;;  %v1954_v9 = vld [vmem:[%s2759_s1 + $0x84] ss:$8 sps:$4 sm:$0xff]   ;;  %v1953_v10 = vld [vmem:[%s2759_s1 + $0x190] ss:$8 sps:$4 sm:$0xff]  }
  0x16   :  { %v230_v62 = vrot.slane %v208_v58, %v2299_v48  ;;  %v2332_v63 = vrot.slane %v207_v59, %v2299_v48  ;;  %v209_v11 = vcombine.high %v207_v59, %v207_v59  ;;  %v1957_v12 = vld [vmem:[%s2759_s1 + $0x184] ss:$8 sps:$4 sm:$0xff]   ;;  %v1956_v13 = vld [vmem:[%s2759_s1 + $0x80] ss:$8 sps:$4 sm:$0xff]   ;;  %v1963_v15 = vld [vmem:[%s2759_s1 + $0x274] ss:$8 sps:$4 sm:$0xff]   ;;  %v238_v20 = vcombine.high %v216_v14, %v216_v14 }
  0x17   :  { %996 = vmatpush1.bf16.msra.mxu0 %v1896_v22  ;;  %v1960_v16 = vld [vmem:[%s2759_s1 + $0x180] ss:$8 sps:$4 sm:$0xff]   ;;  %v1966_v18 = vld [vmem:[%s2759_s1 + $0x374] ss:$8 sps:$4 sm:$0xff]   ;;  %v1961_v19 = vld [vmem:[%s2759_s1 + $0x270] ss:$8 sps:$4 sm:$0xff]  }
  0x18   :  { %997 = vmatprep.subr.bf16.mxu0 %v1900_v23  ;;  %1037 = vmatpush1.bf16.msra.mxu1 %v1899_v24  ;;  %v240_v2 = vcombine.high %v230_v62, %v230_v62  ;;  %v237_v17 = vrot.slane %v209_v11, %v2299_v48  ;;  %v1969_v21 = vld [vmem:[%s2759_s1 + $0x264] ss:$8 sps:$4 sm:$0xff]   ;;  %v1964_v22 = vld [vmem:[%s2759_s1 + $0x370] ss:$8 sps:$4 sm:$0xff]   ;;  %v1982_v35 = vld [vmem:[%s2759_s1 + $0x340] ss:$8 sps:$4 sm:$0xff]  }
  0x19   :  { %1038 = vmatprep.subr.bf16.mxu1 %v1903_v25  ;;  %1017 = vmatprep.mubr.bf16.mxu0 %v230_v62  ;;  %v1972_v24 = vld [vmem:[%s2759_s1 + $0x364] ss:$8 sps:$4 sm:$0xff]   ;;  %v1967_v25 = vld [vmem:[%s2759_s1 + $0x260] ss:$8 sps:$4 sm:$0xff]   ;;  %v1990_v36 = vld [vmem:[%s2759_s1 + $0x334] ss:$8 sps:$4 sm:$0xff]  }
  0x1a   :  { %1058 = vmatprep.mubr.bf16.mxu1 %v240_v2  ;;  %v241_v23 = vcombine.high %v237_v17, %v237_v17  ;;  %v1985_v37 = vld [vmem:[%s2759_s1 + $0x230] ss:$8 sps:$4 sm:$0xff]   ;;  %v1999_v43 = vld [vmem:[%s2759_s1 + $0x214] ss:$8 sps:$4 sm:$0xff]   ;;  %v2041_v11 = vld [vmem:[%s2759_s1 + $0x2a4] ss:$8 sps:$4 sm:$0xff]  }
  0x1b   :  { %998 = vmatpush1.bf16.msra.mxu0 %v1902_v26  ;;  %v1975_v26 = vld [vmem:[%s2759_s1 + $0x254] ss:$8 sps:$4 sm:$0xff]   ;;  %v2009_v55 = vld [vmem:[%s2759_s1 + $0x2f0] ss:$8 sps:$4 sm:$0xff]  }
  0x1c   :  { %999 = vmatprep.subr.bf16.mxu0 %v1906_v27  ;;  %1039 = vmatpush1.bf16.msra.mxu1 %v1905_v28  ;;  %v1970_v27 = vld [vmem:[%s2759_s1 + $0x360] ss:$8 sps:$4 sm:$0xff]   ;;  %v1978_v28 = vld [vmem:[%s2759_s1 + $0x354] ss:$8 sps:$4 sm:$0xff]   ;;  %v2012_v58 = vld [vmem:[%s2759_s1 + $0x3f0] ss:$8 sps:$4 sm:$0xff]  }
  0x1d   :  { %1040 = vmatprep.subr.bf16.mxu1 %v1909_v29  ;;  %v1973_v29 = vld [vmem:[%s2759_s1 + $0x250] ss:$8 sps:$4 sm:$0xff]   ;;  %v2011_v52 = vld [vmem:[%s2759_s1 + $0x2f4] ss:$8 sps:$4 sm:$0xff]  }
  0x1e   :  { %v2014_v54 = vld [vmem:[%s2759_s1 + $0x3f4] ss:$8 sps:$4 sm:$0xff]   ;;  %v2021_v2 = vld [vmem:[%s2759_s1 + $0x2d0] ss:$8 sps:$4 sm:$0xff]  }
  0x1f   :  { %1000 = vmatpush1.bf16.msra.mxu0 %v1908_v30  ;;  %v1981_v30 = vld [vmem:[%s2759_s1 + $0x244] ss:$8 sps:$4 sm:$0xff]   ;;  %v2023_v62 = vld [vmem:[%s2759_s1 + $0x2d4] ss:$8 sps:$4 sm:$0xff]  }
  0x20   :  { %1001 = vmatprep.subr.bf16.mxu0 %v1912_v31  ;;  %1041 = vmatpush1.bf16.msra.mxu1 %v1911_v32  ;;  %v1976_v31 = vld [vmem:[%s2759_s1 + $0x350] ss:$8 sps:$4 sm:$0xff]   ;;  %v1984_v32 = vld [vmem:[%s2759_s1 + $0x344] ss:$8 sps:$4 sm:$0xff]  }
  0x21   :  { %1042 = vmatprep.subr.bf16.mxu1 %v1915_v33  ;;  %v1979_v33 = vld [vmem:[%s2759_s1 + $0x240] ss:$8 sps:$4 sm:$0xff]  }
  0x23   :  { %1002 = vmatpush2.bf16.msra.mxu0 %v1914_v34  ;;  %v1987_v34 = vld [vmem:[%s2759_s1 + $0x234] ss:$8 sps:$4 sm:$0xff]  }
  0x24   :  { %1003 = vmatprep.subr.bf16.mxu0 %v1918_v38  ;;  %1043 = vmatpush2.bf16.msra.mxu1 %v1917_v39  ;;  %v1993_v38 = vld [vmem:[%s2759_s1 + $0x224] ss:$8 sps:$4 sm:$0xff]   ;;  %v1988_v39 = vld [vmem:[%s2759_s1 + $0x330] ss:$8 sps:$4 sm:$0xff]  }
  0x25   :  { %1044 = vmatprep.subr.bf16.mxu1 %v1921_v40  ;;  %v1996_v40 = vld [vmem:[%s2759_s1 + $0x324] ss:$8 sps:$4 sm:$0xff]  }
  0x27   :  { %1004 = vmatpush2.bf16.msra.mxu0 %v1920_v41  ;;  %v1991_v41 = vld [vmem:[%s2759_s1 + $0x220] ss:$8 sps:$4 sm:$0xff]  }
  0x28   :  { %1005 = vmatprep.subr.bf16.mxu0 %v1924_v44  ;;  %1045 = vmatpush2.bf16.msra.mxu1 %v1923_v45  ;;  %v1994_v44 = vld [vmem:[%s2759_s1 + $0x320] ss:$8 sps:$4 sm:$0xff]   ;;  %v2002_v45 = vld [vmem:[%s2759_s1 + $0x314] ss:$8 sps:$4 sm:$0xff]  }
  0x29   :  { %1046 = vmatprep.subr.bf16.mxu1 %v1927_v46  ;;  %v1997_v46 = vld [vmem:[%s2759_s1 + $0x210] ss:$8 sps:$4 sm:$0xff]  }
  0x2b   :  { %1006 = vmatpush2.bf16.msra.mxu0 %v1926_v47  ;;  %v2005_v47 = vld [vmem:[%s2759_s1 + $0x204] ss:$8 sps:$4 sm:$0xff]  }
  0x2c   :  { %1007 = vmatprep.subr.bf16.mxu0 %v1930_v49  ;;  %1047 = vmatpush2.bf16.msra.mxu1 %v1929_v50  ;;  %v2000_v49 = vld [vmem:[%s2759_s1 + $0x310] ss:$8 sps:$4 sm:$0xff]   ;;  %v2008_v50 = vld [vmem:[%s2759_s1 + $0x304] ss:$8 sps:$4 sm:$0xff]  }
  0x2d   :  { %1048 = vmatprep.subr.bf16.mxu1 %v1933_v51  ;;  %v2003_v51 = vld [vmem:[%s2759_s1 + $0x200] ss:$8 sps:$4 sm:$0xff]  }
  0x2f   :  { %1008 = vmatpush2.bf16.msra.mxu0 %v1932_v53  ;;  %v2006_v53 = vld [vmem:[%s2759_s1 + $0x300] ss:$8 sps:$4 sm:$0xff]  }
  0x30   :  { %1009 = vmatprep.subr.bf16.mxu0 %v1936_v56  ;;  %1049 = vmatpush2.bf16.msra.mxu1 %v1935_v57  ;;  %v2017_v56 = vld [vmem:[%s2759_s1 + $0x2e4] ss:$8 sps:$4 sm:$0xff]   ;;  %v2486_v57 = vld.sshfl [vmem:[%s2760_s0 + $0x8] sm:$0x1 pattern:$0x75316420] }
  0x31   :  { %1050 = vmatprep.subr.bf16.mxu1 %v1939_v60  ;;  %v255_v59 = vrot.slane %v2486_v57, %v2299_v48  ;;  %v2020_v60 = vld [vmem:[%s2759_s1 + $0x3e4] ss:$8 sps:$4 sm:$0xff]  }
  0x32   :  { %v2085_v48 = vld [vmem:[%s2761_s3 + $0x68] sm:$0xff]   ;;  %v2096_v57 = vld [vmem:[%s2761_s3] sm:$0xff]  }
  0x33   :  { %1010 = vmatpush2.bf16.msra.mxu0 %v1938_v61  ;;  %v2015_v61 = vld [vmem:[%s2759_s1 + $0x2e0] ss:$8 sps:$4 sm:$0xff]  }
  0x34   :  { %1011 = vmatprep.subr.bf16.mxu0 %v1942_v0  ;;  %1051 = vmatpush2.bf16.msra.mxu1 %v1941_v1  ;;  %v2018_v0 = vld [vmem:[%s2759_s1 + $0x3e0] ss:$8 sps:$4 sm:$0xff]   ;;  %v2026_v1 = vld [vmem:[%s2759_s1 + $0x3d4] ss:$8 sps:$4 sm:$0xff]  }
  0x35   :  { %1052 = vmatprep.subr.bf16.mxu1 %v1945_v3  ;;  %v2029_v3 = vld [vmem:[%s2759_s1 + $0x2c4] ss:$8 sps:$4 sm:$0xff]  }
  0x37   :  { %1012 = vmatpush2.bf16.msra.mxu0 %v1944_v4  ;;  %v2024_v4 = vld [vmem:[%s2759_s1 + $0x3d0] ss:$8 sps:$4 sm:$0xff]  }
  0x38   :  { %1013 = vmatprep.subr.bf16.mxu0 %v1948_v5  ;;  %1053 = vmatpush2.bf16.msra.mxu1 %v1947_v6  ;;  %v2032_v5 = vld [vmem:[%s2759_s1 + $0x3c4] ss:$8 sps:$4 sm:$0xff]   ;;  %v2027_v6 = vld [vmem:[%s2759_s1 + $0x2c0] ss:$8 sps:$4 sm:$0xff]  }
  0x39   :  { %1054 = vmatprep.subr.bf16.mxu1 %v1951_v7  ;;  %v2035_v7 = vld [vmem:[%s2759_s1 + $0x2b4] ss:$8 sps:$4 sm:$0xff]  }
  0x3b   :  { %1014 = vmatpush2.bf16.msra.mxu0 %v1950_v8  ;;  %v2030_v8 = vld [vmem:[%s2759_s1 + $0x3c0] ss:$8 sps:$4 sm:$0xff]  }
  0x3c   :  { %1015 = vmatprep.subr.bf16.mxu0 %v1954_v9  ;;  %1055 = vmatpush2.bf16.msra.mxu1 %v1953_v10  ;;  %v2038_v9 = vld [vmem:[%s2759_s1 + $0x3b4] ss:$8 sps:$4 sm:$0xff]   ;;  %v2033_v10 = vld [vmem:[%s2759_s1 + $0x2b0] ss:$8 sps:$4 sm:$0xff]  }
  0x3d   :  { %1056 = vmatprep.subr.bf16.mxu1 %v1957_v12  ;;  %v2036_v12 = vld [vmem:[%s2759_s1 + $0x3b0] ss:$8 sps:$4 sm:$0xff]  }
  0x3f   :  { %1016 = vmatpush2.bf16.msra.mxu0 %v1956_v13  ;;  %v2044_v13 = vld [vmem:[%s2759_s1 + $0x3a4] ss:$8 sps:$4 sm:$0xff]  }
  0x40   :  { %1067 = vmatprep.subr.bf16.mxu0 %v1963_v15  ;;  %1057 = vmatpush2.bf16.msra.mxu1 %v1960_v16  ;;  %v2047_v15 = vld [vmem:[%s2759_s1 + $0x294] ss:$8 sps:$4 sm:$0xff]   ;;  %v2042_v16 = vld [vmem:[%s2759_s1 + $0x3a0] ss:$8 sps:$4 sm:$0xff]  }
  0x41   :  { %1108 = vmatprep.subr.bf16.mxu1 %v1966_v18  ;;  %v2045_v18 = vld [vmem:[%s2759_s1 + $0x290] ss:$8 sps:$4 sm:$0xff]  }
  0x42   :  { %1018 = vmatmul.mubr.bf16.vlgmr.msra.gmra.mxu0 %v216_v14  ;;  %v2039_v14 = vld [vmem:[%s2759_s1 + $0x2a0] ss:$8 sps:$4 sm:$0xff]  }
  0x43   :  { %1068 = vmatpush1.bf16.msra.mxu0 %v1961_v19  ;;  %1099 = vmatprep.mubr.bf16.mxu0 %v237_v17  ;;  %v2050_v17 = vld [vmem:[%s2759_s1 + $0x394] ss:$8 sps:$4 sm:$0xff]   ;;  %v2053_v19 = vld [vmem:[%s2759_s1 + $0x284] ss:$8 sps:$4 sm:$0xff]  }
  0x44   :  { %1059 = vmatmul.mubr.bf16.vlgmr.msra.gmra.mxu1 %v238_v20  ;;  %1069 = vmatprep.subr.bf16.mxu0 %v1969_v21  ;;  %v2048_v20 = vld [vmem:[%s2759_s1 + $0x390] ss:$8 sps:$4 sm:$0xff]   ;;  %v2056_v21 = vld [vmem:[%s2759_s1 + $0x384] ss:$8 sps:$4 sm:$0xff]  }
  0x45   :  { %1109 = vmatpush1.bf16.msra.mxu1 %v1964_v22  ;;  %1140 = vmatprep.mubr.bf16.mxu1 %v241_v23  ;;  %v2051_v22 = vld [vmem:[%s2759_s1 + $0x280] ss:$8 sps:$4 sm:$0xff]   ;;  %v2059_v23 = vld [vmem:[%s2759_s1 + $0x474] ss:$8 sps:$4 sm:$0xff]  }
  0x46   :  { %1110 = vmatprep.subr.bf16.mxu1 %v1972_v24  ;;  %v2054_v24 = vld [vmem:[%s2759_s1 + $0x380] ss:$8 sps:$4 sm:$0xff]  }
  0x47   :  { %1070 = vmatpush1.bf16.msra.mxu0 %v1967_v25  ;;  %v2057_v25 = vld [vmem:[%s2759_s1 + $0x470] ss:$8 sps:$4 sm:$0xff]  }
  0x48   :  { %1071 = vmatprep.subr.bf16.mxu0 %v1975_v26  ;;  %v239_v26 = vcombine.high %v2332_v63, %v2332_v63 }
  0x49   :  { %1111 = vmatpush1.bf16.msra.mxu1 %v1970_v27  ;;  %v2062_v27 = vld [vmem:[%s2759_s1 + $0x464] ss:$8 sps:$4 sm:$0xff]  }
  0x4a   :  { %1112 = vmatprep.subr.bf16.mxu1 %v1978_v28  ;;  %v2060_v28 = vld [vmem:[%s2759_s1 + $0x460] ss:$8 sps:$4 sm:$0xff]  }
  0x4b   :  { %1072 = vmatpush1.bf16.msra.mxu0 %v1973_v29  ;;  %v2114_v29 = vmov 0  }
  0x4c   :  { %1073 = vmatprep.subr.bf16.mxu0 %v1981_v30  ;;  %v2065_v30 = vld [vmem:[%s2759_s1 + $0x454] ss:$8 sps:$4 sm:$0xff]  }
  0x4d   :  { %1113 = vmatpush1.bf16.msra.mxu1 %v1976_v31  ;;  %v2063_v31 = vld [vmem:[%s2759_s1 + $0x450] ss:$8 sps:$4 sm:$0xff]  }
  0x4e   :  { %1114 = vmatprep.subr.bf16.mxu1 %v1984_v32  ;;  %v2066_v32 = vld [vmem:[%s2759_s1 + $0x440] ss:$8 sps:$4 sm:$0xff]  }
  0x4f   :  { %1074 = vmatpush1.bf16.msra.mxu0 %v1979_v33  ;;  %v2071_v33 = vld [vmem:[%s2759_s1 + $0x434] ss:$8 sps:$4 sm:$0xff]  }
  0x50   :  { %1075 = vmatprep.subr.bf16.mxu0 %v1987_v34  ;;  %v2069_v34 = vld [vmem:[%s2759_s1 + $0x430] ss:$8 sps:$4 sm:$0xff]  }
  0x51   :  { %1115 = vmatpush1.bf16.msra.mxu1 %v1982_v35  ;;  %v2074_v35 = vld [vmem:[%s2759_s1 + $0x424] ss:$8 sps:$4 sm:$0xff]  }
  0x52   :  { %1116 = vmatprep.subr.bf16.mxu1 %v1990_v36  ;;  %v2072_v36 = vld [vmem:[%s2759_s1 + $0x420] ss:$8 sps:$4 sm:$0xff]  }
  0x53   :  { %1076 = vmatpush1.bf16.msra.mxu0 %v1985_v37  ;;  %v2077_v37 = vld [vmem:[%s2759_s1 + $0x414] ss:$8 sps:$4 sm:$0xff]  }
  0x54   :  { %1077 = vmatprep.subr.bf16.mxu0 %v1993_v38  ;;  %v2075_v38 = vld [vmem:[%s2759_s1 + $0x410] ss:$8 sps:$4 sm:$0xff]  }
  0x55   :  { %1117 = vmatpush1.bf16.msra.mxu1 %v1988_v39  ;;  %v2080_v39 = vld [vmem:[%s2759_s1 + $0x404] ss:$8 sps:$4 sm:$0xff]  }
  0x56   :  { %1118 = vmatprep.subr.bf16.mxu1 %v1996_v40  ;;  %v2078_v40 = vld [vmem:[%s2759_s1 + $0x400] ss:$8 sps:$4 sm:$0xff]  }
  0x57   :  { %1078 = vmatpush1.bf16.msra.mxu0 %v1991_v41  ;;  %v2081_v41 = vld [vmem:[%s2761_s3 + $0x78] sm:$0xff]  }
  0x58   :  { %1079 = vmatprep.subr.bf16.mxu0 %v1999_v43  ;;  %v2082_v43 = vld [vmem:[%s2761_s3 + $0x38] sm:$0xff]  }
  0x59   :  { %1119 = vmatpush1.bf16.msra.mxu1 %v1994_v44  ;;  %v2083_v44 = vld [vmem:[%s2761_s3 + $0x70] sm:$0xff]  }
  0x5a   :  { %1120 = vmatprep.subr.bf16.mxu1 %v2002_v45  ;;  %v2084_v45 = vld [vmem:[%s2761_s3 + $0x30] sm:$0xff]  }
  0x5b   :  { %1080 = vmatpush1.bf16.msra.mxu0 %v1997_v46  ;;  %v2086_v46 = vld [vmem:[%s2761_s3 + $0x28] sm:$0xff]  }
  0x5c   :  { %1081 = vmatprep.subr.bf16.mxu0 %v2005_v47  ;;  %v2087_v47 = vld [vmem:[%s2761_s3 + $0x60] sm:$0xff]  }
  0x5d   :  { %1121 = vmatpush1.bf16.msra.mxu1 %v2000_v49  ;;  %v2088_v49 = vld [vmem:[%s2761_s3 + $0x20] sm:$0xff]  }
  0x5e   :  { %1122 = vmatprep.subr.bf16.mxu1 %v2008_v50  ;;  %v2089_v50 = vld [vmem:[%s2761_s3 + $0x58] sm:$0xff]  }
  0x5f   :  { %1082 = vmatpush1.bf16.msra.mxu0 %v2003_v51  ;;  %v2090_v51 = vld [vmem:[%s2761_s3 + $0x18] sm:$0xff]  }
  0x60   :  { %1083 = vmatprep.subr.bf16.mxu0 %v2011_v52  ;;  %v2091_v52 = vld [vmem:[%s2761_s3 + $0x50] sm:$0xff]  }
  0x61   :  { %1123 = vmatpush1.bf16.msra.mxu1 %v2006_v53  ;;  %v2092_v53 = vld [vmem:[%s2761_s3 + $0x10] sm:$0xff]  }
  0x62   :  { %1124 = vmatprep.subr.bf16.mxu1 %v2014_v54  ;;  %v2093_v54 = vld [vmem:[%s2761_s3 + $0x48] sm:$0xff]  }
  0x63   :  { %1084 = vmatpush2.bf16.msra.mxu0 %v2009_v55  ;;  %v2094_v55 = vld [vmem:[%s2761_s3 + $0x8] sm:$0xff]  }
  0x64   :  { %1085 = vmatprep.subr.bf16.mxu0 %v2017_v56  ;;  %v2095_v56 = vld [vmem:[%s2761_s3 + $0x40] sm:$0xff]  }
  0x65   :  { %1125 = vmatpush2.bf16.msra.mxu1 %v2012_v58  ;;  %v2115_v58 = vmov 0.0  }
  0x66   :  { %1126 = vmatprep.subr.bf16.mxu1 %v2020_v60  ;;  %v2098_v60 = vld [vmem:[%s2762_s5 + $0x30] sm:$0xff]  }
  0x67   :  { %1086 = vmatpush2.bf16.msra.mxu0 %v2015_v61  ;;  %v2099_v61 = vld [vmem:[%s2762_s5 + $0x28] sm:$0xff]  }
  0x68   :  { %1087 = vmatprep.subr.bf16.mxu0 %v2023_v62  ;;  %v2100_v62 = vld [vmem:[%s2762_s5 + $0x20] sm:$0xff]  }
  0x69   :  { %1127 = vmatpush2.bf16.msra.mxu1 %v2018_v0  ;;  %v183_v0 = vsub.s32 0, %v2284_v42 }
  0x6a   :  { %1128 = vmatprep.subr.bf16.mxu1 %v2026_v1  ;;  %v2101_v1 = vld [vmem:[%s2762_s5 + $0x18] sm:$0xff]  }
  0x6b   :  { %1088 = vmatpush2.bf16.msra.mxu0 %v2021_v2  ;;  %v177_v2 = vld [vmem:[%s2763_s2] sm:$0x3] }
  0x6c   :  { %1089 = vmatprep.subr.bf16.mxu0 %v2029_v3  ;;  %v187_v3 = vsub.s32 1, %v2284_v42 }
  0x6d   :  { %1129 = vmatpush2.bf16.msra.mxu1 %v2024_v4  ;;  %v184_v4 = vrot.slane %v177_v2, %v183_v0 }
  0x6e   :  { %1130 = vmatprep.subr.bf16.mxu1 %v2032_v5  ;;  %v188_v5 = vrot.slane %v177_v2, %v187_v3 }
  0x6f   :  { %1090 = vmatpush2.bf16.msra.mxu0 %v2027_v6 }
  0x70   :  { %1091 = vmatprep.subr.bf16.mxu0 %v2035_v7 }
  0x71   :  { %1131 = vmatpush2.bf16.msra.mxu1 %v2030_v8 }
  0x72   :  { %1132 = vmatprep.subr.bf16.mxu1 %v2038_v9 }
  0x73   :  { %1092 = vmatpush2.bf16.msra.mxu0 %v2033_v10 }
  0x74   :  { %1093 = vmatprep.subr.bf16.mxu0 %v2041_v11 }
  0x75   :  { %1133 = vmatpush2.bf16.msra.mxu1 %v2036_v12 }
  0x76   :  { %1134 = vmatprep.subr.bf16.mxu1 %v2044_v13 }
  0x77   :  { %1094 = vmatpush2.bf16.msra.mxu0 %v2039_v14 }
  0x78   :  { %1095 = vmatprep.subr.bf16.mxu0 %v2047_v15 }
  0x79   :  { %1135 = vmatpush2.bf16.msra.mxu1 %v2042_v16 }
  0x7a   :  { %1136 = vmatprep.subr.bf16.mxu1 %v2050_v17 }
  0x7b   :  { %1096 = vmatpush2.bf16.msra.mxu0 %v2045_v18 }
  0x7c   :  { %1097 = vmatprep.subr.bf16.mxu0 %v2053_v19 }
  0x7d   :  { %1137 = vmatpush2.bf16.msra.mxu1 %v2048_v20 }
  0x7e   :  { %1138 = vmatprep.subr.bf16.mxu1 %v2056_v21 }
  0x7f   :  { %1098 = vmatpush2.bf16.msra.mxu0 %v2051_v22 }
  0x80   :  { %1149 = vmatprep.subr.bf16.mxu0 %v2059_v23 }
  0x81   :  { %1139 = vmatpush2.bf16.msra.mxu1 %v2054_v24 }
  0x82   :  { %1100 = vmatmul.mubr.bf16.vlgmr.msra.gmra.mxu0 %v2332_v63  ;;  %v2068_v63 = vld [vmem:[%s2759_s1 + $0x444] ss:$8 sps:$4 sm:$0xff]   ;;  %1780 = vmatprep.subr.bf16.mxu1 %v2081_v41  ;;  %v2105_v41 = vld [vmem:[%s2764_s7 + $0x38] sm:$0xff]  }
  0x83   :  { %1150 = vmatpush1.bf16.msra.mxu0 %v2057_v25  ;;  %1181 = vmatprep.mubr.bf16.mxu0 %v2114_v29 }
  0x84   :  { %1141 = vmatmul.mubr.bf16.vlgmr.msra.gmra.mxu1 %v239_v26  ;;  %1151 = vmatprep.subr.bf16.mxu0 %v2062_v27 }
  0x85   :  { %1781 = vmatpush3.bf16.msra.mxu1 %v2082_v43  ;;  %v2106_v43 = vld [vmem:[%s2764_s7 + $0x30] sm:$0xff]  }
  0x86   :  { %1782 = vmatprep.subr.bf16.mxu1 %v2083_v44  ;;  %v2107_v44 = vld [vmem:[%s2764_s7 + $0x28] sm:$0xff]  }
  0x87   :  { %1152 = vmatpush1.bf16.msra.mxu0 %v2060_v28 }
  0x88   :  { %1153 = vmatprep.subr.bf16.mxu0 %v2065_v30 }
  0x89   :  { %1783 = vmatpush3.bf16.msra.mxu1 %v2084_v45  ;;  %v2108_v45 = vld [vmem:[%s2764_s7 + $0x20] sm:$0xff]  }
  0x8a   :  { %1784 = vmatprep.subr.bf16.mxu1 %v2085_v48  ;;  %v2109_v48 = vld [vmem:[%s2764_s7 + $0x18] sm:$0xff]  }
  0x8b   :  { %1154 = vmatpush1.bf16.msra.mxu0 %v2063_v31 }
  0x8c   :  { %1155 = vmatprep.subr.bf16.mxu0 %v2068_v63 }
  0x8d   :  { %1785 = vmatpush3.bf16.msra.mxu1 %v2086_v46  ;;  %v2110_v46 = vld [vmem:[%s2764_s7 + $0x10] sm:$0xff]  }
  0x8e   :  { %1786 = vmatprep.subr.bf16.mxu1 %v2087_v47 }
  0x8f   :  { %1156 = vmatpush1.bf16.msra.mxu0 %v2066_v32 }
  0x90   :  { %1157 = vmatprep.subr.bf16.mxu0 %v2071_v33 }
  0x91   :  { %1787 = vmatpush3.bf16.msra.mxu1 %v2088_v49  ;;  %v1745_v49 = vld [vmem:[%s2765_s4] ss:$0 sm:$0xff] }
  0x92   :  { %1788 = vmatprep.subr.bf16.mxu1 %v2089_v50 }
  0x93   :  { %1158 = vmatpush1.bf16.msra.mxu0 %v2069_v34 }
  0x94   :  { %1159 = vmatprep.subr.bf16.mxu0 %v2074_v35 }
  0x95   :  { %1789 = vmatpush3.bf16.msra.mxu1 %v2090_v51 }
  0x96   :  { %1790 = vmatprep.subr.bf16.mxu1 %v2091_v52 }
  0x97   :  { %1160 = vmatpush1.bf16.msra.mxu0 %v2072_v36 }
  0x98   :  { %1161 = vmatprep.subr.bf16.mxu0 %v2077_v37 }
  0x99   :  { %1791 = vmatpush3.bf16.msra.mxu1 %v2092_v53 }
  0x9a   :  { %1792 = vmatprep.subr.bf16.mxu1 %v2093_v54 }
  0x9b   :  { %1162 = vmatpush1.bf16.msra.mxu0 %v2075_v38  ;;  %v2102_v38 = vld [vmem:[%s2762_s5 + $0x10] sm:$0xff]  }
  0x9c   :  { %1163 = vmatprep.subr.bf16.mxu0 %v2080_v39  ;;  %v2103_v39 = vld [vmem:[%s2762_s5 + $0x8] sm:$0xff]  }
  0x9d   :  { %1793 = vmatpush3.bf16.msra.mxu1 %v2094_v55 }
  0x9e   :  { %1794 = vmatprep.subr.bf16.mxu1 %v2095_v56 }
  0x9f   :  { %1164 = vmatpush1.bf16.msra.mxu0 %v2078_v40  ;;  %v2104_v40 = vld [vmem:[%s2762_s5] sm:$0xff]  }
  0xa0   :  { %1820 = vmatprep.subr.bf16.mxu0 %v2115_v58 }
  0xa1   :  { %1795 = vmatpush3.bf16.msra.mxu1 %v2096_v57  ;;  %v2111_v57 = vld [vmem:[%s2764_s7 + $0x8] sm:$0xff]  }
  0xa2   :  { %1182 = vmatmul.mubr.bf16.vlgmr.msra.gmra.mxu0 %v255_v59  ;;  %v2097_v59 = vld [vmem:[%s2762_s5 + $0x38] sm:$0xff]   ;;  %1840 = vmatprep.subr.bf16.mxu1 %v2115_v58 }
  0xa3   :  { %1821 = vmatpush3.bf16.msra.mxu0 %v2097_v59  ;;  %1836 = vmatprep.mubr.msk.bf16.mxu0 %vm2116_vm0, %v2115_v58  ;;  %v2112_v59 = vld [vmem:[%s2764_s7] sm:$0xff]  }
  0xa4   :  { %1822 = vmatprep.subr.bf16.mxu0 %v2115_v58 }
  0xa7   :  { %1823 = vmatpush3.bf16.msra.mxu0 %v2098_v60  ;;  %v1762_v60 = vld [vmem:[%s2766_s6] ss:$0 sm:$0xff] }
  0xa8   :  { %1824 = vmatprep.subr.bf16.mxu0 %v2115_v58 }
  0xab   :  { %1825 = vmatpush3.bf16.msra.mxu0 %v2099_v61 }
  0xac   :  { %1826 = vmatprep.subr.bf16.mxu0 %v2115_v58 }
  0xaf   :  { %1827 = vmatpush3.bf16.msra.mxu0 %v2100_v62 }
  0xb0   :  { %1828 = vmatprep.subr.bf16.mxu0 %v2115_v58 }
  0xb3   :  { %1829 = vmatpush3.bf16.msra.mxu0 %v2101_v1 }
  0xb4   :  { %1830 = vmatprep.subr.bf16.mxu0 %v2115_v58 }
  0xb7   :  { %1831 = vmatpush3.bf16.msra.mxu0 %v2102_v38 }
  0xb8   :  { %1832 = vmatprep.subr.bf16.mxu0 %v2115_v58 }
  0xbb   :  { %1833 = vmatpush3.bf16.msra.mxu0 %v2103_v39 }
  0xbc   :  { %1834 = vmatprep.subr.bf16.mxu0 %v2115_v58 }
  0xbf   :  { %1835 = vmatpush3.bf16.msra.mxu0 %v2104_v40 }
 0x102   :  { %v1019_v6 = vpop.f32.mrf.mxu0 }
 0x103   :  { %v1020_v7 = vadd.f32 %v1019_v6, %v184_v4 }
 0x104   :  { %v1021_v8 = vpop.f32.mrf.mxu0  ;;  %v1060_v9 = vpop.f32.mrf.mxu1 }
 0x105   :  { %v1022_v10 = vadd.f32 %v1021_v8, %v188_v5  ;;  %v1061_v11 = vadd.f32 %v1060_v9, %v1020_v7 }
 0x106   :  { %v1023_v12 = vpop.f32.mrf.mxu0  ;;  %v1062_v13 = vpop.f32.mrf.mxu1 }
 0x107   :  { %v1063_v14 = vadd.f32 %v1062_v13, %v1022_v10 }
 0x108   :  { %v1024_v15 = vpop.f32.mrf.mxu0  ;;  %v1064_v16 = vpop.f32.mrf.mxu1 }
 0x10a   :  { %v1065_v17 = vpop.f32.mrf.mxu1 }
 0x142   :  { %v1101_v18 = vpop.f32.mrf.mxu0 }
 0x143   :  { %v1102_v25 = vadd.f32 %v1101_v18, %v1061_v11 }
 0x144   :  { %v1103_v19 = vpop.f32.mrf.mxu0  ;;  %v1142_v42 = vpop.f32.mrf.mxu1 }
 0x145   :  { %v1104_v26 = vadd.f32 %v1103_v19, %v1063_v14  ;;  %v1143_v27 = vadd.f32 %v1142_v42, %v1102_v25 }
 0x146   :  { %v1105_v20 = vpop.f32.mrf.mxu0  ;;  %v1144_v21 = vpop.f32.mrf.mxu1 }
 0x147   :  { %v1145_v29 = vadd.f32 %v1144_v21, %v1104_v26 }
 0x148   :  { %v1106_v22 = vpop.f32.mrf.mxu0  ;;  %v1146_v23 = vpop.f32.mrf.mxu1 }
 0x14a   :  { %v1147_v24 = vpop.f32.mrf.mxu1 }
 0x162   :  { %v1183_v28 = vpop.f32.mrf.mxu0 }
 0x163   :  { %v1184_v30 = vadd.f32 %v1183_v28, %v1143_v27 }
 0x164   :  { %v1185_v31 = vpop.f32.mrf.mxu0 }
 0x165   :  { %v1186_v63 = vadd.f32 %v1185_v31, %v1145_v29  ;;  %v1190_v32 = vmax.f32 %v1184_v30, 0.0 }
 0x166   :  { %v1187_v33 = vpop.f32.mrf.mxu0 }
 0x167   :  { %v1191_v34 = vmax.f32 %v1186_v63, 0.0  ;;  %v1192_v37 = vpack.c.bf16 %v1190_v32, %v1190_v32 }
 0x168   :  { %v1188_v35 = vpop.f32.mrf.mxu0 }
 0x169   :  { %v1193_v36 = vpack.c.bf16 %v1191_v34, %v1191_v34 }
 0x16b   :  { %1361 = vmatprep.mubr.bf16.mxu1 %v1193_v36 }
 0x16c   :  { %1362 = vmatmul.mubr.bf16.vlgmr.msra.gmra.mxu1 %v1192_v37 }
 0x16d   :  { %1856 = vmatprep.mubr.msk.bf16.mxu1 %vm2116_vm0, %v2115_v58  ;;  %1841 = vmatpush3.bf16.msra.mxu1 %v2105_v41 }
 0x16e   :  { %1842 = vmatprep.subr.bf16.mxu1 %v2115_v58 }
 0x171   :  { %1843 = vmatpush3.bf16.msra.mxu1 %v2106_v43 }
 0x172   :  { %1844 = vmatprep.subr.bf16.mxu1 %v2115_v58 }
 0x175   :  { %1845 = vmatpush3.bf16.msra.mxu1 %v2107_v44 }
 0x176   :  { %1846 = vmatprep.subr.bf16.mxu1 %v2115_v58 }
 0x179   :  { %1847 = vmatpush3.bf16.msra.mxu1 %v2108_v45 }
 0x17a   :  { %1848 = vmatprep.subr.bf16.mxu1 %v2115_v58 }
 0x17d   :  { %1849 = vmatpush3.bf16.msra.mxu1 %v2109_v48 }
 0x17e   :  { %1850 = vmatprep.subr.bf16.mxu1 %v2115_v58 }
 0x181   :  { %1851 = vmatpush3.bf16.msra.mxu1 %v2110_v46 }
 0x182   :  { %1852 = vmatprep.subr.bf16.mxu1 %v2115_v58 }
 0x185   :  { %1853 = vmatpush3.bf16.msra.mxu1 %v2111_v57 }
 0x186   :  { %1854 = vmatprep.subr.bf16.mxu1 %v2115_v58  ;;  %v1771_v58 = vld [vmem:[%s2767_s8] ss:$0 sm:$0xff] }
 0x189   :  { %1855 = vmatpush3.bf16.msra.mxu1 %v2112_v59 }
 0x22c   :  { %v1796_v47 = vpop.f32.mrf.mxu1 }
 0x22e   :  { %v1797_v50 = vpop.f32.mrf.mxu1 }
 0x22f   :  { %v1798_v51 = vadd.f32 %v1797_v50, %v1796_v47 }
 0x230   :  { %v1799_v52 = vpop.f32.mrf.mxu1 }
 0x231   :  { %v1364_v53 = vadd.f32 %v1798_v51, %v1745_v49 }
 0x232   :  { %v1800_v54 = vpop.f32.mrf.mxu1 }
 0x233   :  { %v1369_v55 = vmax.f32 %v1364_v53, 0.0 }
 0x235   :  { %v1370_v56 = vpack.c.bf16 %v1369_v55, %v1369_v55 }
 0x237   :  { %1837 = vmatmul.mubr.bf16.vlgmr.msra.gmra.mxu0 %v1370_v56 }
 0x2f7   :  { %v1476_v61 = vpop.f32.mrf.mxu0 }
 0x2f8   :  { %v1477_v62 = vadd.f32 %v1762_v60, %v1476_v61 }
 0x2f9   :  { %v1838_v0 = vpop.f32.mrf.mxu0 }
 0x2fa   :  { %v1482_v1 = vmax.f32 %v1477_v62, 0.0 }
 0x2fb   :  { %v1479_v2 = vpop.f32.mrf.mxu0 }
 0x2fc   :  { %v1483_v3 = vpack.c.bf16 %v1482_v1, %v1482_v1 }
 0x2fd   :  { %v1839_v4 = vpop.f32.mrf.mxu0 }
 0x2fe   :  { %1857 = vmatmul.mubr.bf16.vlgmr.msra.gmra.mxu1 %v1483_v3 }
 0x3be   :  { %v1589_v5 = vpop.f32.mrf.mxu1 }
 0x3bf   :  { %v1590_v6 = vadd.f32 %v1771_v58, %v1589_v5 }
 0x3c0   :  { %v1858_v7 = vpop.f32.mrf.mxu1 }
 0x3c1   :  { %1595 = vst [vmem:[%s2768_s9] sm:$0x3] %v1590_v6 }
 0x3c2   :  { %v1592_v8 = vpop.f32.mrf.mxu1 }
 0x3c4   :  { %v1859_v9 = vpop.f32.mrf.mxu1 }

</bundles_post_ra>
